<compile_context>
chip_gen: v7x
topology: tpu7x:2x2x1
jax: 0.10.0
libtpu: 0.0.40
codegen_flags: <defaults>
</compile_context>

<pallas_src>
import numpy as np
import jax
import jax.numpy as jnp
from jax import lax
from jax.experimental import pallas as pl
from jax.experimental.pallas import tpu as pltpu  # noqa: F401  (available for CompilerParams if needed)

# ----------------------------------------------------------------------------
# constants from the torch module
# ----------------------------------------------------------------------------
BOS_POSE_AIST = np.array([
    0.01340632513165474, 1.6259130239486694, -0.09833218157291412,
    0.0707249641418457, 1.5451008081436157, -0.12474726885557175,
    -0.04773886129260063, 1.536355972290039, -0.11427298933267593,
    0.015812935307621956, 1.7525817155838013, -0.12864114344120026,
    0.13902147114276886, 1.1639258861541748, -0.0879698246717453,
    -0.10036090016365051, 1.1553057432174683, -0.08047012239694595,
    0.006522613577544689, 1.8904004096984863, -0.10235153883695602,
    0.07891514897346497, 0.7553867101669312, -0.20340093970298767,
    -0.037818294018507004, 0.7545002698898315, -0.1963980495929718,
    0.00045378319919109344, 1.9454832077026367, -0.09329807013273239,
    0.11616306006908417, 0.668250560760498, -0.0974099189043045,
    -0.05322670564055443, 0.6652328968048096, -0.07871627062559128,
    -0.014527007937431335, 2.159270763397217, -0.08067376166582108,
    0.0712718814611435, 2.0614874362945557, -0.08859370648860931,
    -0.08343493938446045, 2.0597264766693115, -0.09117652475833893,
    -0.002253010869026184, 2.244560718536377, -0.024742677807807922,
    0.19795098900794983, 2.098480463027954, -0.09858542680740356,
    -0.20080527663230896, 2.0911219120025635, -0.0731159895658493,
    0.30632710456848145, 1.8656978607177734, -0.09286995232105255,
    -0.3086402714252472, 1.8520605564117432, -0.06464222073554993,
    0.25927090644836426, 1.632638931274414, 0.02665536105632782,
    -0.2640104591846466, 1.6051883697509766, 0.0331537127494812,
    0.2306937426328659, 1.5523173809051514, 0.051218822598457336,
    -0.24223697185516357, 1.5211939811706543, 0.05606864392757416],
    dtype=np.float64)

# small, shape-consistent config (matches the module constructor wiring)
CFG = dict(
    max_seq_len=32,
    d_frame_vec=16,      # music feature dim (encoder input_size)
    frame_emb_size=32,   # encoder d_word_vec (== d_model, needed for residual)
    n_layers=2,
    n_head=2,
    d_k=16,
    d_v=16,
    d_model=32,
    d_inner=32,          # encoder FFN hidden AND decoder LSTM hidden
    d_pose_vec=72,       # AIST pose dim (24 joints x 3) -> matches BOS pose
    pose_emb_size=16,    # decoder d_word_vec
    condition_step=10,
    sliding_windown_size=4,
    lambda_v=1.0,
)


# ----------------------------------------------------------------------------
# helper tables (plain numpy, host/trace time)
# ----------------------------------------------------------------------------
def get_sinusoid_encoding_table(n_position, d_hid, padding_idx=None):
    pos = np.arange(n_position)[:, None].astype(np.float64)
    hid = np.arange(d_hid)[None, :]
    table = pos / np.power(10000, 2 * (hid // 2) / d_hid)
    table[:, 0::2] = np.sin(table[:, 0::2])
    table[:, 1::2] = np.cos(table[:, 1::2])
    if padding_idx is not None:
        table[padding_idx] = 0.0
    return table.astype(np.float32)


def get_subsequent_mask_np(seq_len, sliding_window_size):
    # 1.0 = masked out (outside the +/- sliding_window band), 0.0 = attend
    i = np.arange(seq_len)[:, None]
    j = np.arange(seq_len)[None, :]
    band = (j - i >= -sliding_window_size) & (j - i <= sliding_window_size)
    return (1.0 - band.astype(np.float32)).astype(np.float32)


def scheduled_sampling_mask(seq_len, epoch_i, cfg):
    # host-static 0/1 per step, exactly mirroring the torch Python-level branch
    gt = np.ones((seq_len, cfg["condition_step"]))
    pred = np.zeros((seq_len, int(epoch_i * cfg["lambda_v"])))
    m = np.concatenate([pred, gt], 1).reshape(-1)[:seq_len]
    return tuple(int(v) for v in m)


# ----------------------------------------------------------------------------
# fully fused forward: embedding + n_layers transformer layers + autoregressive
# 3-LSTM decoder + output linear, all inside ONE pallas_call (no grid).
# ----------------------------------------------------------------------------
def make_forward(cfg, batch, seq_len, ss_mask):
    B, L = batch, seq_len
    F = cfg["d_frame_vec"]
    D = cfg["d_model"]
    H = cfg["n_head"]
    Dk, Dv = cfg["d_k"], cfg["d_v"]
    Di, NL = cfg["d_inner"], cfg["n_layers"]
    HID = cfg["d_inner"]
    P = cfg["d_pose_vec"]
    BL = B * L
    HDk, HDv = H * Dk, H * Dv
    QKVW = 2 * HDk + HDv
    G = 4 * HID                      # per-cell gate width

    mask_steps = tuple(int(v) for v in ss_mask)
    assert len(mask_steps) == L

    def ln(z, g, b, eps=1e-5):
        mu = jnp.mean(z, axis=-1, keepdims=True)
        var = jnp.mean(jnp.square(z - mu), axis=-1, keepdims=True)
        return (z - mu) * lax.rsqrt(var + eps) * g + b

    def kern(src_ref, pos_ref, nmask_ref, embw_ref, embb_ref,
             wqkv_ref, bqkv_ref, wfc_ref, bfc_ref,
             ln1g_ref, ln1b_ref, w1_ref, b1_ref, w2_ref, b2_ref,
             ln2g_ref, ln2b_ref,
             tgt_ref, bos_ref, hin_ref, cin_ref,
             wgate_ref, bgate_ref, wlh_ref, wle_ref, blin_ref,
             o_ref):
        # ---------------- encoder (NL layers, statically unrolled) ------------
        x = (jnp.dot(src_ref[...], embw_ref[...],
                     preferred_element_type=jnp.float32)
             + embb_ref[...] + pos_ref[...])                          # (BL, D)
        nm = nmask_ref[...]                                           # (L, L) additive -1e9

        for l in range(NL):
            qkv = (jnp.dot(x, wqkv_ref[l], preferred_element_type=jnp.float32)
                   + bqkv_ref[l])                                      # (BL, QKVW)

            # scores for every (batch, head), stacked along sublanes
            s_tiles = []
            for b in range(B):
                qkv_b = qkv[b * L:(b + 1) * L, :]
                for h in range(H):
                    qh = qkv_b[:, h * Dk:(h + 1) * Dk]                 # Q pre-scaled by 1/sqrt(dk)
                    kh = qkv_b[:, HDk + h * Dk:HDk + (h + 1) * Dk]
                    s = lax.dot_general(qh, kh, (((1,), (1,)), ((), ())),
                                        preferred_element_type=jnp.float32)
                    s_tiles.append(s + nm)
            s_all = jnp.concatenate(s_tiles, axis=0)                   # (B*H*L, L)

            # one batched softmax for all (b, h) tiles
            s_all = s_all - jnp.max(s_all, axis=-1, keepdims=True)
            p_all = jnp.exp(s_all)
            p_all = p_all * pl.reciprocal(jnp.sum(p_all, axis=-1, keepdims=True),
                                          approx=True)

            # attention-weighted values: heads along lanes, batches along sublanes,
            # then ONE fused output projection (BL, HDv) x (HDv, D).
            rows = []
            for b in range(B):
                qkv_b = qkv[b * L:(b + 1) * L, :]
                heads = []
                for h in range(H):
                    vh = qkv_b[:, 2 * HDk + h * Dv:2 * HDk + (h + 1) * Dv]
                    p = p_all[(b * H + h) * L:(b * H + h + 1) * L, :]
                    heads.append(jnp.dot(p, vh, preferred_element_type=jnp.float32))
                rows.append(jnp.concatenate(heads, axis=1))            # (L, HDv)
            attn = jnp.concatenate(rows, axis=0)                       # (BL, HDv)

            proj = (jnp.dot(attn, wfc_ref[l], preferred_element_type=jnp.float32)
                    + bfc_ref[l])
            z = ln(proj + x, ln1g_ref[l], ln1b_ref[l])
            hdn = jnp.maximum(
                jnp.dot(z, w1_ref[l], preferred_element_type=jnp.float32) + b1_ref[l],
                0.0)
            y = jnp.dot(hdn, w2_ref[l], preferred_element_type=jnp.float32) + b2_ref[l]
            x = ln(y + z, ln2g_ref[l], ln2b_ref[l])

        # encoder half of the output Linear, hoisted off the serial decoder chain
        enc_proj = (jnp.dot(x, wle_ref[...], preferred_element_type=jnp.float32)
                    + blin_ref[...]).reshape(B, L, P)                  # (B, L, P)

        # ---------------- decoder (L steps, statically unrolled) --------------
        h0, h1, h2 = hin_ref[0], hin_ref[1], hin_ref[2]
        c0, c1, c2 = cin_ref[0], cin_ref[1], cin_ref[2]
        prev = bos_ref[...]                                            # (B, P)

        for i in range(L):
            # scheduled sampling (host-static mask == torch's Python `if mask[i] == 1`)
            in_frame = tgt_ref[:, i, :] if mask_steps[i] == 1 else prev

            # All three LSTM cells' gates in ONE matmul.  tgt_emb is folded into
            # wgate's first P rows; lstm2/lstm3 consume the OLD h0 / h1, exactly
            # as the reference Decoder.forward does (vec_h[0], vec_h[1]).
            xcat = jnp.concatenate([in_frame, h0, h1, h2], axis=1)     # (B, P+3*HID)
            gates = (jnp.dot(xcat, wgate_ref[...],
                             preferred_element_type=jnp.float32)
                     + bgate_ref[...])                                 # (B, 3*G)
            sg = jax.nn.sigmoid(gates)
            tg = jnp.tanh(gates)

            def cell(k, c_old):
                o0 = k * G
                ii = sg[:, o0:o0 + HID]
                ff = sg[:, o0 + HID:o0 + 2 * HID]
                gg = tg[:, o0 + 2 * HID:o0 + 3 * HID]
                oo = sg[:, o0 + 3 * HID:o0 + 4 * HID]
                cn = ff * c_old + ii * gg
                return oo * jnp.tanh(cn), cn

            h0n, c0 = cell(0, c0)
            h1n, c1 = cell(1, c1)
            h2n, c2 = cell(2, c2)
            h0, h1, h2 = h0n, h1n, h2n

            # linear(cat([h2_new, enc_out_i])) == h2_new @ W_h + (enc @ W_e + b)
            out = (jnp.dot(h2, wlh_ref[...], preferred_element_type=jnp.float32)
                   + enc_proj[:, i, :])                                # (B, P)
            prev = out
            o_ref[:, i, :] = out

    def forward(params, src_seq, tgt_seq, h_init, c_init, bos_frame):
        p = params
        src_flat = src_seq.reshape(BL, F)      # contiguous reshape (free in XLA)
        return pl.pallas_call(
            kern,
            out_shape=jax.ShapeDtypeStruct((B, L, P), jnp.float32),
        )(src_flat, p["pos_bl"], p["neg_mask"], p["src_emb_w"], p["src_emb_b"],
          p["wqkv"], p["bqkv"], p["wfc"], p["bfc"],
          p["ln1_g"], p["ln1_b"], p["w1"], p["b1"], p["w2"], p["b2"],
          p["ln2_g"], p["ln2_b"],
          tgt_seq, bos_frame, h_init, c_init,
          p["wgate"], p["bgate"], p["w_lin_h"], p["w_lin_e"], p["b_lin"])

    return forward


# ----------------------------------------------------------------------------
# parameters / initial state
# ----------------------------------------------------------------------------
def init_params(key, cfg, batch, seq_len):
    keys = iter(jax.random.split(key, 128))

    def nrm(shape, scale=0.08):
        return (scale * jax.random.normal(next(keys), shape)).astype(jnp.float32)

    D, Dk, Dv, H = cfg["d_model"], cfg["d_k"], cfg["d_v"], cfg["n_head"]
    Di, NL, F = cfg["d_inner"], cfg["n_layers"], cfg["d_frame_vec"]
    HID, P, E = cfg["d_inner"], cfg["d_pose_vec"], cfg["pose_emb_size"]
    HDk, HDv = H * Dk, H * Dv
    G = 4 * HID
    inv_temp = 1.0 / float(np.sqrt(Dk))

    # ---- encoder layers ----
    wqkv, bqkv, wfc, bfc = [], [], [], []
    ln1g, ln1b, w1, b1, w2, b2, ln2g, ln2b = ([] for _ in range(8))
    for _ in range(NL):
        wq, wk, wv = nrm((D, HDk)), nrm((D, HDk)), nrm((D, HDv))
        bq, bk, bv = nrm((1, HDk)), nrm((1, HDk)), nrm((1, HDv))
        # 1/sqrt(d_k) attention temperature folded into the Q projection (w AND b)
        wqkv.append(jnp.concatenate([wq * inv_temp, wk, wv], axis=1))
        bqkv.append(jnp.concatenate([bq * inv_temp, bk, bv], axis=1))
        wfc.append(nrm((HDv, D))); bfc.append(nrm((1, D)))
        ln1g.append(jnp.ones((1, D), jnp.float32)); ln1b.append(jnp.zeros((1, D), jnp.float32))
        w1.append(nrm((D, Di))); b1.append(nrm((1, Di)))
        w2.append(nrm((Di, D))); b2.append(nrm((1, D)))
        ln2g.append(jnp.ones((1, D), jnp.float32)); ln2b.append(jnp.zeros((1, D), jnp.float32))

    pos_table = get_sinusoid_encoding_table(cfg["max_seq_len"] + 1,
                                            cfg["frame_emb_size"], padding_idx=0)
    pos_bl = jnp.tile(jnp.asarray(pos_table[1:seq_len + 1]), (batch, 1))        # (B*L, D)
    neg_mask = jnp.asarray(
        get_subsequent_mask_np(seq_len, cfg["sliding_windown_size"]) * (-1e9), jnp.float32)

    # ---- decoder: tgt_emb folded into lstm1; all three cells' weights fused ----
    emb_w, emb_b = nrm((P, E)), nrm((1, E))
    # NOTE: single combined bias per cell (== torch b_ih + b_hh summed)
    l1_wih, l1_whh, l1_b = nrm((E, G)), nrm((HID, G)), nrm((1, G))
    l2_wih, l2_whh, l2_b = nrm((HID, G)), nrm((HID, G)), nrm((1, G))
    l3_wih, l3_whh, l3_b = nrm((HID, G)), nrm((HID, G)), nrm((1, G))

    w_x1 = jnp.dot(emb_w, l1_wih)                    # (P, G): embedding folded into lstm1
    b1p = jnp.dot(emb_b, l1_wih) + l1_b              # (1, G)

    wgate = jnp.zeros((P + 3 * HID, 3 * G), jnp.float32)
    wgate = wgate.at[:P, 0:G].set(w_x1)
    wgate = wgate.at[P:P + HID, 0:G].set(l1_whh)
    wgate = wgate.at[P:P + HID, G:2 * G].set(l2_wih)
    wgate = wgate.at[P + HID:P + 2 * HID, G:2 * G].set(l2_whh)
    wgate = wgate.at[P + HID:P + 2 * HID, 2 * G:3 * G].set(l3_wih)
    wgate = wgate.at[P + 2 * HID:P + 3 * HID, 2 * G:3 * G].set(l3_whh)
    bgate = jnp.concatenate([b1p, l2_b, l3_b], axis=1)                           # (1, 3*G)

    w_lin = nrm((HID + D, P))
    b_lin = nrm((1, P))

    return dict(
        src_emb_w=nrm((F, D)), src_emb_b=nrm((1, D)),
        pos_bl=pos_bl, neg_mask=neg_mask,
        wqkv=jnp.stack(wqkv), bqkv=jnp.stack(bqkv),
        wfc=jnp.stack(wfc), bfc=jnp.stack(bfc),
        ln1_g=jnp.stack(ln1g), ln1_b=jnp.stack(ln1b),
        w1=jnp.stack(w1), b1=jnp.stack(b1),
        w2=jnp.stack(w2), b2=jnp.stack(b2),
        ln2_g=jnp.stack(ln2g), ln2_b=jnp.stack(ln2b),
        wgate=wgate, bgate=bgate,
        w_lin_h=w_lin[:HID], w_lin_e=w_lin[HID:], b_lin=b_lin,
    )


def init_decoder_state(bsz, hidden_size, pose_dim, key):
    # torch.randn initial states -> deterministic jax.random equivalents
    ks = jax.random.split(key, 6)
    h = jnp.stack([jax.random.normal(ks[i], (bsz, hidden_size), jnp.float32)
                   for i in range(3)])
    c = jnp.stack([jax.random.normal(ks[i + 3], (bsz, hidden_size), jnp.float32)
                   for i in range(3)])
    # BOS pose (non-rotmat branch): root-relative except the root itself
    bos = np.tile(BOS_POSE_AIST, (bsz, 1))
    root = bos[:, :3].copy()
    bos = bos - np.tile(root, (1, 24))
    bos[:, :3] = root
    assert bos.shape[1] == pose_dim
    return h, c, jnp.asarray(bos.astype(np.float32))


# ----------------------------------------------------------------------------
if __name__ == "__main__":
    cfg = CFG
    B, L = 2, 8
    key = jax.random.PRNGKey(0)
    k_param, k_src, k_tgt, k_state = jax.random.split(key, 4)
    epoch_i = 1  # -> step 0 uses the BOS pose, remaining steps teacher-forced

    ss_mask = scheduled_sampling_mask(L, epoch_i, cfg)
    params = init_params(k_param, cfg, B, L)
    src_seq = jax.random.normal(k_src, (B, L, cfg["d_frame_vec"]), jnp.float32)
    tgt_seq = jax.random.normal(k_tgt, (B, L, cfg["d_pose_vec"]), jnp.float32)
    h_init, c_init, bos_frame = init_decoder_state(B, cfg["d_inner"],
                                                   cfg["d_pose_vec"], k_state)

    fwd = jax.jit(make_forward(cfg, B, L, ss_mask))
    out = fwd(params, src_seq, tgt_seq, h_init, c_init, bos_frame)
    out = jax.block_until_ready(out)

    assert out.shape == (B, L, cfg["d_pose_vec"]), out.shape
    assert bool(jnp.all(jnp.isfinite(out)))
    print("KERNEL_OK")
</pallas_src>

<mosaic_0001>
module attributes {stable_mosaic.version = 11 : i64} {
  func.func @kern(%arg0: memref<16x16xf32, #tpu.memory_space<vmem>>, %arg1: memref<16x32xf32, #tpu.memory_space<vmem>>, %arg2: memref<8x8xf32, #tpu.memory_space<vmem>>, %arg3: memref<16x32xf32, #tpu.memory_space<vmem>>, %arg4: memref<1x32xf32, #tpu.memory_space<vmem>>, %arg5: memref<2x32x96xf32, #tpu.memory_space<vmem>>, %arg6: memref<2x1x96xf32, #tpu.memory_space<vmem>>, %arg7: memref<2x32x32xf32, #tpu.memory_space<vmem>>, %arg8: memref<2x1x32xf32, #tpu.memory_space<vmem>>, %arg9: memref<2x1x32xf32, #tpu.memory_space<vmem>>, %arg10: memref<2x1x32xf32, #tpu.memory_space<vmem>>, %arg11: memref<2x32x32xf32, #tpu.memory_space<vmem>>, %arg12: memref<2x1x32xf32, #tpu.memory_space<vmem>>, %arg13: memref<2x32x32xf32, #tpu.memory_space<vmem>>, %arg14: memref<2x1x32xf32, #tpu.memory_space<vmem>>, %arg15: memref<2x1x32xf32, #tpu.memory_space<vmem>>, %arg16: memref<2x1x32xf32, #tpu.memory_space<vmem>>, %arg17: memref<2x8x72xf32, #tpu.memory_space<vmem>>, %arg18: memref<2x72xf32, #tpu.memory_space<vmem>>, %arg19: memref<3x2x32xf32, #tpu.memory_space<vmem>>, %arg20: memref<3x2x32xf32, #tpu.memory_space<vmem>>, %arg21: memref<168x384xf32, #tpu.memory_space<vmem>>, %arg22: memref<1x384xf32, #tpu.memory_space<vmem>>, %arg23: memref<32x72xf32, #tpu.memory_space<vmem>>, %arg24: memref<32x72xf32, #tpu.memory_space<vmem>>, %arg25: memref<1x72xf32, #tpu.memory_space<vmem>>, %arg26: memref<2x8x72xf32, #tpu.memory_space<vmem>>) attributes {dimension_semantics = [], scalar_prefetch = 0 : i64, scratch_operands = 0 : i64, tpu.core_type = #tpu.core_type<tc>} {
    %c0 = arith.constant 0 : index
    %c0_0 = arith.constant 0 : index
    %0 = vector.load %arg0[%c0, %c0_0] : memref<16x16xf32, #tpu.memory_space<vmem>>, vector<16x16xf32>
    %c0_1 = arith.constant 0 : index
    %c0_2 = arith.constant 0 : index
    %1 = vector.load %arg3[%c0_1, %c0_2] : memref<16x32xf32, #tpu.memory_space<vmem>>, vector<16x32xf32>
    %cst = arith.constant dense<0.000000e+00> : vector<16x32xf32>
    %2 = tpu.matmul %0, %1, %cst {dimension_numbers = #tpu.dot_dimension_numbers<[1], [0], [0], [1], [0, 0, 1, 1], [], []>} : vector<16x16xf32>, vector<16x32xf32>, vector<16x32xf32> -> vector<16x32xf32>
    %c0_3 = arith.constant 0 : index
    %c0_4 = arith.constant 0 : index
    %3 = vector.load %arg4[%c0_3, %c0_4] : memref<1x32xf32, #tpu.memory_space<vmem>>, vector<1x32xf32>
    %4 = vector.broadcast %3 : vector<1x32xf32> to vector<16x32xf32>
    %5 = arith.addf %2, %4 : vector<16x32xf32>
    %c0_5 = arith.constant 0 : index
    %c0_6 = arith.constant 0 : index
    %6 = vector.load %arg1[%c0_5, %c0_6] : memref<16x32xf32, #tpu.memory_space<vmem>>, vector<16x32xf32>
    %7 = arith.addf %5, %6 : vector<16x32xf32>
    %c0_7 = arith.constant 0 : index
    %c0_8 = arith.constant 0 : index
    %8 = vector.load %arg2[%c0_7, %c0_8] : memref<8x8xf32, #tpu.memory_space<vmem>>, vector<8x8xf32>
    %c0_9 = arith.constant 0 : index
    %c0_10 = arith.constant 0 : index
    %c0_11 = arith.constant 0 : index
    %9 = vector.load %arg5[%c0_9, %c0_10, %c0_11] : memref<2x32x96xf32, #tpu.memory_space<vmem>>, vector<1x32x96xf32>
    %10 = vector.shape_cast %9 : vector<1x32x96xf32> to vector<32x96xf32>
    %cst_12 = arith.constant dense<0.000000e+00> : vector<16x96xf32>
    %11 = tpu.matmul %7, %10, %cst_12 {dimension_numbers = #tpu.dot_dimension_numbers<[1], [0], [0], [1], [0, 0, 1, 1], [], []>} : vector<16x32xf32>, vector<32x96xf32>, vector<16x96xf32> -> vector<16x96xf32>
    %c0_13 = arith.constant 0 : index
    %c0_14 = arith.constant 0 : index
    %c0_15 = arith.constant 0 : index
    %12 = vector.load %arg6[%c0_13, %c0_14, %c0_15] : memref<2x1x96xf32, #tpu.memory_space<vmem>>, vector<1x1x96xf32>
    %13 = vector.shape_cast %12 : vector<1x1x96xf32> to vector<1x96xf32>
    %14 = vector.broadcast %13 : vector<1x96xf32> to vector<16x96xf32>
    %15 = arith.addf %11, %14 : vector<16x96xf32>
    %16 = vector.extract_strided_slice %15 {offsets = [0, 0], sizes = [8, 96], strides = [1, 1]} : vector<16x96xf32> to vector<8x96xf32>
    %17 = vector.extract_strided_slice %16 {offsets = [0, 0], sizes = [8, 16], strides = [1, 1]} : vector<8x96xf32> to vector<8x16xf32>
    %18 = vector.extract_strided_slice %16 {offsets = [0, 32], sizes = [8, 16], strides = [1, 1]} : vector<8x96xf32> to vector<8x16xf32>
    %cst_16 = arith.constant dense<0.000000e+00> : vector<8x8xf32>
    %19 = tpu.matmul %17, %18, %cst_16 {dimension_numbers = #tpu.dot_dimension_numbers<[1], [1], [0], [0], [0, 0, 1, 0], [], []>} : vector<8x16xf32>, vector<8x16xf32>, vector<8x8xf32> -> vector<8x8xf32>
    %20 = arith.addf %19, %8 : vector<8x8xf32>
    %21 = vector.extract_strided_slice %16 {offsets = [0, 16], sizes = [8, 16], strides = [1, 1]} : vector<8x96xf32> to vector<8x16xf32>
    %22 = vector.extract_strided_slice %16 {offsets = [0, 48], sizes = [8, 16], strides = [1, 1]} : vector<8x96xf32> to vector<8x16xf32>
    %cst_17 = arith.constant dense<0.000000e+00> : vector<8x8xf32>
    %23 = tpu.matmul %21, %22, %cst_17 {dimension_numbers = #tpu.dot_dimension_numbers<[1], [1], [0], [0], [0, 0, 1, 0], [], []>} : vector<8x16xf32>, vector<8x16xf32>, vector<8x8xf32> -> vector<8x8xf32>
    %24 = arith.addf %23, %8 : vector<8x8xf32>
    %25 = vector.extract_strided_slice %15 {offsets = [8, 0], sizes = [8, 96], strides = [1, 1]} : vector<16x96xf32> to vector<8x96xf32>
    %26 = vector.extract_strided_slice %25 {offsets = [0, 0], sizes = [8, 16], strides = [1, 1]} : vector<8x96xf32> to vector<8x16xf32>
    %27 = vector.extract_strided_slice %25 {offsets = [0, 32], sizes = [8, 16], strides = [1, 1]} : vector<8x96xf32> to vector<8x16xf32>
    %cst_18 = arith.constant dense<0.000000e+00> : vector<8x8xf32>
    %28 = tpu.matmul %26, %27, %cst_18 {dimension_numbers = #tpu.dot_dimension_numbers<[1], [1], [0], [0], [0, 0, 1, 0], [], []>} : vector<8x16xf32>, vector<8x16xf32>, vector<8x8xf32> -> vector<8x8xf32>
    %29 = arith.addf %28, %8 : vector<8x8xf32>
    %30 = vector.extract_strided_slice %25 {offsets = [0, 16], sizes = [8, 16], strides = [1, 1]} : vector<8x96xf32> to vector<8x16xf32>
    %31 = vector.extract_strided_slice %25 {offsets = [0, 48], sizes = [8, 16], strides = [1, 1]} : vector<8x96xf32> to vector<8x16xf32>
    %cst_19 = arith.constant dense<0.000000e+00> : vector<8x8xf32>
    %32 = tpu.matmul %30, %31, %cst_19 {dimension_numbers = #tpu.dot_dimension_numbers<[1], [1], [0], [0], [0, 0, 1, 0], [], []>} : vector<8x16xf32>, vector<8x16xf32>, vector<8x8xf32> -> vector<8x8xf32>
    %33 = arith.addf %32, %8 : vector<8x8xf32>
    %34 = tpu.concatenate %20, %24, %29, %33 in 0 : vector<8x8xf32>, vector<8x8xf32>, vector<8x8xf32>, vector<8x8xf32> -> vector<32x8xf32>
    %cst_20 = arith.constant dense<0xFF800000> : vector<32xf32>
    %35 = vector.multi_reduction <maximumf>, %34, %cst_20 [1] : vector<32x8xf32> to vector<32xf32>
    %36 = vector.shape_cast %35 : vector<32xf32> to vector<32x1xf32>
    %37 = vector.broadcast %36 : vector<32x1xf32> to vector<32x8xf32>
    %38 = arith.subf %34, %37 : vector<32x8xf32>
    %39 = math.exp %38 : vector<32x8xf32>
    %cst_21 = arith.constant dense<0.000000e+00> : vector<32xf32>
    %40 = vector.multi_reduction <add>, %39, %cst_21 [1] : vector<32x8xf32> to vector<32xf32>
    %41 = vector.shape_cast %40 : vector<32xf32> to vector<32x1xf32>
    %42 = tpu.reciprocal %41 {approx = true} : vector<32x1xf32> -> vector<32x1xf32>
    %43 = vector.broadcast %42 : vector<32x1xf32> to vector<32x8xf32>
    %44 = arith.mulf %39, %43 : vector<32x8xf32>
    %45 = vector.extract_strided_slice %15 {offsets = [0, 0], sizes = [8, 96], strides = [1, 1]} : vector<16x96xf32> to vector<8x96xf32>
    %46 = vector.extract_strided_slice %45 {offsets = [0, 64], sizes = [8, 16], strides = [1, 1]} : vector<8x96xf32> to vector<8x16xf32>
    %47 = vector.extract_strided_slice %44 {offsets = [0, 0], sizes = [8, 8], strides = [1, 1]} : vector<32x8xf32> to vector<8x8xf32>
    %cst_22 = arith.constant dense<0.000000e+00> : vector<8x16xf32>
    %48 = tpu.matmul %47, %46, %cst_22 {dimension_numbers = #tpu.dot_dimension_numbers<[1], [0], [0], [1], [0, 0, 1, 1], [], []>} : vector<8x8xf32>, vector<8x16xf32>, vector<8x16xf32> -> vector<8x16xf32>
    %49 = vector.extract_strided_slice %45 {offsets = [0, 80], sizes = [8, 16], strides = [1, 1]} : vector<8x96xf32> to vector<8x16xf32>
    %50 = vector.extract_strided_slice %44 {offsets = [8, 0], sizes = [8, 8], strides = [1, 1]} : vector<32x8xf32> to vector<8x8xf32>
    %cst_23 = arith.constant dense<0.000000e+00> : vector<8x16xf32>
    %51 = tpu.matmul %50, %49, %cst_23 {dimension_numbers = #tpu.dot_dimension_numbers<[1], [0], [0], [1], [0, 0, 1, 1], [], []>} : vector<8x8xf32>, vector<8x16xf32>, vector<8x16xf32> -> vector<8x16xf32>
    %52 = tpu.concatenate %48, %51 in 1 : vector<8x16xf32>, vector<8x16xf32> -> vector<8x32xf32>
    %53 = vector.extract_strided_slice %15 {offsets = [8, 0], sizes = [8, 96], strides = [1, 1]} : vector<16x96xf32> to vector<8x96xf32>
    %54 = vector.extract_strided_slice %53 {offsets = [0, 64], sizes = [8, 16], strides = [1, 1]} : vector<8x96xf32> to vector<8x16xf32>
    %55 = vector.extract_strided_slice %44 {offsets = [16, 0], sizes = [8, 8], strides = [1, 1]} : vector<32x8xf32> to vector<8x8xf32>
    %cst_24 = arith.constant dense<0.000000e+00> : vector<8x16xf32>
    %56 = tpu.matmul %55, %54, %cst_24 {dimension_numbers = #tpu.dot_dimension_numbers<[1], [0], [0], [1], [0, 0, 1, 1], [], []>} : vector<8x8xf32>, vector<8x16xf32>, vector<8x16xf32> -> vector<8x16xf32>
    %57 = vector.extract_strided_slice %53 {offsets = [0, 80], sizes = [8, 16], strides = [1, 1]} : vector<8x96xf32> to vector<8x16xf32>
    %58 = vector.extract_strided_slice %44 {offsets = [24, 0], sizes = [8, 8], strides = [1, 1]} : vector<32x8xf32> to vector<8x8xf32>
    %cst_25 = arith.constant dense<0.000000e+00> : vector<8x16xf32>
    %59 = tpu.matmul %58, %57, %cst_25 {dimension_numbers = #tpu.dot_dimension_numbers<[1], [0], [0], [1], [0, 0, 1, 1], [], []>} : vector<8x8xf32>, vector<8x16xf32>, vector<8x16xf32> -> vector<8x16xf32>
    %60 = tpu.concatenate %56, %59 in 1 : vector<8x16xf32>, vector<8x16xf32> -> vector<8x32xf32>
    %61 = tpu.concatenate %52, %60 in 0 : vector<8x32xf32>, vector<8x32xf32> -> vector<16x32xf32>
    %c0_26 = arith.constant 0 : index
    %c0_27 = arith.constant 0 : index
    %c0_28 = arith.constant 0 : index
    %62 = vector.load %arg7[%c0_26, %c0_27, %c0_28] : memref<2x32x32xf32, #tpu.memory_space<vmem>>, vector<1x32x32xf32>
    %63 = vector.shape_cast %62 : vector<1x32x32xf32> to vector<32x32xf32>
    %cst_29 = arith.constant dense<0.000000e+00> : vector<16x32xf32>
    %64 = tpu.matmul %61, %63, %cst_29 {dimension_numbers = #tpu.dot_dimension_numbers<[1], [0], [0], [1], [0, 0, 1, 1], [], []>} : vector<16x32xf32>, vector<32x32xf32>, vector<16x32xf32> -> vector<16x32xf32>
    %c0_30 = arith.constant 0 : index
    %c0_31 = arith.constant 0 : index
    %c0_32 = arith.constant 0 : index
    %65 = vector.load %arg8[%c0_30, %c0_31, %c0_32] : memref<2x1x32xf32, #tpu.memory_space<vmem>>, vector<1x1x32xf32>
    %66 = vector.shape_cast %65 : vector<1x1x32xf32> to vector<1x32xf32>
    %67 = vector.broadcast %66 : vector<1x32xf32> to vector<16x32xf32>
    %68 = arith.addf %64, %67 : vector<16x32xf32>
    %69 = arith.addf %68, %7 : vector<16x32xf32>
    %c0_33 = arith.constant 0 : index
    %c0_34 = arith.constant 0 : index
    %c0_35 = arith.constant 0 : index
    %70 = vector.load %arg9[%c0_33, %c0_34, %c0_35] : memref<2x1x32xf32, #tpu.memory_space<vmem>>, vector<1x1x32xf32>
    %71 = vector.shape_cast %70 : vector<1x1x32xf32> to vector<1x32xf32>
    %c0_36 = arith.constant 0 : index
    %c0_37 = arith.constant 0 : index
    %c0_38 = arith.constant 0 : index
    %72 = vector.load %arg10[%c0_36, %c0_37, %c0_38] : memref<2x1x32xf32, #tpu.memory_space<vmem>>, vector<1x1x32xf32>
    %73 = vector.shape_cast %72 : vector<1x1x32xf32> to vector<1x32xf32>
    %cst_39 = arith.constant dense<0.000000e+00> : vector<16xf32>
    %74 = vector.multi_reduction <add>, %69, %cst_39 [1] : vector<16x32xf32> to vector<16xf32>
    %75 = vector.shape_cast %74 : vector<16xf32> to vector<16x1xf32>
    %cst_40 = arith.constant 3.200000e+01 : f32
    %76 = vector.broadcast %cst_40 : f32 to vector<16x1xf32>
    %77 = arith.divf %75, %76 : vector<16x1xf32>
    %78 = vector.broadcast %77 : vector<16x1xf32> to vector<16x32xf32>
    %79 = arith.subf %69, %78 : vector<16x32xf32>
    %80 = arith.mulf %79, %79 : vector<16x32xf32>
    %cst_41 = arith.constant dense<0.000000e+00> : vector<16xf32>
    %81 = vector.multi_reduction <add>, %80, %cst_41 [1] : vector<16x32xf32> to vector<16xf32>
    %82 = vector.shape_cast %81 : vector<16xf32> to vector<16x1xf32>
    %cst_42 = arith.constant 3.200000e+01 : f32
    %83 = vector.broadcast %cst_42 : f32 to vector<16x1xf32>
    %84 = arith.divf %82, %83 : vector<16x1xf32>
    %85 = vector.broadcast %77 : vector<16x1xf32> to vector<16x32xf32>
    %86 = arith.subf %69, %85 : vector<16x32xf32>
    %cst_43 = arith.constant 9.99999974E-6 : f32
    %87 = vector.broadcast %cst_43 : f32 to vector<16x1xf32>
    %88 = arith.addf %84, %87 : vector<16x1xf32>
    %89 = math.rsqrt %88 : vector<16x1xf32>
    %90 = vector.broadcast %89 : vector<16x1xf32> to vector<16x32xf32>
    %91 = arith.mulf %86, %90 : vector<16x32xf32>
    %92 = vector.broadcast %71 : vector<1x32xf32> to vector<16x32xf32>
    %93 = arith.mulf %91, %92 : vector<16x32xf32>
    %94 = vector.broadcast %73 : vector<1x32xf32> to vector<16x32xf32>
    %95 = arith.addf %93, %94 : vector<16x32xf32>
    %c0_44 = arith.constant 0 : index
    %c0_45 = arith.constant 0 : index
    %c0_46 = arith.constant 0 : index
    %96 = vector.load %arg11[%c0_44, %c0_45, %c0_46] : memref<2x32x32xf32, #tpu.memory_space<vmem>>, vector<1x32x32xf32>
    %97 = vector.shape_cast %96 : vector<1x32x32xf32> to vector<32x32xf32>
    %cst_47 = arith.constant dense<0.000000e+00> : vector<16x32xf32>
    %98 = tpu.matmul %95, %97, %cst_47 {dimension_numbers = #tpu.dot_dimension_numbers<[1], [0], [0], [1], [0, 0, 1, 1], [], []>} : vector<16x32xf32>, vector<32x32xf32>, vector<16x32xf32> -> vector<16x32xf32>
    %c0_48 = arith.constant 0 : index
    %c0_49 = arith.constant 0 : index
    %c0_50 = arith.constant 0 : index
    %99 = vector.load %arg12[%c0_48, %c0_49, %c0_50] : memref<2x1x32xf32, #tpu.memory_space<vmem>>, vector<1x1x32xf32>
    %100 = vector.shape_cast %99 : vector<1x1x32xf32> to vector<1x32xf32>
    %101 = vector.broadcast %100 : vector<1x32xf32> to vector<16x32xf32>
    %102 = arith.addf %98, %101 : vector<16x32xf32>
    %cst_51 = arith.constant 0.000000e+00 : f32
    %103 = vector.broadcast %cst_51 : f32 to vector<16x32xf32>
    %104 = arith.maximumf %102, %103 : vector<16x32xf32>
    %c0_52 = arith.constant 0 : index
    %c0_53 = arith.constant 0 : index
    %c0_54 = arith.constant 0 : index
    %105 = vector.load %arg13[%c0_52, %c0_53, %c0_54] : memref<2x32x32xf32, #tpu.memory_space<vmem>>, vector<1x32x32xf32>
    %106 = vector.shape_cast %105 : vector<1x32x32xf32> to vector<32x32xf32>
    %cst_55 = arith.constant dense<0.000000e+00> : vector<16x32xf32>
    %107 = tpu.matmul %104, %106, %cst_55 {dimension_numbers = #tpu.dot_dimension_numbers<[1], [0], [0], [1], [0, 0, 1, 1], [], []>} : vector<16x32xf32>, vector<32x32xf32>, vector<16x32xf32> -> vector<16x32xf32>
    %c0_56 = arith.constant 0 : index
    %c0_57 = arith.constant 0 : index
    %c0_58 = arith.constant 0 : index
    %108 = vector.load %arg14[%c0_56, %c0_57, %c0_58] : memref<2x1x32xf32, #tpu.memory_space<vmem>>, vector<1x1x32xf32>
    %109 = vector.shape_cast %108 : vector<1x1x32xf32> to vector<1x32xf32>
    %110 = vector.broadcast %109 : vector<1x32xf32> to vector<16x32xf32>
    %111 = arith.addf %107, %110 : vector<16x32xf32>
    %112 = arith.addf %111, %95 : vector<16x32xf32>
    %c0_59 = arith.constant 0 : index
    %c0_60 = arith.constant 0 : index
    %c0_61 = arith.constant 0 : index
    %113 = vector.load %arg15[%c0_59, %c0_60, %c0_61] : memref<2x1x32xf32, #tpu.memory_space<vmem>>, vector<1x1x32xf32>
    %114 = vector.shape_cast %113 : vector<1x1x32xf32> to vector<1x32xf32>
    %c0_62 = arith.constant 0 : index
    %c0_63 = arith.constant 0 : index
    %c0_64 = arith.constant 0 : index
    %115 = vector.load %arg16[%c0_62, %c0_63, %c0_64] : memref<2x1x32xf32, #tpu.memory_space<vmem>>, vector<1x1x32xf32>
    %116 = vector.shape_cast %115 : vector<1x1x32xf32> to vector<1x32xf32>
    %cst_65 = arith.constant dense<0.000000e+00> : vector<16xf32>
    %117 = vector.multi_reduction <add>, %112, %cst_65 [1] : vector<16x32xf32> to vector<16xf32>
    %118 = vector.shape_cast %117 : vector<16xf32> to vector<16x1xf32>
    %cst_66 = arith.constant 3.200000e+01 : f32
    %119 = vector.broadcast %cst_66 : f32 to vector<16x1xf32>
    %120 = arith.divf %118, %119 : vector<16x1xf32>
    %121 = vector.broadcast %120 : vector<16x1xf32> to vector<16x32xf32>
    %122 = arith.subf %112, %121 : vector<16x32xf32>
    %123 = arith.mulf %122, %122 : vector<16x32xf32>
    %cst_67 = arith.constant dense<0.000000e+00> : vector<16xf32>
    %124 = vector.multi_reduction <add>, %123, %cst_67 [1] : vector<16x32xf32> to vector<16xf32>
    %125 = vector.shape_cast %124 : vector<16xf32> to vector<16x1xf32>
    %cst_68 = arith.constant 3.200000e+01 : f32
    %126 = vector.broadcast %cst_68 : f32 to vector<16x1xf32>
    %127 = arith.divf %125, %126 : vector<16x1xf32>
    %128 = vector.broadcast %120 : vector<16x1xf32> to vector<16x32xf32>
    %129 = arith.subf %112, %128 : vector<16x32xf32>
    %cst_69 = arith.constant 9.99999974E-6 : f32
    %130 = vector.broadcast %cst_69 : f32 to vector<16x1xf32>
    %131 = arith.addf %127, %130 : vector<16x1xf32>
    %132 = math.rsqrt %131 : vector<16x1xf32>
    %133 = vector.broadcast %132 : vector<16x1xf32> to vector<16x32xf32>
    %134 = arith.mulf %129, %133 : vector<16x32xf32>
    %135 = vector.broadcast %114 : vector<1x32xf32> to vector<16x32xf32>
    %136 = arith.mulf %134, %135 : vector<16x32xf32>
    %137 = vector.broadcast %116 : vector<1x32xf32> to vector<16x32xf32>
    %138 = arith.addf %136, %137 : vector<16x32xf32>
    %c1 = arith.constant 1 : index
    %c0_70 = arith.constant 0 : index
    %c0_71 = arith.constant 0 : index
    %139 = vector.load %arg5[%c1, %c0_70, %c0_71] : memref<2x32x96xf32, #tpu.memory_space<vmem>>, vector<1x32x96xf32>
    %140 = vector.shape_cast %139 : vector<1x32x96xf32> to vector<32x96xf32>
    %cst_72 = arith.constant dense<0.000000e+00> : vector<16x96xf32>
    %141 = tpu.matmul %138, %140, %cst_72 {dimension_numbers = #tpu.dot_dimension_numbers<[1], [0], [0], [1], [0, 0, 1, 1], [], []>} : vector<16x32xf32>, vector<32x96xf32>, vector<16x96xf32> -> vector<16x96xf32>
    %c1_73 = arith.constant 1 : index
    %c0_74 = arith.constant 0 : index
    %c0_75 = arith.constant 0 : index
    %142 = vector.load %arg6[%c1_73, %c0_74, %c0_75] : memref<2x1x96xf32, #tpu.memory_space<vmem>>, vector<1x1x96xf32>
    %143 = vector.shape_cast %142 : vector<1x1x96xf32> to vector<1x96xf32>
    %144 = vector.broadcast %143 : vector<1x96xf32> to vector<16x96xf32>
    %145 = arith.addf %141, %144 : vector<16x96xf32>
    %146 = vector.extract_strided_slice %145 {offsets = [0, 0], sizes = [8, 96], strides = [1, 1]} : vector<16x96xf32> to vector<8x96xf32>
    %147 = vector.extract_strided_slice %146 {offsets = [0, 0], sizes = [8, 16], strides = [1, 1]} : vector<8x96xf32> to vector<8x16xf32>
    %148 = vector.extract_strided_slice %146 {offsets = [0, 32], sizes = [8, 16], strides = [1, 1]} : vector<8x96xf32> to vector<8x16xf32>
    %cst_76 = arith.constant dense<0.000000e+00> : vector<8x8xf32>
    %149 = tpu.matmul %147, %148, %cst_76 {dimension_numbers = #tpu.dot_dimension_numbers<[1], [1], [0], [0], [0, 0, 1, 0], [], []>} : vector<8x16xf32>, vector<8x16xf32>, vector<8x8xf32> -> vector<8x8xf32>
    %150 = arith.addf %149, %8 : vector<8x8xf32>
    %151 = vector.extract_strided_slice %146 {offsets = [0, 16], sizes = [8, 16], strides = [1, 1]} : vector<8x96xf32> to vector<8x16xf32>
    %152 = vector.extract_strided_slice %146 {offsets = [0, 48], sizes = [8, 16], strides = [1, 1]} : vector<8x96xf32> to vector<8x16xf32>
    %cst_77 = arith.constant dense<0.000000e+00> : vector<8x8xf32>
    %153 = tpu.matmul %151, %152, %cst_77 {dimension_numbers = #tpu.dot_dimension_numbers<[1], [1], [0], [0], [0, 0, 1, 0], [], []>} : vector<8x16xf32>, vector<8x16xf32>, vector<8x8xf32> -> vector<8x8xf32>
    %154 = arith.addf %153, %8 : vector<8x8xf32>
    %155 = vector.extract_strided_slice %145 {offsets = [8, 0], sizes = [8, 96], strides = [1, 1]} : vector<16x96xf32> to vector<8x96xf32>
    %156 = vector.extract_strided_slice %155 {offsets = [0, 0], sizes = [8, 16], strides = [1, 1]} : vector<8x96xf32> to vector<8x16xf32>
    %157 = vector.extract_strided_slice %155 {offsets = [0, 32], sizes = [8, 16], strides = [1, 1]} : vector<8x96xf32> to vector<8x16xf32>
    %cst_78 = arith.constant dense<0.000000e+00> : vector<8x8xf32>
    %158 = tpu.matmul %156, %157, %cst_78 {dimension_numbers = #tpu.dot_dimension_numbers<[1], [1], [0], [0], [0, 0, 1, 0], [], []>} : vector<8x16xf32>, vector<8x16xf32>, vector<8x8xf32> -> vector<8x8xf32>
    %159 = arith.addf %158, %8 : vector<8x8xf32>
    %160 = vector.extract_strided_slice %155 {offsets = [0, 16], sizes = [8, 16], strides = [1, 1]} : vector<8x96xf32> to vector<8x16xf32>
    %161 = vector.extract_strided_slice %155 {offsets = [0, 48], sizes = [8, 16], strides = [1, 1]} : vector<8x96xf32> to vector<8x16xf32>
    %cst_79 = arith.constant dense<0.000000e+00> : vector<8x8xf32>
    %162 = tpu.matmul %160, %161, %cst_79 {dimension_numbers = #tpu.dot_dimension_numbers<[1], [1], [0], [0], [0, 0, 1, 0], [], []>} : vector<8x16xf32>, vector<8x16xf32>, vector<8x8xf32> -> vector<8x8xf32>
    %163 = arith.addf %162, %8 : vector<8x8xf32>
    %164 = tpu.concatenate %150, %154, %159, %163 in 0 : vector<8x8xf32>, vector<8x8xf32>, vector<8x8xf32>, vector<8x8xf32> -> vector<32x8xf32>
    %cst_80 = arith.constant dense<0xFF800000> : vector<32xf32>
    %165 = vector.multi_reduction <maximumf>, %164, %cst_80 [1] : vector<32x8xf32> to vector<32xf32>
    %166 = vector.shape_cast %165 : vector<32xf32> to vector<32x1xf32>
    %167 = vector.broadcast %166 : vector<32x1xf32> to vector<32x8xf32>
    %168 = arith.subf %164, %167 : vector<32x8xf32>
    %169 = math.exp %168 : vector<32x8xf32>
    %cst_81 = arith.constant dense<0.000000e+00> : vector<32xf32>
    %170 = vector.multi_reduction <add>, %169, %cst_81 [1] : vector<32x8xf32> to vector<32xf32>
    %171 = vector.shape_cast %170 : vector<32xf32> to vector<32x1xf32>
    %172 = tpu.reciprocal %171 {approx = true} : vector<32x1xf32> -> vector<32x1xf32>
    %173 = vector.broadcast %172 : vector<32x1xf32> to vector<32x8xf32>
    %174 = arith.mulf %169, %173 : vector<32x8xf32>
    %175 = vector.extract_strided_slice %145 {offsets = [0, 0], sizes = [8, 96], strides = [1, 1]} : vector<16x96xf32> to vector<8x96xf32>
    %176 = vector.extract_strided_slice %175 {offsets = [0, 64], sizes = [8, 16], strides = [1, 1]} : vector<8x96xf32> to vector<8x16xf32>
    %177 = vector.extract_strided_slice %174 {offsets = [0, 0], sizes = [8, 8], strides = [1, 1]} : vector<32x8xf32> to vector<8x8xf32>
    %cst_82 = arith.constant dense<0.000000e+00> : vector<8x16xf32>
    %178 = tpu.matmul %177, %176, %cst_82 {dimension_numbers = #tpu.dot_dimension_numbers<[1], [0], [0], [1], [0, 0, 1, 1], [], []>} : vector<8x8xf32>, vector<8x16xf32>, vector<8x16xf32> -> vector<8x16xf32>
    %179 = vector.extract_strided_slice %175 {offsets = [0, 80], sizes = [8, 16], strides = [1, 1]} : vector<8x96xf32> to vector<8x16xf32>
    %180 = vector.extract_strided_slice %174 {offsets = [8, 0], sizes = [8, 8], strides = [1, 1]} : vector<32x8xf32> to vector<8x8xf32>
    %cst_83 = arith.constant dense<0.000000e+00> : vector<8x16xf32>
    %181 = tpu.matmul %180, %179, %cst_83 {dimension_numbers = #tpu.dot_dimension_numbers<[1], [0], [0], [1], [0, 0, 1, 1], [], []>} : vector<8x8xf32>, vector<8x16xf32>, vector<8x16xf32> -> vector<8x16xf32>
    %182 = tpu.concatenate %178, %181 in 1 : vector<8x16xf32>, vector<8x16xf32> -> vector<8x32xf32>
    %183 = vector.extract_strided_slice %145 {offsets = [8, 0], sizes = [8, 96], strides = [1, 1]} : vector<16x96xf32> to vector<8x96xf32>
    %184 = vector.extract_strided_slice %183 {offsets = [0, 64], sizes = [8, 16], strides = [1, 1]} : vector<8x96xf32> to vector<8x16xf32>
    %185 = vector.extract_strided_slice %174 {offsets = [16, 0], sizes = [8, 8], strides = [1, 1]} : vector<32x8xf32> to vector<8x8xf32>
    %cst_84 = arith.constant dense<0.000000e+00> : vector<8x16xf32>
    %186 = tpu.matmul %185, %184, %cst_84 {dimension_numbers = #tpu.dot_dimension_numbers<[1], [0], [0], [1], [0, 0, 1, 1], [], []>} : vector<8x8xf32>, vector<8x16xf32>, vector<8x16xf32> -> vector<8x16xf32>
    %187 = vector.extract_strided_slice %183 {offsets = [0, 80], sizes = [8, 16], strides = [1, 1]} : vector<8x96xf32> to vector<8x16xf32>
    %188 = vector.extract_strided_slice %174 {offsets = [24, 0], sizes = [8, 8], strides = [1, 1]} : vector<32x8xf32> to vector<8x8xf32>
    %cst_85 = arith.constant dense<0.000000e+00> : vector<8x16xf32>
    %189 = tpu.matmul %188, %187, %cst_85 {dimension_numbers = #tpu.dot_dimension_numbers<[1], [0], [0], [1], [0, 0, 1, 1], [], []>} : vector<8x8xf32>, vector<8x16xf32>, vector<8x16xf32> -> vector<8x16xf32>
    %190 = tpu.concatenate %186, %189 in 1 : vector<8x16xf32>, vector<8x16xf32> -> vector<8x32xf32>
    %191 = tpu.concatenate %182, %190 in 0 : vector<8x32xf32>, vector<8x32xf32> -> vector<16x32xf32>
    %c1_86 = arith.constant 1 : index
    %c0_87 = arith.constant 0 : index
    %c0_88 = arith.constant 0 : index
    %192 = vector.load %arg7[%c1_86, %c0_87, %c0_88] : memref<2x32x32xf32, #tpu.memory_space<vmem>>, vector<1x32x32xf32>
    %193 = vector.shape_cast %192 : vector<1x32x32xf32> to vector<32x32xf32>
    %cst_89 = arith.constant dense<0.000000e+00> : vector<16x32xf32>
    %194 = tpu.matmul %191, %193, %cst_89 {dimension_numbers = #tpu.dot_dimension_numbers<[1], [0], [0], [1], [0, 0, 1, 1], [], []>} : vector<16x32xf32>, vector<32x32xf32>, vector<16x32xf32> -> vector<16x32xf32>
    %c1_90 = arith.constant 1 : index
    %c0_91 = arith.constant 0 : index
    %c0_92 = arith.constant 0 : index
    %195 = vector.load %arg8[%c1_90, %c0_91, %c0_92] : memref<2x1x32xf32, #tpu.memory_space<vmem>>, vector<1x1x32xf32>
    %196 = vector.shape_cast %195 : vector<1x1x32xf32> to vector<1x32xf32>
    %197 = vector.broadcast %196 : vector<1x32xf32> to vector<16x32xf32>
    %198 = arith.addf %194, %197 : vector<16x32xf32>
    %199 = arith.addf %198, %138 : vector<16x32xf32>
    %c1_93 = arith.constant 1 : index
    %c0_94 = arith.constant 0 : index
    %c0_95 = arith.constant 0 : index
    %200 = vector.load %arg9[%c1_93, %c0_94, %c0_95] : memref<2x1x32xf32, #tpu.memory_space<vmem>>, vector<1x1x32xf32>
    %201 = vector.shape_cast %200 : vector<1x1x32xf32> to vector<1x32xf32>
    %c1_96 = arith.constant 1 : index
    %c0_97 = arith.constant 0 : index
    %c0_98 = arith.constant 0 : index
    %202 = vector.load %arg10[%c1_96, %c0_97, %c0_98] : memref<2x1x32xf32, #tpu.memory_space<vmem>>, vector<1x1x32xf32>
    %203 = vector.shape_cast %202 : vector<1x1x32xf32> to vector<1x32xf32>
    %cst_99 = arith.constant dense<0.000000e+00> : vector<16xf32>
    %204 = vector.multi_reduction <add>, %199, %cst_99 [1] : vector<16x32xf32> to vector<16xf32>
    %205 = vector.shape_cast %204 : vector<16xf32> to vector<16x1xf32>
    %cst_100 = arith.constant 3.200000e+01 : f32
    %206 = vector.broadcast %cst_100 : f32 to vector<16x1xf32>
    %207 = arith.divf %205, %206 : vector<16x1xf32>
    %208 = vector.broadcast %207 : vector<16x1xf32> to vector<16x32xf32>
    %209 = arith.subf %199, %208 : vector<16x32xf32>
    %210 = arith.mulf %209, %209 : vector<16x32xf32>
    %cst_101 = arith.constant dense<0.000000e+00> : vector<16xf32>
    %211 = vector.multi_reduction <add>, %210, %cst_101 [1] : vector<16x32xf32> to vector<16xf32>
    %212 = vector.shape_cast %211 : vector<16xf32> to vector<16x1xf32>
    %cst_102 = arith.constant 3.200000e+01 : f32
    %213 = vector.broadcast %cst_102 : f32 to vector<16x1xf32>
    %214 = arith.divf %212, %213 : vector<16x1xf32>
    %215 = vector.broadcast %207 : vector<16x1xf32> to vector<16x32xf32>
    %216 = arith.subf %199, %215 : vector<16x32xf32>
    %cst_103 = arith.constant 9.99999974E-6 : f32
    %217 = vector.broadcast %cst_103 : f32 to vector<16x1xf32>
    %218 = arith.addf %214, %217 : vector<16x1xf32>
    %219 = math.rsqrt %218 : vector<16x1xf32>
    %220 = vector.broadcast %219 : vector<16x1xf32> to vector<16x32xf32>
    %221 = arith.mulf %216, %220 : vector<16x32xf32>
    %222 = vector.broadcast %201 : vector<1x32xf32> to vector<16x32xf32>
    %223 = arith.mulf %221, %222 : vector<16x32xf32>
    %224 = vector.broadcast %203 : vector<1x32xf32> to vector<16x32xf32>
    %225 = arith.addf %223, %224 : vector<16x32xf32>
    %c1_104 = arith.constant 1 : index
    %c0_105 = arith.constant 0 : index
    %c0_106 = arith.constant 0 : index
    %226 = vector.load %arg11[%c1_104, %c0_105, %c0_106] : memref<2x32x32xf32, #tpu.memory_space<vmem>>, vector<1x32x32xf32>
    %227 = vector.shape_cast %226 : vector<1x32x32xf32> to vector<32x32xf32>
    %cst_107 = arith.constant dense<0.000000e+00> : vector<16x32xf32>
    %228 = tpu.matmul %225, %227, %cst_107 {dimension_numbers = #tpu.dot_dimension_numbers<[1], [0], [0], [1], [0, 0, 1, 1], [], []>} : vector<16x32xf32>, vector<32x32xf32>, vector<16x32xf32> -> vector<16x32xf32>
    %c1_108 = arith.constant 1 : index
    %c0_109 = arith.constant 0 : index
    %c0_110 = arith.constant 0 : index
    %229 = vector.load %arg12[%c1_108, %c0_109, %c0_110] : memref<2x1x32xf32, #tpu.memory_space<vmem>>, vector<1x1x32xf32>
    %230 = vector.shape_cast %229 : vector<1x1x32xf32> to vector<1x32xf32>
    %231 = vector.broadcast %230 : vector<1x32xf32> to vector<16x32xf32>
    %232 = arith.addf %228, %231 : vector<16x32xf32>
    %cst_111 = arith.constant 0.000000e+00 : f32
    %233 = vector.broadcast %cst_111 : f32 to vector<16x32xf32>
    %234 = arith.maximumf %232, %233 : vector<16x32xf32>
    %c1_112 = arith.constant 1 : index
    %c0_113 = arith.constant 0 : index
    %c0_114 = arith.constant 0 : index
    %235 = vector.load %arg13[%c1_112, %c0_113, %c0_114] : memref<2x32x32xf32, #tpu.memory_space<vmem>>, vector<1x32x32xf32>
    %236 = vector.shape_cast %235 : vector<1x32x32xf32> to vector<32x32xf32>
    %cst_115 = arith.constant dense<0.000000e+00> : vector<16x32xf32>
    %237 = tpu.matmul %234, %236, %cst_115 {dimension_numbers = #tpu.dot_dimension_numbers<[1], [0], [0], [1], [0, 0, 1, 1], [], []>} : vector<16x32xf32>, vector<32x32xf32>, vector<16x32xf32> -> vector<16x32xf32>
    %c1_116 = arith.constant 1 : index
    %c0_117 = arith.constant 0 : index
    %c0_118 = arith.constant 0 : index
    %238 = vector.load %arg14[%c1_116, %c0_117, %c0_118] : memref<2x1x32xf32, #tpu.memory_space<vmem>>, vector<1x1x32xf32>
    %239 = vector.shape_cast %238 : vector<1x1x32xf32> to vector<1x32xf32>
    %240 = vector.broadcast %239 : vector<1x32xf32> to vector<16x32xf32>
    %241 = arith.addf %237, %240 : vector<16x32xf32>
    %242 = arith.addf %241, %225 : vector<16x32xf32>
    %c1_119 = arith.constant 1 : index
    %c0_120 = arith.constant 0 : index
    %c0_121 = arith.constant 0 : index
    %243 = vector.load %arg15[%c1_119, %c0_120, %c0_121] : memref<2x1x32xf32, #tpu.memory_space<vmem>>, vector<1x1x32xf32>
    %244 = vector.shape_cast %243 : vector<1x1x32xf32> to vector<1x32xf32>
    %c1_122 = arith.constant 1 : index
    %c0_123 = arith.constant 0 : index
    %c0_124 = arith.constant 0 : index
    %245 = vector.load %arg16[%c1_122, %c0_123, %c0_124] : memref<2x1x32xf32, #tpu.memory_space<vmem>>, vector<1x1x32xf32>
    %246 = vector.shape_cast %245 : vector<1x1x32xf32> to vector<1x32xf32>
    %cst_125 = arith.constant dense<0.000000e+00> : vector<16xf32>
    %247 = vector.multi_reduction <add>, %242, %cst_125 [1] : vector<16x32xf32> to vector<16xf32>
    %248 = vector.shape_cast %247 : vector<16xf32> to vector<16x1xf32>
    %cst_126 = arith.constant 3.200000e+01 : f32
    %249 = vector.broadcast %cst_126 : f32 to vector<16x1xf32>
    %250 = arith.divf %248, %249 : vector<16x1xf32>
    %251 = vector.broadcast %250 : vector<16x1xf32> to vector<16x32xf32>
    %252 = arith.subf %242, %251 : vector<16x32xf32>
    %253 = arith.mulf %252, %252 : vector<16x32xf32>
    %cst_127 = arith.constant dense<0.000000e+00> : vector<16xf32>
    %254 = vector.multi_reduction <add>, %253, %cst_127 [1] : vector<16x32xf32> to vector<16xf32>
    %255 = vector.shape_cast %254 : vector<16xf32> to vector<16x1xf32>
    %cst_128 = arith.constant 3.200000e+01 : f32
    %256 = vector.broadcast %cst_128 : f32 to vector<16x1xf32>
    %257 = arith.divf %255, %256 : vector<16x1xf32>
    %258 = vector.broadcast %250 : vector<16x1xf32> to vector<16x32xf32>
    %259 = arith.subf %242, %258 : vector<16x32xf32>
    %cst_129 = arith.constant 9.99999974E-6 : f32
    %260 = vector.broadcast %cst_129 : f32 to vector<16x1xf32>
    %261 = arith.addf %257, %260 : vector<16x1xf32>
    %262 = math.rsqrt %261 : vector<16x1xf32>
    %263 = vector.broadcast %262 : vector<16x1xf32> to vector<16x32xf32>
    %264 = arith.mulf %259, %263 : vector<16x32xf32>
    %265 = vector.broadcast %244 : vector<1x32xf32> to vector<16x32xf32>
    %266 = arith.mulf %264, %265 : vector<16x32xf32>
    %267 = vector.broadcast %246 : vector<1x32xf32> to vector<16x32xf32>
    %268 = arith.addf %266, %267 : vector<16x32xf32>
    %c0_130 = arith.constant 0 : index
    %c0_131 = arith.constant 0 : index
    %269 = vector.load %arg24[%c0_130, %c0_131] : memref<32x72xf32, #tpu.memory_space<vmem>>, vector<32x72xf32>
    %cst_132 = arith.constant dense<0.000000e+00> : vector<16x72xf32>
    %270 = tpu.matmul %268, %269, %cst_132 {dimension_numbers = #tpu.dot_dimension_numbers<[1], [0], [0], [1], [0, 0, 1, 1], [], []>} : vector<16x32xf32>, vector<32x72xf32>, vector<16x72xf32> -> vector<16x72xf32>
    %c0_133 = arith.constant 0 : index
    %c0_134 = arith.constant 0 : index
    %271 = vector.load %arg25[%c0_133, %c0_134] : memref<1x72xf32, #tpu.memory_space<vmem>>, vector<1x72xf32>
    %272 = vector.broadcast %271 : vector<1x72xf32> to vector<16x72xf32>
    %273 = arith.addf %270, %272 : vector<16x72xf32>
    %274 = vector.shape_cast %273 : vector<16x72xf32> to vector<2x8x72xf32>
    %c0_135 = arith.constant 0 : index
    %c0_136 = arith.constant 0 : index
    %c0_137 = arith.constant 0 : index
    %275 = vector.load %arg19[%c0_135, %c0_136, %c0_137] : memref<3x2x32xf32, #tpu.memory_space<vmem>>, vector<1x2x32xf32>
    %276 = vector.shape_cast %275 : vector<1x2x32xf32> to vector<2x32xf32>
    %c1_138 = arith.constant 1 : index
    %c0_139 = arith.constant 0 : index
    %c0_140 = arith.constant 0 : index
    %277 = vector.load %arg19[%c1_138, %c0_139, %c0_140] : memref<3x2x32xf32, #tpu.memory_space<vmem>>, vector<1x2x32xf32>
    %278 = vector.shape_cast %277 : vector<1x2x32xf32> to vector<2x32xf32>
    %c2 = arith.constant 2 : index
    %c0_141 = arith.constant 0 : index
    %c0_142 = arith.constant 0 : index
    %279 = vector.load %arg19[%c2, %c0_141, %c0_142] : memref<3x2x32xf32, #tpu.memory_space<vmem>>, vector<1x2x32xf32>
    %280 = vector.shape_cast %279 : vector<1x2x32xf32> to vector<2x32xf32>
    %c0_143 = arith.constant 0 : index
    %c0_144 = arith.constant 0 : index
    %c0_145 = arith.constant 0 : index
    %281 = vector.load %arg20[%c0_143, %c0_144, %c0_145] : memref<3x2x32xf32, #tpu.memory_space<vmem>>, vector<1x2x32xf32>
    %282 = vector.shape_cast %281 : vector<1x2x32xf32> to vector<2x32xf32>
    %c1_146 = arith.constant 1 : index
    %c0_147 = arith.constant 0 : index
    %c0_148 = arith.constant 0 : index
    %283 = vector.load %arg20[%c1_146, %c0_147, %c0_148] : memref<3x2x32xf32, #tpu.memory_space<vmem>>, vector<1x2x32xf32>
    %284 = vector.shape_cast %283 : vector<1x2x32xf32> to vector<2x32xf32>
    %c2_149 = arith.constant 2 : index
    %c0_150 = arith.constant 0 : index
    %c0_151 = arith.constant 0 : index
    %285 = vector.load %arg20[%c2_149, %c0_150, %c0_151] : memref<3x2x32xf32, #tpu.memory_space<vmem>>, vector<1x2x32xf32>
    %286 = vector.shape_cast %285 : vector<1x2x32xf32> to vector<2x32xf32>
    %c0_152 = arith.constant 0 : index
    %c0_153 = arith.constant 0 : index
    %287 = vector.load %arg18[%c0_152, %c0_153] : memref<2x72xf32, #tpu.memory_space<vmem>>, vector<2x72xf32>
    %288 = tpu.concatenate %287, %276, %278, %280 in 1 : vector<2x72xf32>, vector<2x32xf32>, vector<2x32xf32>, vector<2x32xf32> -> vector<2x168xf32>
    %c0_154 = arith.constant 0 : index
    %c0_155 = arith.constant 0 : index
    %289 = vector.load %arg21[%c0_154, %c0_155] : memref<168x384xf32, #tpu.memory_space<vmem>>, vector<168x384xf32>
    %cst_156 = arith.constant dense<0.000000e+00> : vector<2x384xf32>
    %290 = tpu.matmul %288, %289, %cst_156 {dimension_numbers = #tpu.dot_dimension_numbers<[1], [0], [0], [1], [0, 0, 1, 1], [], []>} : vector<2x168xf32>, vector<168x384xf32>, vector<2x384xf32> -> vector<2x384xf32>
    %c0_157 = arith.constant 0 : index
    %c0_158 = arith.constant 0 : index
    %291 = vector.load %arg22[%c0_157, %c0_158] : memref<1x384xf32, #tpu.memory_space<vmem>>, vector<1x384xf32>
    %292 = vector.broadcast %291 : vector<1x384xf32> to vector<2x384xf32>
    %293 = arith.addf %290, %292 : vector<2x384xf32>
    %294 = arith.negf %293 : vector<2x384xf32>
    %295 = math.exp %294 : vector<2x384xf32>
    %cst_159 = arith.constant 1.000000e+00 : f32
    %296 = vector.broadcast %cst_159 : f32 to vector<2x384xf32>
    %297 = arith.addf %296, %295 : vector<2x384xf32>
    %298 = arith.divf %296, %297 : vector<2x384xf32>
    %299 = math.tanh %293 : vector<2x384xf32>
    %300 = vector.extract_strided_slice %298 {offsets = [0, 0], sizes = [2, 32], strides = [1, 1]} : vector<2x384xf32> to vector<2x32xf32>
    %301 = vector.extract_strided_slice %298 {offsets = [0, 32], sizes = [2, 32], strides = [1, 1]} : vector<2x384xf32> to vector<2x32xf32>
    %302 = vector.extract_strided_slice %299 {offsets = [0, 64], sizes = [2, 32], strides = [1, 1]} : vector<2x384xf32> to vector<2x32xf32>
    %303 = vector.extract_strided_slice %298 {offsets = [0, 96], sizes = [2, 32], strides = [1, 1]} : vector<2x384xf32> to vector<2x32xf32>
    %304 = arith.mulf %301, %282 : vector<2x32xf32>
    %305 = arith.mulf %300, %302 : vector<2x32xf32>
    %306 = arith.addf %304, %305 : vector<2x32xf32>
    %307 = math.tanh %306 : vector<2x32xf32>
    %308 = arith.mulf %303, %307 : vector<2x32xf32>
    %309 = vector.extract_strided_slice %298 {offsets = [0, 128], sizes = [2, 32], strides = [1, 1]} : vector<2x384xf32> to vector<2x32xf32>
    %310 = vector.extract_strided_slice %298 {offsets = [0, 160], sizes = [2, 32], strides = [1, 1]} : vector<2x384xf32> to vector<2x32xf32>
    %311 = vector.extract_strided_slice %299 {offsets = [0, 192], sizes = [2, 32], strides = [1, 1]} : vector<2x384xf32> to vector<2x32xf32>
    %312 = vector.extract_strided_slice %298 {offsets = [0, 224], sizes = [2, 32], strides = [1, 1]} : vector<2x384xf32> to vector<2x32xf32>
    %313 = arith.mulf %310, %284 : vector<2x32xf32>
    %314 = arith.mulf %309, %311 : vector<2x32xf32>
    %315 = arith.addf %313, %314 : vector<2x32xf32>
    %316 = math.tanh %315 : vector<2x32xf32>
    %317 = arith.mulf %312, %316 : vector<2x32xf32>
    %318 = vector.extract_strided_slice %298 {offsets = [0, 256], sizes = [2, 32], strides = [1, 1]} : vector<2x384xf32> to vector<2x32xf32>
    %319 = vector.extract_strided_slice %298 {offsets = [0, 288], sizes = [2, 32], strides = [1, 1]} : vector<2x384xf32> to vector<2x32xf32>
    %320 = vector.extract_strided_slice %299 {offsets = [0, 320], sizes = [2, 32], strides = [1, 1]} : vector<2x384xf32> to vector<2x32xf32>
    %321 = vector.extract_strided_slice %298 {offsets = [0, 352], sizes = [2, 32], strides = [1, 1]} : vector<2x384xf32> to vector<2x32xf32>
    %322 = arith.mulf %319, %286 : vector<2x32xf32>
    %323 = arith.mulf %318, %320 : vector<2x32xf32>
    %324 = arith.addf %322, %323 : vector<2x32xf32>
    %325 = math.tanh %324 : vector<2x32xf32>
    %326 = arith.mulf %321, %325 : vector<2x32xf32>
    %c0_160 = arith.constant 0 : index
    %c0_161 = arith.constant 0 : index
    %327 = vector.load %arg23[%c0_160, %c0_161] : memref<32x72xf32, #tpu.memory_space<vmem>>, vector<32x72xf32>
    %cst_162 = arith.constant dense<0.000000e+00> : vector<2x72xf32>
    %328 = tpu.matmul %326, %327, %cst_162 {dimension_numbers = #tpu.dot_dimension_numbers<[1], [0], [0], [1], [0, 0, 1, 1], [], []>} : vector<2x32xf32>, vector<32x72xf32>, vector<2x72xf32> -> vector<2x72xf32>
    %329 = vector.extract_strided_slice %274 {offsets = [0, 0, 0], sizes = [2, 1, 72], strides = [1, 1, 1]} : vector<2x8x72xf32> to vector<2x1x72xf32>
    %330 = vector.shape_cast %329 : vector<2x1x72xf32> to vector<2x72xf32>
    %331 = arith.addf %328, %330 : vector<2x72xf32>
    %c0_163 = arith.constant 0 : index
    %c0_164 = arith.constant 0 : index
    %c0_165 = arith.constant 0 : index
    %332 = vector.load %arg26[%c0_163, %c0_164, %c0_165] : memref<2x8x72xf32, #tpu.memory_space<vmem>>, vector<2x1x72xf32>
    %333 = vector.shape_cast %332 : vector<2x1x72xf32> to vector<2x72xf32>
    %334 = vector.shape_cast %331 : vector<2x72xf32> to vector<2x1x72xf32>
    tpu.vector_store %arg26[%c0_163, %c0_164, %c0_165], %334 {strides = array<i32>} : memref<2x8x72xf32, #tpu.memory_space<vmem>>, vector<2x1x72xf32>,
    %c0_166 = arith.constant 0 : index
    %c1_167 = arith.constant 1 : index
    %c0_168 = arith.constant 0 : index
    %335 = vector.load %arg17[%c0_166, %c1_167, %c0_168] : memref<2x8x72xf32, #tpu.memory_space<vmem>>, vector<2x1x72xf32>
    %336 = vector.shape_cast %335 : vector<2x1x72xf32> to vector<2x72xf32>
    %337 = tpu.concatenate %336, %308, %317, %326 in 1 : vector<2x72xf32>, vector<2x32xf32>, vector<2x32xf32>, vector<2x32xf32> -> vector<2x168xf32>
    %c0_169 = arith.constant 0 : index
    %c0_170 = arith.constant 0 : index
    %338 = vector.load %arg21[%c0_169, %c0_170] : memref<168x384xf32, #tpu.memory_space<vmem>>, vector<168x384xf32>
    %cst_171 = arith.constant dense<0.000000e+00> : vector<2x384xf32>
    %339 = tpu.matmul %337, %338, %cst_171 {dimension_numbers = #tpu.dot_dimension_numbers<[1], [0], [0], [1], [0, 0, 1, 1], [], []>} : vector<2x168xf32>, vector<168x384xf32>, vector<2x384xf32> -> vector<2x384xf32>
    %c0_172 = arith.constant 0 : index
    %c0_173 = arith.constant 0 : index
    %340 = vector.load %arg22[%c0_172, %c0_173] : memref<1x384xf32, #tpu.memory_space<vmem>>, vector<1x384xf32>
    %341 = vector.broadcast %340 : vector<1x384xf32> to vector<2x384xf32>
    %342 = arith.addf %339, %341 : vector<2x384xf32>
    %343 = arith.negf %342 : vector<2x384xf32>
    %344 = math.exp %343 : vector<2x384xf32>
    %cst_174 = arith.constant 1.000000e+00 : f32
    %345 = vector.broadcast %cst_174 : f32 to vector<2x384xf32>
    %346 = arith.addf %345, %344 : vector<2x384xf32>
    %347 = arith.divf %345, %346 : vector<2x384xf32>
    %348 = math.tanh %342 : vector<2x384xf32>
    %349 = vector.extract_strided_slice %347 {offsets = [0, 0], sizes = [2, 32], strides = [1, 1]} : vector<2x384xf32> to vector<2x32xf32>
    %350 = vector.extract_strided_slice %347 {offsets = [0, 32], sizes = [2, 32], strides = [1, 1]} : vector<2x384xf32> to vector<2x32xf32>
    %351 = vector.extract_strided_slice %348 {offsets = [0, 64], sizes = [2, 32], strides = [1, 1]} : vector<2x384xf32> to vector<2x32xf32>
    %352 = vector.extract_strided_slice %347 {offsets = [0, 96], sizes = [2, 32], strides = [1, 1]} : vector<2x384xf32> to vector<2x32xf32>
    %353 = arith.mulf %350, %306 : vector<2x32xf32>
    %354 = arith.mulf %349, %351 : vector<2x32xf32>
    %355 = arith.addf %353, %354 : vector<2x32xf32>
    %356 = math.tanh %355 : vector<2x32xf32>
    %357 = arith.mulf %352, %356 : vector<2x32xf32>
    %358 = vector.extract_strided_slice %347 {offsets = [0, 128], sizes = [2, 32], strides = [1, 1]} : vector<2x384xf32> to vector<2x32xf32>
    %359 = vector.extract_strided_slice %347 {offsets = [0, 160], sizes = [2, 32], strides = [1, 1]} : vector<2x384xf32> to vector<2x32xf32>
    %360 = vector.extract_strided_slice %348 {offsets = [0, 192], sizes = [2, 32], strides = [1, 1]} : vector<2x384xf32> to vector<2x32xf32>
    %361 = vector.extract_strided_slice %347 {offsets = [0, 224], sizes = [2, 32], strides = [1, 1]} : vector<2x384xf32> to vector<2x32xf32>
    %362 = arith.mulf %359, %315 : vector<2x32xf32>
    %363 = arith.mulf %358, %360 : vector<2x32xf32>
    %364 = arith.addf %362, %363 : vector<2x32xf32>
    %365 = math.tanh %364 : vector<2x32xf32>
    %366 = arith.mulf %361, %365 : vector<2x32xf32>
    %367 = vector.extract_strided_slice %347 {offsets = [0, 256], sizes = [2, 32], strides = [1, 1]} : vector<2x384xf32> to vector<2x32xf32>
    %368 = vector.extract_strided_slice %347 {offsets = [0, 288], sizes = [2, 32], strides = [1, 1]} : vector<2x384xf32> to vector<2x32xf32>
    %369 = vector.extract_strided_slice %348 {offsets = [0, 320], sizes = [2, 32], strides = [1, 1]} : vector<2x384xf32> to vector<2x32xf32>
    %370 = vector.extract_strided_slice %347 {offsets = [0, 352], sizes = [2, 32], strides = [1, 1]} : vector<2x384xf32> to vector<2x32xf32>
    %371 = arith.mulf %368, %324 : vector<2x32xf32>
    %372 = arith.mulf %367, %369 : vector<2x32xf32>
    %373 = arith.addf %371, %372 : vector<2x32xf32>
    %374 = math.tanh %373 : vector<2x32xf32>
    %375 = arith.mulf %370, %374 : vector<2x32xf32>
    %c0_175 = arith.constant 0 : index
    %c0_176 = arith.constant 0 : index
    %376 = vector.load %arg23[%c0_175, %c0_176] : memref<32x72xf32, #tpu.memory_space<vmem>>, vector<32x72xf32>
    %cst_177 = arith.constant dense<0.000000e+00> : vector<2x72xf32>
    %377 = tpu.matmul %375, %376, %cst_177 {dimension_numbers = #tpu.dot_dimension_numbers<[1], [0], [0], [1], [0, 0, 1, 1], [], []>} : vector<2x32xf32>, vector<32x72xf32>, vector<2x72xf32> -> vector<2x72xf32>
    %378 = vector.extract_strided_slice %274 {offsets = [0, 1, 0], sizes = [2, 1, 72], strides = [1, 1, 1]} : vector<2x8x72xf32> to vector<2x1x72xf32>
    %379 = vector.shape_cast %378 : vector<2x1x72xf32> to vector<2x72xf32>
    %380 = arith.addf %377, %379 : vector<2x72xf32>
    %c0_178 = arith.constant 0 : index
    %c1_179 = arith.constant 1 : index
    %c0_180 = arith.constant 0 : index
    %381 = vector.load %arg26[%c0_178, %c1_179, %c0_180] : memref<2x8x72xf32, #tpu.memory_space<vmem>>, vector<2x1x72xf32>
    %382 = vector.shape_cast %381 : vector<2x1x72xf32> to vector<2x72xf32>
    %383 = vector.shape_cast %380 : vector<2x72xf32> to vector<2x1x72xf32>
    tpu.vector_store %arg26[%c0_178, %c1_179, %c0_180], %383 {strides = array<i32>} : memref<2x8x72xf32, #tpu.memory_space<vmem>>, vector<2x1x72xf32>,
    %c0_181 = arith.constant 0 : index
    %c2_182 = arith.constant 2 : index
    %c0_183 = arith.constant 0 : index
    %384 = vector.load %arg17[%c0_181, %c2_182, %c0_183] : memref<2x8x72xf32, #tpu.memory_space<vmem>>, vector<2x1x72xf32>
    %385 = vector.shape_cast %384 : vector<2x1x72xf32> to vector<2x72xf32>
    %386 = tpu.concatenate %385, %357, %366, %375 in 1 : vector<2x72xf32>, vector<2x32xf32>, vector<2x32xf32>, vector<2x32xf32> -> vector<2x168xf32>
    %c0_184 = arith.constant 0 : index
    %c0_185 = arith.constant 0 : index
    %387 = vector.load %arg21[%c0_184, %c0_185] : memref<168x384xf32, #tpu.memory_space<vmem>>, vector<168x384xf32>
    %cst_186 = arith.constant dense<0.000000e+00> : vector<2x384xf32>
    %388 = tpu.matmul %386, %387, %cst_186 {dimension_numbers = #tpu.dot_dimension_numbers<[1], [0], [0], [1], [0, 0, 1, 1], [], []>} : vector<2x168xf32>, vector<168x384xf32>, vector<2x384xf32> -> vector<2x384xf32>
    %c0_187 = arith.constant 0 : index
    %c0_188 = arith.constant 0 : index
    %389 = vector.load %arg22[%c0_187, %c0_188] : memref<1x384xf32, #tpu.memory_space<vmem>>, vector<1x384xf32>
    %390 = vector.broadcast %389 : vector<1x384xf32> to vector<2x384xf32>
    %391 = arith.addf %388, %390 : vector<2x384xf32>
    %392 = arith.negf %391 : vector<2x384xf32>
    %393 = math.exp %392 : vector<2x384xf32>
    %cst_189 = arith.constant 1.000000e+00 : f32
    %394 = vector.broadcast %cst_189 : f32 to vector<2x384xf32>
    %395 = arith.addf %394, %393 : vector<2x384xf32>
    %396 = arith.divf %394, %395 : vector<2x384xf32>
    %397 = math.tanh %391 : vector<2x384xf32>
    %398 = vector.extract_strided_slice %396 {offsets = [0, 0], sizes = [2, 32], strides = [1, 1]} : vector<2x384xf32> to vector<2x32xf32>
    %399 = vector.extract_strided_slice %396 {offsets = [0, 32], sizes = [2, 32], strides = [1, 1]} : vector<2x384xf32> to vector<2x32xf32>
    %400 = vector.extract_strided_slice %397 {offsets = [0, 64], sizes = [2, 32], strides = [1, 1]} : vector<2x384xf32> to vector<2x32xf32>
    %401 = vector.extract_strided_slice %396 {offsets = [0, 96], sizes = [2, 32], strides = [1, 1]} : vector<2x384xf32> to vector<2x32xf32>
    %402 = arith.mulf %399, %355 : vector<2x32xf32>
    %403 = arith.mulf %398, %400 : vector<2x32xf32>
    %404 = arith.addf %402, %403 : vector<2x32xf32>
    %405 = math.tanh %404 : vector<2x32xf32>
    %406 = arith.mulf %401, %405 : vector<2x32xf32>
    %407 = vector.extract_strided_slice %396 {offsets = [0, 128], sizes = [2, 32], strides = [1, 1]} : vector<2x384xf32> to vector<2x32xf32>
    %408 = vector.extract_strided_slice %396 {offsets = [0, 160], sizes = [2, 32], strides = [1, 1]} : vector<2x384xf32> to vector<2x32xf32>
    %409 = vector.extract_strided_slice %397 {offsets = [0, 192], sizes = [2, 32], strides = [1, 1]} : vector<2x384xf32> to vector<2x32xf32>
    %410 = vector.extract_strided_slice %396 {offsets = [0, 224], sizes = [2, 32], strides = [1, 1]} : vector<2x384xf32> to vector<2x32xf32>
    %411 = arith.mulf %408, %364 : vector<2x32xf32>
    %412 = arith.mulf %407, %409 : vector<2x32xf32>
    %413 = arith.addf %411, %412 : vector<2x32xf32>
    %414 = math.tanh %413 : vector<2x32xf32>
    %415 = arith.mulf %410, %414 : vector<2x32xf32>
    %416 = vector.extract_strided_slice %396 {offsets = [0, 256], sizes = [2, 32], strides = [1, 1]} : vector<2x384xf32> to vector<2x32xf32>
    %417 = vector.extract_strided_slice %396 {offsets = [0, 288], sizes = [2, 32], strides = [1, 1]} : vector<2x384xf32> to vector<2x32xf32>
    %418 = vector.extract_strided_slice %397 {offsets = [0, 320], sizes = [2, 32], strides = [1, 1]} : vector<2x384xf32> to vector<2x32xf32>
    %419 = vector.extract_strided_slice %396 {offsets = [0, 352], sizes = [2, 32], strides = [1, 1]} : vector<2x384xf32> to vector<2x32xf32>
    %420 = arith.mulf %417, %373 : vector<2x32xf32>
    %421 = arith.mulf %416, %418 : vector<2x32xf32>
    %422 = arith.addf %420, %421 : vector<2x32xf32>
    %423 = math.tanh %422 : vector<2x32xf32>
    %424 = arith.mulf %419, %423 : vector<2x32xf32>
    %c0_190 = arith.constant 0 : index
    %c0_191 = arith.constant 0 : index
    %425 = vector.load %arg23[%c0_190, %c0_191] : memref<32x72xf32, #tpu.memory_space<vmem>>, vector<32x72xf32>
    %cst_192 = arith.constant dense<0.000000e+00> : vector<2x72xf32>
    %426 = tpu.matmul %424, %425, %cst_192 {dimension_numbers = #tpu.dot_dimension_numbers<[1], [0], [0], [1], [0, 0, 1, 1], [], []>} : vector<2x32xf32>, vector<32x72xf32>, vector<2x72xf32> -> vector<2x72xf32>
    %427 = vector.extract_strided_slice %274 {offsets = [0, 2, 0], sizes = [2, 1, 72], strides = [1, 1, 1]} : vector<2x8x72xf32> to vector<2x1x72xf32>
    %428 = vector.shape_cast %427 : vector<2x1x72xf32> to vector<2x72xf32>
    %429 = arith.addf %426, %428 : vector<2x72xf32>
    %c0_193 = arith.constant 0 : index
    %c2_194 = arith.constant 2 : index
    %c0_195 = arith.constant 0 : index
    %430 = vector.load %arg26[%c0_193, %c2_194, %c0_195] : memref<2x8x72xf32, #tpu.memory_space<vmem>>, vector<2x1x72xf32>
    %431 = vector.shape_cast %430 : vector<2x1x72xf32> to vector<2x72xf32>
    %432 = vector.shape_cast %429 : vector<2x72xf32> to vector<2x1x72xf32>
    tpu.vector_store %arg26[%c0_193, %c2_194, %c0_195], %432 {strides = array<i32>} : memref<2x8x72xf32, #tpu.memory_space<vmem>>, vector<2x1x72xf32>,
    %c0_196 = arith.constant 0 : index
    %c3 = arith.constant 3 : index
    %c0_197 = arith.constant 0 : index
    %433 = vector.load %arg17[%c0_196, %c3, %c0_197] : memref<2x8x72xf32, #tpu.memory_space<vmem>>, vector<2x1x72xf32>
    %434 = vector.shape_cast %433 : vector<2x1x72xf32> to vector<2x72xf32>
    %435 = tpu.concatenate %434, %406, %415, %424 in 1 : vector<2x72xf32>, vector<2x32xf32>, vector<2x32xf32>, vector<2x32xf32> -> vector<2x168xf32>
    %c0_198 = arith.constant 0 : index
    %c0_199 = arith.constant 0 : index
    %436 = vector.load %arg21[%c0_198, %c0_199] : memref<168x384xf32, #tpu.memory_space<vmem>>, vector<168x384xf32>
    %cst_200 = arith.constant dense<0.000000e+00> : vector<2x384xf32>
    %437 = tpu.matmul %435, %436, %cst_200 {dimension_numbers = #tpu.dot_dimension_numbers<[1], [0], [0], [1], [0, 0, 1, 1], [], []>} : vector<2x168xf32>, vector<168x384xf32>, vector<2x384xf32> -> vector<2x384xf32>
    %c0_201 = arith.constant 0 : index
    %c0_202 = arith.constant 0 : index
    %438 = vector.load %arg22[%c0_201, %c0_202] : memref<1x384xf32, #tpu.memory_space<vmem>>, vector<1x384xf32>
    %439 = vector.broadcast %438 : vector<1x384xf32> to vector<2x384xf32>
    %440 = arith.addf %437, %439 : vector<2x384xf32>
    %441 = arith.negf %440 : vector<2x384xf32>
    %442 = math.exp %441 : vector<2x384xf32>
    %cst_203 = arith.constant 1.000000e+00 : f32
    %443 = vector.broadcast %cst_203 : f32 to vector<2x384xf32>
    %444 = arith.addf %443, %442 : vector<2x384xf32>
    %445 = arith.divf %443, %444 : vector<2x384xf32>
    %446 = math.tanh %440 : vector<2x384xf32>
    %447 = vector.extract_strided_slice %445 {offsets = [0, 0], sizes = [2, 32], strides = [1, 1]} : vector<2x384xf32> to vector<2x32xf32>
    %448 = vector.extract_strided_slice %445 {offsets = [0, 32], sizes = [2, 32], strides = [1, 1]} : vector<2x384xf32> to vector<2x32xf32>
    %449 = vector.extract_strided_slice %446 {offsets = [0, 64], sizes = [2, 32], strides = [1, 1]} : vector<2x384xf32> to vector<2x32xf32>
    %450 = vector.extract_strided_slice %445 {offsets = [0, 96], sizes = [2, 32], strides = [1, 1]} : vector<2x384xf32> to vector<2x32xf32>
    %451 = arith.mulf %448, %404 : vector<2x32xf32>
    %452 = arith.mulf %447, %449 : vector<2x32xf32>
    %453 = arith.addf %451, %452 : vector<2x32xf32>
    %454 = math.tanh %453 : vector<2x32xf32>
    %455 = arith.mulf %450, %454 : vector<2x32xf32>
    %456 = vector.extract_strided_slice %445 {offsets = [0, 128], sizes = [2, 32], strides = [1, 1]} : vector<2x384xf32> to vector<2x32xf32>
    %457 = vector.extract_strided_slice %445 {offsets = [0, 160], sizes = [2, 32], strides = [1, 1]} : vector<2x384xf32> to vector<2x32xf32>
    %458 = vector.extract_strided_slice %446 {offsets = [0, 192], sizes = [2, 32], strides = [1, 1]} : vector<2x384xf32> to vector<2x32xf32>
    %459 = vector.extract_strided_slice %445 {offsets = [0, 224], sizes = [2, 32], strides = [1, 1]} : vector<2x384xf32> to vector<2x32xf32>
    %460 = arith.mulf %457, %413 : vector<2x32xf32>
    %461 = arith.mulf %456, %458 : vector<2x32xf32>
    %462 = arith.addf %460, %461 : vector<2x32xf32>
    %463 = math.tanh %462 : vector<2x32xf32>
    %464 = arith.mulf %459, %463 : vector<2x32xf32>
    %465 = vector.extract_strided_slice %445 {offsets = [0, 256], sizes = [2, 32], strides = [1, 1]} : vector<2x384xf32> to vector<2x32xf32>
    %466 = vector.extract_strided_slice %445 {offsets = [0, 288], sizes = [2, 32], strides = [1, 1]} : vector<2x384xf32> to vector<2x32xf32>
    %467 = vector.extract_strided_slice %446 {offsets = [0, 320], sizes = [2, 32], strides = [1, 1]} : vector<2x384xf32> to vector<2x32xf32>
    %468 = vector.extract_strided_slice %445 {offsets = [0, 352], sizes = [2, 32], strides = [1, 1]} : vector<2x384xf32> to vector<2x32xf32>
    %469 = arith.mulf %466, %422 : vector<2x32xf32>
    %470 = arith.mulf %465, %467 : vector<2x32xf32>
    %471 = arith.addf %469, %470 : vector<2x32xf32>
    %472 = math.tanh %471 : vector<2x32xf32>
    %473 = arith.mulf %468, %472 : vector<2x32xf32>
    %c0_204 = arith.constant 0 : index
    %c0_205 = arith.constant 0 : index
    %474 = vector.load %arg23[%c0_204, %c0_205] : memref<32x72xf32, #tpu.memory_space<vmem>>, vector<32x72xf32>
    %cst_206 = arith.constant dense<0.000000e+00> : vector<2x72xf32>
    %475 = tpu.matmul %473, %474, %cst_206 {dimension_numbers = #tpu.dot_dimension_numbers<[1], [0], [0], [1], [0, 0, 1, 1], [], []>} : vector<2x32xf32>, vector<32x72xf32>, vector<2x72xf32> -> vector<2x72xf32>
    %476 = vector.extract_strided_slice %274 {offsets = [0, 3, 0], sizes = [2, 1, 72], strides = [1, 1, 1]} : vector<2x8x72xf32> to vector<2x1x72xf32>
    %477 = vector.shape_cast %476 : vector<2x1x72xf32> to vector<2x72xf32>
    %478 = arith.addf %475, %477 : vector<2x72xf32>
    %c0_207 = arith.constant 0 : index
    %c3_208 = arith.constant 3 : index
    %c0_209 = arith.constant 0 : index
    %479 = vector.load %arg26[%c0_207, %c3_208, %c0_209] : memref<2x8x72xf32, #tpu.memory_space<vmem>>, vector<2x1x72xf32>
    %480 = vector.shape_cast %479 : vector<2x1x72xf32> to vector<2x72xf32>
    %481 = vector.shape_cast %478 : vector<2x72xf32> to vector<2x1x72xf32>
    tpu.vector_store %arg26[%c0_207, %c3_208, %c0_209], %481 {strides = array<i32>} : memref<2x8x72xf32, #tpu.memory_space<vmem>>, vector<2x1x72xf32>,
    %c0_210 = arith.constant 0 : index
    %c4 = arith.constant 4 : index
    %c0_211 = arith.constant 0 : index
    %482 = vector.load %arg17[%c0_210, %c4, %c0_211] : memref<2x8x72xf32, #tpu.memory_space<vmem>>, vector<2x1x72xf32>
    %483 = vector.shape_cast %482 : vector<2x1x72xf32> to vector<2x72xf32>
    %484 = tpu.concatenate %483, %455, %464, %473 in 1 : vector<2x72xf32>, vector<2x32xf32>, vector<2x32xf32>, vector<2x32xf32> -> vector<2x168xf32>
    %c0_212 = arith.constant 0 : index
    %c0_213 = arith.constant 0 : index
    %485 = vector.load %arg21[%c0_212, %c0_213] : memref<168x384xf32, #tpu.memory_space<vmem>>, vector<168x384xf32>
    %cst_214 = arith.constant dense<0.000000e+00> : vector<2x384xf32>
    %486 = tpu.matmul %484, %485, %cst_214 {dimension_numbers = #tpu.dot_dimension_numbers<[1], [0], [0], [1], [0, 0, 1, 1], [], []>} : vector<2x168xf32>, vector<168x384xf32>, vector<2x384xf32> -> vector<2x384xf32>
    %c0_215 = arith.constant 0 : index
    %c0_216 = arith.constant 0 : index
    %487 = vector.load %arg22[%c0_215, %c0_216] : memref<1x384xf32, #tpu.memory_space<vmem>>, vector<1x384xf32>
    %488 = vector.broadcast %487 : vector<1x384xf32> to vector<2x384xf32>
    %489 = arith.addf %486, %488 : vector<2x384xf32>
    %490 = arith.negf %489 : vector<2x384xf32>
    %491 = math.exp %490 : vector<2x384xf32>
    %cst_217 = arith.constant 1.000000e+00 : f32
    %492 = vector.broadcast %cst_217 : f32 to vector<2x384xf32>
    %493 = arith.addf %492, %491 : vector<2x384xf32>
    %494 = arith.divf %492, %493 : vector<2x384xf32>
    %495 = math.tanh %489 : vector<2x384xf32>
    %496 = vector.extract_strided_slice %494 {offsets = [0, 0], sizes = [2, 32], strides = [1, 1]} : vector<2x384xf32> to vector<2x32xf32>
    %497 = vector.extract_strided_slice %494 {offsets = [0, 32], sizes = [2, 32], strides = [1, 1]} : vector<2x384xf32> to vector<2x32xf32>
    %498 = vector.extract_strided_slice %495 {offsets = [0, 64], sizes = [2, 32], strides = [1, 1]} : vector<2x384xf32> to vector<2x32xf32>
    %499 = vector.extract_strided_slice %494 {offsets = [0, 96], sizes = [2, 32], strides = [1, 1]} : vector<2x384xf32> to vector<2x32xf32>
    %500 = arith.mulf %497, %453 : vector<2x32xf32>
    %501 = arith.mulf %496, %498 : vector<2x32xf32>
    %502 = arith.addf %500, %501 : vector<2x32xf32>
    %503 = math.tanh %502 : vector<2x32xf32>
    %504 = arith.mulf %499, %503 : vector<2x32xf32>
    %505 = vector.extract_strided_slice %494 {offsets = [0, 128], sizes = [2, 32], strides = [1, 1]} : vector<2x384xf32> to vector<2x32xf32>
    %506 = vector.extract_strided_slice %494 {offsets = [0, 160], sizes = [2, 32], strides = [1, 1]} : vector<2x384xf32> to vector<2x32xf32>
    %507 = vector.extract_strided_slice %495 {offsets = [0, 192], sizes = [2, 32], strides = [1, 1]} : vector<2x384xf32> to vector<2x32xf32>
    %508 = vector.extract_strided_slice %494 {offsets = [0, 224], sizes = [2, 32], strides = [1, 1]} : vector<2x384xf32> to vector<2x32xf32>
    %509 = arith.mulf %506, %462 : vector<2x32xf32>
    %510 = arith.mulf %505, %507 : vector<2x32xf32>
    %511 = arith.addf %509, %510 : vector<2x32xf32>
    %512 = math.tanh %511 : vector<2x32xf32>
    %513 = arith.mulf %508, %512 : vector<2x32xf32>
    %514 = vector.extract_strided_slice %494 {offsets = [0, 256], sizes = [2, 32], strides = [1, 1]} : vector<2x384xf32> to vector<2x32xf32>
    %515 = vector.extract_strided_slice %494 {offsets = [0, 288], sizes = [2, 32], strides = [1, 1]} : vector<2x384xf32> to vector<2x32xf32>
    %516 = vector.extract_strided_slice %495 {offsets = [0, 320], sizes = [2, 32], strides = [1, 1]} : vector<2x384xf32> to vector<2x32xf32>
    %517 = vector.extract_strided_slice %494 {offsets = [0, 352], sizes = [2, 32], strides = [1, 1]} : vector<2x384xf32> to vector<2x32xf32>
    %518 = arith.mulf %515, %471 : vector<2x32xf32>
    %519 = arith.mulf %514, %516 : vector<2x32xf32>
    %520 = arith.addf %518, %519 : vector<2x32xf32>
    %521 = math.tanh %520 : vector<2x32xf32>
    %522 = arith.mulf %517, %521 : vector<2x32xf32>
    %c0_218 = arith.constant 0 : index
    %c0_219 = arith.constant 0 : index
    %523 = vector.load %arg23[%c0_218, %c0_219] : memref<32x72xf32, #tpu.memory_space<vmem>>, vector<32x72xf32>
    %cst_220 = arith.constant dense<0.000000e+00> : vector<2x72xf32>
    %524 = tpu.matmul %522, %523, %cst_220 {dimension_numbers = #tpu.dot_dimension_numbers<[1], [0], [0], [1], [0, 0, 1, 1], [], []>} : vector<2x32xf32>, vector<32x72xf32>, vector<2x72xf32> -> vector<2x72xf32>
    %525 = vector.extract_strided_slice %274 {offsets = [0, 4, 0], sizes = [2, 1, 72], strides = [1, 1, 1]} : vector<2x8x72xf32> to vector<2x1x72xf32>
    %526 = vector.shape_cast %525 : vector<2x1x72xf32> to vector<2x72xf32>
    %527 = arith.addf %524, %526 : vector<2x72xf32>
    %c0_221 = arith.constant 0 : index
    %c4_222 = arith.constant 4 : index
    %c0_223 = arith.constant 0 : index
    %528 = vector.load %arg26[%c0_221, %c4_222, %c0_223] : memref<2x8x72xf32, #tpu.memory_space<vmem>>, vector<2x1x72xf32>
    %529 = vector.shape_cast %528 : vector<2x1x72xf32> to vector<2x72xf32>
    %530 = vector.shape_cast %527 : vector<2x72xf32> to vector<2x1x72xf32>
    tpu.vector_store %arg26[%c0_221, %c4_222, %c0_223], %530 {strides = array<i32>} : memref<2x8x72xf32, #tpu.memory_space<vmem>>, vector<2x1x72xf32>,
    %c0_224 = arith.constant 0 : index
    %c5 = arith.constant 5 : index
    %c0_225 = arith.constant 0 : index
    %531 = vector.load %arg17[%c0_224, %c5, %c0_225] : memref<2x8x72xf32, #tpu.memory_space<vmem>>, vector<2x1x72xf32>
    %532 = vector.shape_cast %531 : vector<2x1x72xf32> to vector<2x72xf32>
    %533 = tpu.concatenate %532, %504, %513, %522 in 1 : vector<2x72xf32>, vector<2x32xf32>, vector<2x32xf32>, vector<2x32xf32> -> vector<2x168xf32>
    %c0_226 = arith.constant 0 : index
    %c0_227 = arith.constant 0 : index
    %534 = vector.load %arg21[%c0_226, %c0_227] : memref<168x384xf32, #tpu.memory_space<vmem>>, vector<168x384xf32>
    %cst_228 = arith.constant dense<0.000000e+00> : vector<2x384xf32>
    %535 = tpu.matmul %533, %534, %cst_228 {dimension_numbers = #tpu.dot_dimension_numbers<[1], [0], [0], [1], [0, 0, 1, 1], [], []>} : vector<2x168xf32>, vector<168x384xf32>, vector<2x384xf32> -> vector<2x384xf32>
    %c0_229 = arith.constant 0 : index
    %c0_230 = arith.constant 0 : index
    %536 = vector.load %arg22[%c0_229, %c0_230] : memref<1x384xf32, #tpu.memory_space<vmem>>, vector<1x384xf32>
    %537 = vector.broadcast %536 : vector<1x384xf32> to vector<2x384xf32>
    %538 = arith.addf %535, %537 : vector<2x384xf32>
    %539 = arith.negf %538 : vector<2x384xf32>
    %540 = math.exp %539 : vector<2x384xf32>
    %cst_231 = arith.constant 1.000000e+00 : f32
    %541 = vector.broadcast %cst_231 : f32 to vector<2x384xf32>
    %542 = arith.addf %541, %540 : vector<2x384xf32>
    %543 = arith.divf %541, %542 : vector<2x384xf32>
    %544 = math.tanh %538 : vector<2x384xf32>
    %545 = vector.extract_strided_slice %543 {offsets = [0, 0], sizes = [2, 32], strides = [1, 1]} : vector<2x384xf32> to vector<2x32xf32>
    %546 = vector.extract_strided_slice %543 {offsets = [0, 32], sizes = [2, 32], strides = [1, 1]} : vector<2x384xf32> to vector<2x32xf32>
    %547 = vector.extract_strided_slice %544 {offsets = [0, 64], sizes = [2, 32], strides = [1, 1]} : vector<2x384xf32> to vector<2x32xf32>
    %548 = vector.extract_strided_slice %543 {offsets = [0, 96], sizes = [2, 32], strides = [1, 1]} : vector<2x384xf32> to vector<2x32xf32>
    %549 = arith.mulf %546, %502 : vector<2x32xf32>
    %550 = arith.mulf %545, %547 : vector<2x32xf32>
    %551 = arith.addf %549, %550 : vector<2x32xf32>
    %552 = math.tanh %551 : vector<2x32xf32>
    %553 = arith.mulf %548, %552 : vector<2x32xf32>
    %554 = vector.extract_strided_slice %543 {offsets = [0, 128], sizes = [2, 32], strides = [1, 1]} : vector<2x384xf32> to vector<2x32xf32>
    %555 = vector.extract_strided_slice %543 {offsets = [0, 160], sizes = [2, 32], strides = [1, 1]} : vector<2x384xf32> to vector<2x32xf32>
    %556 = vector.extract_strided_slice %544 {offsets = [0, 192], sizes = [2, 32], strides = [1, 1]} : vector<2x384xf32> to vector<2x32xf32>
    %557 = vector.extract_strided_slice %543 {offsets = [0, 224], sizes = [2, 32], strides = [1, 1]} : vector<2x384xf32> to vector<2x32xf32>
    %558 = arith.mulf %555, %511 : vector<2x32xf32>
    %559 = arith.mulf %554, %556 : vector<2x32xf32>
    %560 = arith.addf %558, %559 : vector<2x32xf32>
    %561 = math.tanh %560 : vector<2x32xf32>
    %562 = arith.mulf %557, %561 : vector<2x32xf32>
    %563 = vector.extract_strided_slice %543 {offsets = [0, 256], sizes = [2, 32], strides = [1, 1]} : vector<2x384xf32> to vector<2x32xf32>
    %564 = vector.extract_strided_slice %543 {offsets = [0, 288], sizes = [2, 32], strides = [1, 1]} : vector<2x384xf32> to vector<2x32xf32>
    %565 = vector.extract_strided_slice %544 {offsets = [0, 320], sizes = [2, 32], strides = [1, 1]} : vector<2x384xf32> to vector<2x32xf32>
    %566 = vector.extract_strided_slice %543 {offsets = [0, 352], sizes = [2, 32], strides = [1, 1]} : vector<2x384xf32> to vector<2x32xf32>
    %567 = arith.mulf %564, %520 : vector<2x32xf32>
    %568 = arith.mulf %563, %565 : vector<2x32xf32>
    %569 = arith.addf %567, %568 : vector<2x32xf32>
    %570 = math.tanh %569 : vector<2x32xf32>
    %571 = arith.mulf %566, %570 : vector<2x32xf32>
    %c0_232 = arith.constant 0 : index
    %c0_233 = arith.constant 0 : index
    %572 = vector.load %arg23[%c0_232, %c0_233] : memref<32x72xf32, #tpu.memory_space<vmem>>, vector<32x72xf32>
    %cst_234 = arith.constant dense<0.000000e+00> : vector<2x72xf32>
    %573 = tpu.matmul %571, %572, %cst_234 {dimension_numbers = #tpu.dot_dimension_numbers<[1], [0], [0], [1], [0, 0, 1, 1], [], []>} : vector<2x32xf32>, vector<32x72xf32>, vector<2x72xf32> -> vector<2x72xf32>
    %574 = vector.extract_strided_slice %274 {offsets = [0, 5, 0], sizes = [2, 1, 72], strides = [1, 1, 1]} : vector<2x8x72xf32> to vector<2x1x72xf32>
    %575 = vector.shape_cast %574 : vector<2x1x72xf32> to vector<2x72xf32>
    %576 = arith.addf %573, %575 : vector<2x72xf32>
    %c0_235 = arith.constant 0 : index
    %c5_236 = arith.constant 5 : index
    %c0_237 = arith.constant 0 : index
    %577 = vector.load %arg26[%c0_235, %c5_236, %c0_237] : memref<2x8x72xf32, #tpu.memory_space<vmem>>, vector<2x1x72xf32>
    %578 = vector.shape_cast %577 : vector<2x1x72xf32> to vector<2x72xf32>
    %579 = vector.shape_cast %576 : vector<2x72xf32> to vector<2x1x72xf32>
    tpu.vector_store %arg26[%c0_235, %c5_236, %c0_237], %579 {strides = array<i32>} : memref<2x8x72xf32, #tpu.memory_space<vmem>>, vector<2x1x72xf32>,
    %c0_238 = arith.constant 0 : index
    %c6 = arith.constant 6 : index
    %c0_239 = arith.constant 0 : index
    %580 = vector.load %arg17[%c0_238, %c6, %c0_239] : memref<2x8x72xf32, #tpu.memory_space<vmem>>, vector<2x1x72xf32>
    %581 = vector.shape_cast %580 : vector<2x1x72xf32> to vector<2x72xf32>
    %582 = tpu.concatenate %581, %553, %562, %571 in 1 : vector<2x72xf32>, vector<2x32xf32>, vector<2x32xf32>, vector<2x32xf32> -> vector<2x168xf32>
    %c0_240 = arith.constant 0 : index
    %c0_241 = arith.constant 0 : index
    %583 = vector.load %arg21[%c0_240, %c0_241] : memref<168x384xf32, #tpu.memory_space<vmem>>, vector<168x384xf32>
    %cst_242 = arith.constant dense<0.000000e+00> : vector<2x384xf32>
    %584 = tpu.matmul %582, %583, %cst_242 {dimension_numbers = #tpu.dot_dimension_numbers<[1], [0], [0], [1], [0, 0, 1, 1], [], []>} : vector<2x168xf32>, vector<168x384xf32>, vector<2x384xf32> -> vector<2x384xf32>
    %c0_243 = arith.constant 0 : index
    %c0_244 = arith.constant 0 : index
    %585 = vector.load %arg22[%c0_243, %c0_244] : memref<1x384xf32, #tpu.memory_space<vmem>>, vector<1x384xf32>
    %586 = vector.broadcast %585 : vector<1x384xf32> to vector<2x384xf32>
    %587 = arith.addf %584, %586 : vector<2x384xf32>
    %588 = arith.negf %587 : vector<2x384xf32>
    %589 = math.exp %588 : vector<2x384xf32>
    %cst_245 = arith.constant 1.000000e+00 : f32
    %590 = vector.broadcast %cst_245 : f32 to vector<2x384xf32>
    %591 = arith.addf %590, %589 : vector<2x384xf32>
    %592 = arith.divf %590, %591 : vector<2x384xf32>
    %593 = math.tanh %587 : vector<2x384xf32>
    %594 = vector.extract_strided_slice %592 {offsets = [0, 0], sizes = [2, 32], strides = [1, 1]} : vector<2x384xf32> to vector<2x32xf32>
    %595 = vector.extract_strided_slice %592 {offsets = [0, 32], sizes = [2, 32], strides = [1, 1]} : vector<2x384xf32> to vector<2x32xf32>
    %596 = vector.extract_strided_slice %593 {offsets = [0, 64], sizes = [2, 32], strides = [1, 1]} : vector<2x384xf32> to vector<2x32xf32>
    %597 = vector.extract_strided_slice %592 {offsets = [0, 96], sizes = [2, 32], strides = [1, 1]} : vector<2x384xf32> to vector<2x32xf32>
    %598 = arith.mulf %595, %551 : vector<2x32xf32>
    %599 = arith.mulf %594, %596 : vector<2x32xf32>
    %600 = arith.addf %598, %599 : vector<2x32xf32>
    %601 = math.tanh %600 : vector<2x32xf32>
    %602 = arith.mulf %597, %601 : vector<2x32xf32>
    %603 = vector.extract_strided_slice %592 {offsets = [0, 128], sizes = [2, 32], strides = [1, 1]} : vector<2x384xf32> to vector<2x32xf32>
    %604 = vector.extract_strided_slice %592 {offsets = [0, 160], sizes = [2, 32], strides = [1, 1]} : vector<2x384xf32> to vector<2x32xf32>
    %605 = vector.extract_strided_slice %593 {offsets = [0, 192], sizes = [2, 32], strides = [1, 1]} : vector<2x384xf32> to vector<2x32xf32>
    %606 = vector.extract_strided_slice %592 {offsets = [0, 224], sizes = [2, 32], strides = [1, 1]} : vector<2x384xf32> to vector<2x32xf32>
    %607 = arith.mulf %604, %560 : vector<2x32xf32>
    %608 = arith.mulf %603, %605 : vector<2x32xf32>
    %609 = arith.addf %607, %608 : vector<2x32xf32>
    %610 = math.tanh %609 : vector<2x32xf32>
    %611 = arith.mulf %606, %610 : vector<2x32xf32>
    %612 = vector.extract_strided_slice %592 {offsets = [0, 256], sizes = [2, 32], strides = [1, 1]} : vector<2x384xf32> to vector<2x32xf32>
    %613 = vector.extract_strided_slice %592 {offsets = [0, 288], sizes = [2, 32], strides = [1, 1]} : vector<2x384xf32> to vector<2x32xf32>
    %614 = vector.extract_strided_slice %593 {offsets = [0, 320], sizes = [2, 32], strides = [1, 1]} : vector<2x384xf32> to vector<2x32xf32>
    %615 = vector.extract_strided_slice %592 {offsets = [0, 352], sizes = [2, 32], strides = [1, 1]} : vector<2x384xf32> to vector<2x32xf32>
    %616 = arith.mulf %613, %569 : vector<2x32xf32>
    %617 = arith.mulf %612, %614 : vector<2x32xf32>
    %618 = arith.addf %616, %617 : vector<2x32xf32>
    %619 = math.tanh %618 : vector<2x32xf32>
    %620 = arith.mulf %615, %619 : vector<2x32xf32>
    %c0_246 = arith.constant 0 : index
    %c0_247 = arith.constant 0 : index
    %621 = vector.load %arg23[%c0_246, %c0_247] : memref<32x72xf32, #tpu.memory_space<vmem>>, vector<32x72xf32>
    %cst_248 = arith.constant dense<0.000000e+00> : vector<2x72xf32>
    %622 = tpu.matmul %620, %621, %cst_248 {dimension_numbers = #tpu.dot_dimension_numbers<[1], [0], [0], [1], [0, 0, 1, 1], [], []>} : vector<2x32xf32>, vector<32x72xf32>, vector<2x72xf32> -> vector<2x72xf32>
    %623 = vector.extract_strided_slice %274 {offsets = [0, 6, 0], sizes = [2, 1, 72], strides = [1, 1, 1]} : vector<2x8x72xf32> to vector<2x1x72xf32>
    %624 = vector.shape_cast %623 : vector<2x1x72xf32> to vector<2x72xf32>
    %625 = arith.addf %622, %624 : vector<2x72xf32>
    %c0_249 = arith.constant 0 : index
    %c6_250 = arith.constant 6 : index
    %c0_251 = arith.constant 0 : index
    %626 = vector.load %arg26[%c0_249, %c6_250, %c0_251] : memref<2x8x72xf32, #tpu.memory_space<vmem>>, vector<2x1x72xf32>
    %627 = vector.shape_cast %626 : vector<2x1x72xf32> to vector<2x72xf32>
    %628 = vector.shape_cast %625 : vector<2x72xf32> to vector<2x1x72xf32>
    tpu.vector_store %arg26[%c0_249, %c6_250, %c0_251], %628 {strides = array<i32>} : memref<2x8x72xf32, #tpu.memory_space<vmem>>, vector<2x1x72xf32>,
    %c0_252 = arith.constant 0 : index
    %c7 = arith.constant 7 : index
    %c0_253 = arith.constant 0 : index
    %629 = vector.load %arg17[%c0_252, %c7, %c0_253] : memref<2x8x72xf32, #tpu.memory_space<vmem>>, vector<2x1x72xf32>
    %630 = vector.shape_cast %629 : vector<2x1x72xf32> to vector<2x72xf32>
    %631 = tpu.concatenate %630, %602, %611, %620 in 1 : vector<2x72xf32>, vector<2x32xf32>, vector<2x32xf32>, vector<2x32xf32> -> vector<2x168xf32>
    %c0_254 = arith.constant 0 : index
    %c0_255 = arith.constant 0 : index
    %632 = vector.load %arg21[%c0_254, %c0_255] : memref<168x384xf32, #tpu.memory_space<vmem>>, vector<168x384xf32>
    %cst_256 = arith.constant dense<0.000000e+00> : vector<2x384xf32>
    %633 = tpu.matmul %631, %632, %cst_256 {dimension_numbers = #tpu.dot_dimension_numbers<[1], [0], [0], [1], [0, 0, 1, 1], [], []>} : vector<2x168xf32>, vector<168x384xf32>, vector<2x384xf32> -> vector<2x384xf32>
    %c0_257 = arith.constant 0 : index
    %c0_258 = arith.constant 0 : index
    %634 = vector.load %arg22[%c0_257, %c0_258] : memref<1x384xf32, #tpu.memory_space<vmem>>, vector<1x384xf32>
    %635 = vector.broadcast %634 : vector<1x384xf32> to vector<2x384xf32>
    %636 = arith.addf %633, %635 : vector<2x384xf32>
    %637 = arith.negf %636 : vector<2x384xf32>
    %638 = math.exp %637 : vector<2x384xf32>
    %cst_259 = arith.constant 1.000000e+00 : f32
    %639 = vector.broadcast %cst_259 : f32 to vector<2x384xf32>
    %640 = arith.addf %639, %638 : vector<2x384xf32>
    %641 = arith.divf %639, %640 : vector<2x384xf32>
    %642 = math.tanh %636 : vector<2x384xf32>
    %643 = vector.extract_strided_slice %641 {offsets = [0, 256], sizes = [2, 32], strides = [1, 1]} : vector<2x384xf32> to vector<2x32xf32>
    %644 = vector.extract_strided_slice %641 {offsets = [0, 288], sizes = [2, 32], strides = [1, 1]} : vector<2x384xf32> to vector<2x32xf32>
    %645 = vector.extract_strided_slice %642 {offsets = [0, 320], sizes = [2, 32], strides = [1, 1]} : vector<2x384xf32> to vector<2x32xf32>
    %646 = vector.extract_strided_slice %641 {offsets = [0, 352], sizes = [2, 32], strides = [1, 1]} : vector<2x384xf32> to vector<2x32xf32>
    %647 = arith.mulf %644, %618 : vector<2x32xf32>
    %648 = arith.mulf %643, %645 : vector<2x32xf32>
    %649 = arith.addf %647, %648 : vector<2x32xf32>
    %650 = math.tanh %649 : vector<2x32xf32>
    %651 = arith.mulf %646, %650 : vector<2x32xf32>
    %c0_260 = arith.constant 0 : index
    %c0_261 = arith.constant 0 : index
    %652 = vector.load %arg23[%c0_260, %c0_261] : memref<32x72xf32, #tpu.memory_space<vmem>>, vector<32x72xf32>
    %cst_262 = arith.constant dense<0.000000e+00> : vector<2x72xf32>
    %653 = tpu.matmul %651, %652, %cst_262 {dimension_numbers = #tpu.dot_dimension_numbers<[1], [0], [0], [1], [0, 0, 1, 1], [], []>} : vector<2x32xf32>, vector<32x72xf32>, vector<2x72xf32> -> vector<2x72xf32>
    %654 = vector.extract_strided_slice %274 {offsets = [0, 7, 0], sizes = [2, 1, 72], strides = [1, 1, 1]} : vector<2x8x72xf32> to vector<2x1x72xf32>
    %655 = vector.shape_cast %654 : vector<2x1x72xf32> to vector<2x72xf32>
    %656 = arith.addf %653, %655 : vector<2x72xf32>
    %c0_263 = arith.constant 0 : index
    %c7_264 = arith.constant 7 : index
    %c0_265 = arith.constant 0 : index
    %657 = vector.load %arg26[%c0_263, %c7_264, %c0_265] : memref<2x8x72xf32, #tpu.memory_space<vmem>>, vector<2x1x72xf32>
    %658 = vector.shape_cast %657 : vector<2x1x72xf32> to vector<2x72xf32>
    %659 = vector.shape_cast %656 : vector<2x72xf32> to vector<2x1x72xf32>
    tpu.vector_store %arg26[%c0_263, %c7_264, %c0_265], %659 {strides = array<i32>} : memref<2x8x72xf32, #tpu.memory_space<vmem>>, vector<2x1x72xf32>,
    return
  }
}

</mosaic_0001>

<bundles_post_ra>
// kernel: forward.1
= control target key start
LH: loop header
LB: loop body
LE: loop exit
PB: predicated region body
PF: predicated region fallthrough
CT: control target
= control target key end

     0   :  { %s9724_s0 = inlined_call_operand.vmem [shape: f32[16,16], index: 0, kind: input, shape index: {}]   ;;  %s9725_s1 = inlined_call_operand.hbm [shape: f32[16,32], index: 1, kind: input, shape index: {}]   ;;  %s9726_s2 = inlined_call_operand.hbm [shape: f32[8,8], index: 2, kind: input, shape index: {}]   ;;  %s9727_s3 = inlined_call_operand.hbm [shape: f32[16,32], index: 3, kind: input, shape index: {}]   ;;  %s9728_s4 = inlined_call_operand.hbm [shape: f32[1,32], index: 4, kind: input, shape index: {}]   ;;  %s9729_s5 = inlined_call_operand.vmem [shape: f32[2,32,96], index: 5, kind: input, shape index: {}]   ;;  %s9730_s6 = inlined_call_operand.hbm [shape: f32[2,1,96], index: 6, kind: input, shape index: {}]   ;;  %s9731_s7 = inlined_call_operand.hbm [shape: f32[2,32,32], index: 7, kind: input, shape index: {}]   ;;  %s9732_s8 = inlined_call_operand.hbm [shape: f32[2,1,32], index: 8, kind: input, shape index: {}]   ;;  %s9733_s9 = inlined_call_operand.hbm [shape: f32[2,1,32], index: 9, kind: input, shape index: {}]   ;;  %s9734_s10 = inlined_call_operand.hbm [shape: f32[2,1,32], index: 10, kind: input, shape index: {}]   ;;  %s9735_s11 = inlined_call_operand.hbm [shape: f32[2,32,32], index: 11, kind: input, shape index: {}]   ;;  %s9736_s12 = inlined_call_operand.hbm [shape: f32[2,1,32], index: 12, kind: input, shape index: {}]   ;;  %s9737_s13 = inlined_call_operand.hbm [shape: f32[2,32,32], index: 13, kind: input, shape index: {}]   ;;  %s9738_s14 = inlined_call_operand.hbm [shape: f32[2,1,32], index: 14, kind: input, shape index: {}]   ;;  %s9739_s15 = inlined_call_operand.hbm [shape: f32[2,1,32], index: 15, kind: input, shape index: {}]   ;;  %s9740_s16 = inlined_call_operand.hbm [shape: f32[2,1,32], index: 16, kind: input, shape index: {}]   ;;  %s9741_s17 = inlined_call_operand.hbm [shape: f32[2,8,72], index: 17, kind: input, shape index: {}]   ;;  %s9742_s18 = inlined_call_operand.vmem [shape: f32[2,72], index: 18, kind: input, shape index: {}]   ;;  %s9743_s19 = inlined_call_operand.vmem [shape: f32[3,2,32], index: 19, kind: input, shape index: {}]   ;;  %s9744_s20 = inlined_call_operand.vmem [shape: f32[3,2,32], index: 20, kind: input, shape index: {}]   ;;  %s9745_s21 = inlined_call_operand.hbm [shape: f32[168,384], index: 21, kind: input, shape index: {}]   ;;  %s9746_s22 = inlined_call_operand.hbm [shape: f32[1,384], index: 22, kind: input, shape index: {}]   ;;  %s9747_s23 = inlined_call_operand.hbm [shape: f32[32,72], index: 23, kind: input, shape index: {}]   ;;  %s9748_s24 = inlined_call_operand.hbm [shape: f32[32,72], index: 24, kind: input, shape index: {}]   ;;  %s9749_s25 = inlined_call_operand.hbm [shape: f32[1,72], index: 25, kind: input, shape index: {}]   ;;  %s9750_s26 = inlined_call_operand.hbm [shape: f32[2,8,72], index: 26, kind: output, shape index: {}]  }
   0x1   :  { %9764 = sst [smem:[#allocation48_spill]] %s9724_s0 }
   0x2   :  { %9765 = sst [smem:[#allocation49_spill]] %s9725_s1 }
   0x3   :  { %9766 = sst [smem:[#allocation50_spill]] %s9726_s2 }
   0x4   :  { %9767 = sst [smem:[#allocation51_spill]] %s9727_s3 }
   0x5   :  { %9768 = sst [smem:[#allocation52_spill]] %s9728_s4 }
   0x6   :  { %9769 = sst [smem:[#allocation53_spill]] %s9729_s5 }
   0x7   :  { %9770 = sst [smem:[#allocation54_spill]] %s9730_s6 }
   0x8   :  { %9771 = sst [smem:[#allocation55_spill]] %s9731_s7 }
   0x9   :  { %9772 = sst [smem:[#allocation56_spill]] %s9732_s8 }
   0xa   :  { %9773 = sst [smem:[#allocation57_spill]] %s9733_s9 }
   0xb   :  { %9774 = sst [smem:[#allocation58_spill]] %s9734_s10 }
   0xc   :  { %9775 = sst [smem:[#allocation59_spill]] %s9742_s18 }
   0xd   :  { %9776 = sst [smem:[#allocation60_spill]] %s9744_s20 }
   0xe   :  { %9777 = sst [smem:[#allocation61_spill]] %s9750_s26 }
   0xf   :  { %31 = vsyncpa [#allocation3], 0 }
  0x10   :  { %32 = vsyncpa [#allocation6], 0 }
  0x11   :  { %33 = vsyncpa [#allocation9], 0 }
  0x12   :  { %34 = vsyncpa [#allocation12], 0 }
  0x13   :  { %35 = vsyncpa [#allocation15], 0 }
  0x14   :  { %36 = vsyncpa [#allocation18], 0 }
  0x15   :  { %37 = vsyncpa [#allocation21], 0 }
  0x16   :  { %38 = vsyncpa [#allocation24], 0 }
  0x17   :  { %39 = vsyncpa [#allocation27], 0 }
  0x18   :  { %40 = vsyncpa [#allocation30], 0 }
  0x19   :  { %41 = vsyncpa [#allocation33], 0 }
  0x1a   :  { %42 = vsyncpa [#allocation4], 0  ;;  %s8055_s27 = smov [#allocation5]   ;;  %s8056_s7 = smov [#allocation8]  }
  0x1b   :  { %s63_s3 = sshll.u32 %s8055_s27, 4  ;;  %s85_s28 = sshll.u32 %s8056_s7, 4  ;;  %s64_s3 = int_to_ptr.vmem [resolvable:$true] %s63_s3  ;;  %s86_s28 = int_to_ptr.vmem [resolvable:$true] %s85_s28 }
  0x1c   :  { %s9778_s29 = sld [smem:[#allocation50_spill]] }
  0x22   :  { %s7547_s0 = scalar_lea.hbm %s9778_s29, 128 }
  0x23   :  { %p7548_p0 = scmp.ne.s32.totalorder %s9778_s29, %s7547_s0  ;;  %p7551_p1 = scmp.lt.u32.totalorder %s7547_s0, %s9778_s29 }
  0x25   :  { %p7553_p2 = pnand %p7551_p1, %p7548_p0 }
  0x27   :  { %7556 = shalt.err (!%p7553_p2)
}
  0x28   :  { %s7557_s10 = scalar_lea.vmem %s64_s3, 128  ;;  %p7562_p4 = scmp.lt.s32.totalorder %s64_s3, %s64_s3 }
  0x29   :  { %p7558_p3 = scmp.ne.s32.totalorder %s64_s3, %s7557_s10  ;;  %p7563_p5 = scmp.lt.s32.totalorder %s7557_s10, %s7557_s10 }
  0x2b   :  { %p7564_p6 = por %p7563_p5, %p7562_p4 }
  0x2d   :  { %p7565_p7 = pnand %p7564_p6, %p7558_p3 }
  0x2f   :  { %7568 = shalt.err (!%p7565_p7)
}
  0x30   :  { %66 = dma.hbm_to_vmem [thread:$0]  %s9778_s29, 128, %s64_s3, [#allocation6]  }
  0x31   :  { %s9779_s8 = sld [smem:[#allocation52_spill]] }
  0x37   :  { %s7569_s4 = scalar_lea.hbm %s9779_s8, 16 }
  0x38   :  { %p7570_p8 = scmp.ne.s32.totalorder %s9779_s8, %s7569_s4  ;;  %p7573_p9 = scmp.lt.u32.totalorder %s7569_s4, %s9779_s8 }
  0x3a   :  { %p7575_p10 = pnand %p7573_p9, %p7570_p8 }
  0x3c   :  { %7578 = shalt.err (!%p7575_p10)
}
  0x3d   :  { %s7579_s5 = scalar_lea.vmem %s86_s28, 16  ;;  %s7583_s10 = scalar_lea.vmem %s86_s28, 32 }
  0x3e   :  { %p7580_p11 = scmp.ne.s32.totalorder %s86_s28, %s7579_s5  ;;  %p7584_p12 = scmp.lt.s32.totalorder %s86_s28, %s86_s28 }
  0x3f   :  { %p7585_p13 = scmp.lt.s32.totalorder %s7583_s10, %s7579_s5 }
  0x41   :  { %p7586_p0 = por %p7585_p13, %p7584_p12 }
  0x43   :  { %p7587_p1 = pnand %p7586_p0, %p7580_p11 }
  0x45   :  { %7590 = shalt.err (!%p7587_p1)
}
  0x46   :  { %88 = dma.hbm_to_vmem [thread:$0]  %s9779_s8, 16, %s86_s28, [#allocation9]  }
  0x47   :  { %s8057_s6 = smov [#allocation11]   ;;  %s9780_s4 = sld [smem:[#allocation55_spill]] }
  0x48   :  { %s108_s1 = sshll.u32 %s8057_s6, 4  ;;  %s109_s1 = int_to_ptr.vmem [resolvable:$true] %s108_s1 }
  0x4d   :  { %s7591_s9 = scalar_lea.hbm %s9780_s4, 1024 }
  0x4e   :  { %p7592_p2 = scmp.ne.s32.totalorder %s9780_s4, %s7591_s9  ;;  %p7595_p3 = scmp.lt.u32.totalorder %s7591_s9, %s9780_s4 }
  0x50   :  { %p7597_p4 = pnand %p7595_p3, %p7592_p2 }
  0x52   :  { %7600 = shalt.err (!%p7597_p4)
}
  0x53   :  { %s7601_s10 = scalar_lea.vmem %s109_s1, 1024  ;;  %p7606_p6 = scmp.lt.s32.totalorder %s109_s1, %s109_s1 }
  0x54   :  { %p7602_p5 = scmp.ne.s32.totalorder %s109_s1, %s7601_s10  ;;  %p7607_p7 = scmp.lt.s32.totalorder %s7601_s10, %s7601_s10 }
  0x56   :  { %p7608_p8 = por %p7607_p7, %p7606_p6 }
  0x58   :  { %p7609_p9 = pnand %p7608_p8, %p7602_p5 }
  0x5a   :  { %7612 = shalt.err (!%p7609_p9)
}
  0x5b   :  { %s8058_s28 = smov 128   ;;  %s8059_s8 = smov 8  }
  0x5c   :  { %114 = dma.hbm_to_vmem [thread:$0]  %s9780_s4, 1024, %s109_s1, [#allocation12], %s8058_s28, %s8058_s28, %s8059_s8  }
  0x5d   :  { %s8060_s6 = smov [#allocation14]   ;;  %s8061_s7 = smov [#allocation17]  }
  0x5e   :  { %s132_s27 = sshll.u32 %s8060_s6, 4  ;;  %s156_s9 = sshll.u32 %s8061_s7, 4  ;;  %s133_s27 = int_to_ptr.vmem [resolvable:$true] %s132_s27  ;;  %s157_s9 = int_to_ptr.vmem [resolvable:$true] %s156_s9 }
  0x5f   :  { %s9781_s2 = sld [smem:[#allocation57_spill]] }
  0x65   :  { %s7613_s5 = scalar_lea.hbm %s9781_s2, 32 }
  0x66   :  { %p7614_p10 = scmp.ne.s32.totalorder %s9781_s2, %s7613_s5  ;;  %p7617_p11 = scmp.lt.u32.totalorder %s7613_s5, %s9781_s2 }
  0x68   :  { %p7619_p12 = pnand %p7617_p11, %p7614_p10 }
  0x6a   :  { %7622 = shalt.err (!%p7619_p12)
}
  0x6b   :  { %s7623_s1 = scalar_lea.vmem %s133_s27, 32  ;;  %p7628_p0 = scmp.lt.s32.totalorder %s133_s27, %s133_s27 }
  0x6c   :  { %p7624_p13 = scmp.ne.s32.totalorder %s133_s27, %s7623_s1  ;;  %p7629_p1 = scmp.lt.s32.totalorder %s7623_s1, %s7623_s1 }
  0x6e   :  { %p7630_p2 = por %p7629_p1, %p7628_p0 }
  0x70   :  { %p7631_p3 = pnand %p7630_p2, %p7624_p13 }
  0x72   :  { %7634 = shalt.err (!%p7631_p3)
}
  0x73   :  { %s8062_s4 = smov 16   ;;  %s8063_s3 = smov 1  }
  0x74   :  { %138 = dma.hbm_to_vmem [thread:$0]  %s9781_s2, 32, %s133_s27, [#allocation15], %s8062_s4, %s8062_s4, %s8063_s3  }
  0x75   :  { %s7635_s6 = scalar_lea.hbm %s9735_s11, 1024 }
  0x76   :  { %p7636_p4 = scmp.ne.s32.totalorder %s9735_s11, %s7635_s6  ;;  %p7639_p5 = scmp.lt.u32.totalorder %s7635_s6, %s9735_s11 }
  0x78   :  { %p7641_p6 = pnand %p7639_p5, %p7636_p4 }
  0x7a   :  { %7644 = shalt.err (!%p7641_p6)
}
  0x7b   :  { %s7645_s10 = scalar_lea.vmem %s157_s9, 1024  ;;  %p7650_p8 = scmp.lt.s32.totalorder %s157_s9, %s157_s9 }
  0x7c   :  { %p7646_p7 = scmp.ne.s32.totalorder %s157_s9, %s7645_s10  ;;  %p7651_p9 = scmp.lt.s32.totalorder %s7645_s10, %s7645_s10 }
  0x7e   :  { %p7652_p10 = por %p7651_p9, %p7650_p8 }
  0x80   :  { %p7653_p11 = pnand %p7652_p10, %p7646_p7 }
  0x82   :  { %7656 = shalt.err (!%p7653_p11)
}
  0x83   :  { %162 = dma.hbm_to_vmem [thread:$0]  %s9735_s11, 1024, %s157_s9, [#allocation18], %s8058_s28, %s8058_s28, %s8059_s8  }
  0x84   :  { %s8064_s1 = smov [#allocation20]   ;;  %s8065_s29 = smov [#allocation23]  }
  0x85   :  { %s180_s26 = sshll.u32 %s8064_s1, 4  ;;  %s204_s18 = sshll.u32 %s8065_s29, 4  ;;  %s181_s26 = int_to_ptr.vmem [resolvable:$true] %s180_s26  ;;  %s205_s18 = int_to_ptr.vmem [resolvable:$true] %s204_s18 }
  0x86   :  { %s7657_s7 = scalar_lea.hbm %s9737_s13, 1024 }
  0x87   :  { %p7658_p12 = scmp.ne.s32.totalorder %s9737_s13, %s7657_s7  ;;  %p7661_p13 = scmp.lt.u32.totalorder %s7657_s7, %s9737_s13 }
  0x89   :  { %p7663_p0 = pnand %p7661_p13, %p7658_p12 }
  0x8b   :  { %7666 = shalt.err (!%p7663_p0)
}
  0x8c   :  { %s7667_s11 = scalar_lea.vmem %s181_s26, 1024  ;;  %p7672_p2 = scmp.lt.s32.totalorder %s181_s26, %s181_s26 }
  0x8d   :  { %p7668_p1 = scmp.ne.s32.totalorder %s181_s26, %s7667_s11  ;;  %p7673_p3 = scmp.lt.s32.totalorder %s7667_s11, %s7667_s11 }
  0x8f   :  { %p7674_p4 = por %p7673_p3, %p7672_p2 }
  0x91   :  { %p7675_p5 = pnand %p7674_p4, %p7668_p1 }
  0x93   :  { %7678 = shalt.err (!%p7675_p5)
}
  0x94   :  { %186 = dma.hbm_to_vmem [thread:$0]  %s9737_s13, 1024, %s181_s26, [#allocation21], %s8058_s28, %s8058_s28, %s8059_s8  }
  0x95   :  { %s7679_s29 = scalar_lea.hbm %s9739_s15, 32 }
  0x96   :  { %p7680_p6 = scmp.ne.s32.totalorder %s9739_s15, %s7679_s29  ;;  %p7683_p7 = scmp.lt.u32.totalorder %s7679_s29, %s9739_s15 }
  0x98   :  { %p7685_p8 = pnand %p7683_p7, %p7680_p6 }
  0x9a   :  { %7688 = shalt.err (!%p7685_p8)
}
  0x9b   :  { %s7689_s0 = scalar_lea.vmem %s205_s18, 32  ;;  %p7694_p10 = scmp.lt.s32.totalorder %s205_s18, %s205_s18 }
  0x9c   :  { %p7690_p9 = scmp.ne.s32.totalorder %s205_s18, %s7689_s0  ;;  %p7695_p11 = scmp.lt.s32.totalorder %s7689_s0, %s7689_s0 }
  0x9e   :  { %p7696_p12 = por %p7695_p11, %p7694_p10 }
  0xa0   :  { %p7697_p13 = pnand %p7696_p12, %p7690_p9 }
  0xa2   :  { %7700 = shalt.err (!%p7697_p13)
}
  0xa3   :  { %210 = dma.hbm_to_vmem [thread:$0]  %s9739_s15, 32, %s205_s18, [#allocation24], %s8062_s4, %s8062_s4, %s8063_s3  }
  0xa4   :  { %s8066_s5 = smov [#allocation26]   ;;  %s8067_s11 = smov [#allocation29]  }
  0xa5   :  { %s228_s10 = sshll.u32 %s8066_s5, 4  ;;  %s259_s9 = sshll.u32 %s8067_s11, 4  ;;  %s229_s10 = int_to_ptr.vmem [resolvable:$true] %s228_s10  ;;  %s260_s9 = int_to_ptr.vmem [resolvable:$true] %s259_s9 }
  0xa6   :  { %s7701_s1 = scalar_lea.hbm %s9741_s17, 256 }
  0xa7   :  { %p7702_p0 = scmp.ne.s32.totalorder %s9741_s17, %s7701_s1  ;;  %p7705_p1 = scmp.lt.u32.totalorder %s7701_s1, %s9741_s17 }
  0xa9   :  { %p7707_p2 = pnand %p7705_p1, %p7702_p0 }
  0xab   :  { %7710 = shalt.err (!%p7707_p2)
}
  0xac   :  { %s7711_s15 = scalar_lea.vmem %s229_s10, 256  ;;  %p7716_p4 = scmp.lt.s32.totalorder %s229_s10, %s229_s10 }
  0xad   :  { %p7712_p3 = scmp.ne.s32.totalorder %s229_s10, %s7711_s15  ;;  %p7717_p5 = scmp.lt.s32.totalorder %s7711_s15, %s7711_s15 }
  0xaf   :  { %p7718_p6 = por %p7717_p5, %p7716_p4 }
  0xb1   :  { %p7719_p7 = pnand %p7718_p6, %p7712_p3 }
  0xb3   :  { %7722 = shalt.err (!%p7719_p7)
}
  0xb4   :  { %234 = dma.hbm_to_vmem [thread:$0]  %s9741_s17, 256, %s229_s10, [#allocation27], %s8058_s28, %s8058_s28, %s8059_s8  }
  0xb5   :  { %s7723_s26 = scalar_lea.hbm %s9746_s22, 48 }
  0xb6   :  { %p7724_p8 = scmp.ne.s32.totalorder %s9746_s22, %s7723_s26  ;;  %p7727_p9 = scmp.lt.u32.totalorder %s7723_s26, %s9746_s22 }
  0xb8   :  { %p7729_p10 = pnand %p7727_p9, %p7724_p8 }
  0xba   :  { %7732 = shalt.err (!%p7729_p10)
}
  0xbb   :  { %s7733_s1 = scalar_lea.vmem %s260_s9, 48  ;;  %s7737_s29 = scalar_lea.vmem %s260_s9, 64 }
  0xbc   :  { %p7734_p11 = scmp.ne.s32.totalorder %s260_s9, %s7733_s1  ;;  %p7738_p12 = scmp.lt.s32.totalorder %s260_s9, %s260_s9 }
  0xbd   :  { %p7739_p13 = scmp.lt.s32.totalorder %s7737_s29, %s7733_s1 }
  0xbf   :  { %p7740_p0 = por %p7739_p13, %p7738_p12 }
  0xc1   :  { %p7741_p1 = pnand %p7740_p0, %p7734_p11 }
  0xc3   :  { %7744 = shalt.err (!%p7741_p1)
}
  0xc4   :  { %262 = dma.hbm_to_vmem [thread:$0]  %s9746_s22, 48, %s260_s9, [#allocation30]  }
  0xc5   :  { %s8068_s20 = smov [#allocation32]   ;;  %s8069_s7 = smov [#allocation2]  }
  0xc6   :  { %s280_s6 = sshll.u32 %s8068_s20, 4  ;;  %s50_s15 = sshll.u32 %s8069_s7, 4  ;;  %s281_s6 = int_to_ptr.vmem [resolvable:$true] %s280_s6  ;;  %s51_s15 = int_to_ptr.vmem [resolvable:$true] %s50_s15 }
  0xc7   :  { %s7745_s0 = scalar_lea.hbm %s9748_s24, 512 }
  0xc8   :  { %p7746_p2 = scmp.ne.s32.totalorder %s9748_s24, %s7745_s0  ;;  %p7749_p3 = scmp.lt.u32.totalorder %s7745_s0, %s9748_s24 }
  0xca   :  { %p7751_p4 = pnand %p7749_p3, %p7746_p2 }
  0xcc   :  { %7754 = shalt.err (!%p7751_p4)
}
  0xcd   :  { %s7755_s22 = scalar_lea.vmem %s281_s6, 512  ;;  %p7760_p6 = scmp.lt.s32.totalorder %s281_s6, %s281_s6 }
  0xce   :  { %p7756_p5 = scmp.ne.s32.totalorder %s281_s6, %s7755_s22  ;;  %p7761_p7 = scmp.lt.s32.totalorder %s7755_s22, %s7755_s22 }
  0xd0   :  { %p7762_p8 = por %p7761_p7, %p7760_p6 }
  0xd2   :  { %p7763_p9 = pnand %p7762_p8, %p7756_p5 }
  0xd4   :  { %7766 = shalt.err (!%p7763_p9)
}
  0xd5   :  { %286 = dma.hbm_to_vmem [thread:$0]  %s9748_s24, 512, %s281_s6, [#allocation33], %s8058_s28, %s8058_s28, %s8059_s8  }
  0xd6   :  { %s9782_s29 = sld [smem:[#allocation49_spill]] }
  0xdc   :  { %s7767_s17 = scalar_lea.hbm %s9782_s29, 256 }
  0xdd   :  { %p7768_p10 = scmp.ne.s32.totalorder %s9782_s29, %s7767_s17  ;;  %p7771_p11 = scmp.lt.u32.totalorder %s7767_s17, %s9782_s29 }
  0xdf   :  { %p7773_p12 = pnand %p7771_p11, %p7768_p10 }
  0xe1   :  { %7776 = shalt.err (!%p7773_p12)
}
  0xe2   :  { %s7777_s30 = scalar_lea.vmem %s51_s15, 256  ;;  %p7782_p0 = scmp.lt.s32.totalorder %s51_s15, %s51_s15 }
  0xe3   :  { %p7778_p13 = scmp.ne.s32.totalorder %s51_s15, %s7777_s30  ;;  %p7783_p1 = scmp.lt.s32.totalorder %s7777_s30, %s7777_s30 }
  0xe5   :  { %p7784_p2 = por %p7783_p1, %p7782_p0 }
  0xe7   :  { %p7785_p3 = pnand %p7784_p2, %p7778_p13 }
  0xe9   :  { %7788 = shalt.err (!%p7785_p3)
}
  0xea   :  { %56 = dma.hbm_to_vmem [thread:$0]  %s9782_s29, 256, %s51_s15, [#allocation3], %s8058_s28, %s8058_s28, %s8059_s8  }
  0xeb   :  { %s8070_s0 = smov [#allocation7]   ;;  %s8071_s26 = smov [#allocation10]  }
  0xec   :  { %s72_s13 = sshll.u32 %s8070_s0, 4  ;;  %s96_s5 = sshll.u32 %s8071_s26, 4  ;;  %s73_s13 = int_to_ptr.vmem [resolvable:$true] %s72_s13  ;;  %s97_s5 = int_to_ptr.vmem [resolvable:$true] %s96_s5 }
  0xed   :  { %s9783_s9 = sld [smem:[#allocation51_spill]] }
  0xf3   :  { %s7789_s27 = scalar_lea.hbm %s9783_s9, 256 }
  0xf4   :  { %p7790_p4 = scmp.ne.s32.totalorder %s9783_s9, %s7789_s27  ;;  %p7793_p5 = scmp.lt.u32.totalorder %s7789_s27, %s9783_s9 }
  0xf6   :  { %p7795_p6 = pnand %p7793_p5, %p7790_p4 }
  0xf8   :  { %7798 = shalt.err (!%p7795_p6)
}
  0xf9   :  { %s7799_s15 = scalar_lea.vmem %s73_s13, 256  ;;  %p7804_p8 = scmp.lt.s32.totalorder %s73_s13, %s73_s13 }
  0xfa   :  { %p7800_p7 = scmp.ne.s32.totalorder %s73_s13, %s7799_s15  ;;  %p7805_p9 = scmp.lt.s32.totalorder %s7799_s15, %s7799_s15 }
  0xfc   :  { %p7806_p10 = por %p7805_p9, %p7804_p8 }
  0xfe   :  { %p7807_p11 = pnand %p7806_p10, %p7800_p7 }
 0x100   :  { %7810 = shalt.err (!%p7807_p11)
}
 0x101   :  { %78 = dma.hbm_to_vmem [thread:$0]  %s9783_s9, 256, %s73_s13, [#allocation6], %s8058_s28, %s8058_s28, %s8059_s8  }
 0x102   :  { %s9784_s30 = sld [smem:[#allocation54_spill]] }
 0x108   :  { %s7811_s24 = scalar_lea.hbm %s9784_s30, 32 }
 0x109   :  { %p7812_p12 = scmp.ne.s32.totalorder %s9784_s30, %s7811_s24  ;;  %p7815_p13 = scmp.lt.u32.totalorder %s7811_s24, %s9784_s30 }
 0x10b   :  { %p7817_p0 = pnand %p7815_p13, %p7812_p12 }
 0x10d   :  { %7820 = shalt.err (!%p7817_p0)
}
 0x10e   :  { %s7821_s22 = scalar_lea.vmem %s97_s5, 32  ;;  %p7826_p2 = scmp.lt.s32.totalorder %s97_s5, %s97_s5 }
 0x10f   :  { %p7822_p1 = scmp.ne.s32.totalorder %s97_s5, %s7821_s22  ;;  %p7827_p3 = scmp.lt.s32.totalorder %s7821_s22, %s7821_s22 }
 0x111   :  { %p7828_p4 = por %p7827_p3, %p7826_p2 }
 0x113   :  { %p7829_p5 = pnand %p7828_p4, %p7822_p1 }
 0x115   :  { %7832 = shalt.err (!%p7829_p5)
}
 0x116   :  { %102 = dma.hbm_to_vmem [thread:$0]  %s9784_s30, 32, %s97_s5, [#allocation9], %s8062_s4, %s8062_s4, %s8063_s3  }
 0x117   :  { %s8072_s27 = smov [#allocation13]   ;;  %s8073_s1 = smov [#allocation16]  }
 0x118   :  { %s120_s2 = sshll.u32 %s8072_s27, 4  ;;  %s144_s17 = sshll.u32 %s8073_s1, 4  ;;  %s121_s2 = int_to_ptr.vmem [resolvable:$true] %s120_s2  ;;  %s145_s17 = int_to_ptr.vmem [resolvable:$true] %s144_s17 }
 0x119   :  { %s9785_s29 = sld [smem:[#allocation56_spill]] }
 0x11f   :  { %s7833_s20 = scalar_lea.hbm %s9785_s29, 32 }
 0x120   :  { %p7834_p6 = scmp.ne.s32.totalorder %s9785_s29, %s7833_s20  ;;  %p7837_p7 = scmp.lt.u32.totalorder %s7833_s20, %s9785_s29 }
 0x122   :  { %p7839_p8 = pnand %p7837_p7, %p7834_p6 }
 0x124   :  { %7842 = shalt.err (!%p7839_p8)
}
 0x125   :  { %s7843_s5 = scalar_lea.vmem %s121_s2, 32  ;;  %p7848_p10 = scmp.lt.s32.totalorder %s121_s2, %s121_s2 }
 0x126   :  { %p7844_p9 = scmp.ne.s32.totalorder %s121_s2, %s7843_s5  ;;  %p7849_p11 = scmp.lt.s32.totalorder %s7843_s5, %s7843_s5 }
 0x128   :  { %p7850_p12 = por %p7849_p11, %p7848_p10 }
 0x12a   :  { %p7851_p13 = pnand %p7850_p12, %p7844_p9 }
 0x12c   :  { %7854 = shalt.err (!%p7851_p13)
}
 0x12d   :  { %126 = dma.hbm_to_vmem [thread:$0]  %s9785_s29, 32, %s121_s2, [#allocation12], %s8062_s4, %s8062_s4, %s8063_s3  }
 0x12e   :  { %s9786_s22 = sld [smem:[#allocation58_spill]] }
 0x134   :  { %s7855_s13 = scalar_lea.hbm %s9786_s22, 32 }
 0x135   :  { %p7856_p0 = scmp.ne.s32.totalorder %s9786_s22, %s7855_s13  ;;  %p7859_p1 = scmp.lt.u32.totalorder %s7855_s13, %s9786_s22 }
 0x137   :  { %p7861_p2 = pnand %p7859_p1, %p7856_p0 }
 0x139   :  { %7864 = shalt.err (!%p7861_p2)
}
 0x13a   :  { %s7865_s15 = scalar_lea.vmem %s145_s17, 32  ;;  %p7870_p4 = scmp.lt.s32.totalorder %s145_s17, %s145_s17 }
 0x13b   :  { %p7866_p3 = scmp.ne.s32.totalorder %s145_s17, %s7865_s15  ;;  %p7871_p5 = scmp.lt.s32.totalorder %s7865_s15, %s7865_s15 }
 0x13d   :  { %p7872_p6 = por %p7871_p5, %p7870_p4 }
 0x13f   :  { %p7873_p7 = pnand %p7872_p6, %p7866_p3 }
 0x141   :  { %7876 = shalt.err (!%p7873_p7)
}
 0x142   :  { %150 = dma.hbm_to_vmem [thread:$0]  %s9786_s22, 32, %s145_s17, [#allocation15], %s8062_s4, %s8062_s4, %s8063_s3  }
 0x143   :  { %s8074_s20 = smov [#allocation19]   ;;  %s8075_s18 = smov [#allocation22]  }
 0x144   :  { %s168_s7 = sshll.u32 %s8074_s20, 4  ;;  %s192_s24 = sshll.u32 %s8075_s18, 4  ;;  %s169_s7 = int_to_ptr.vmem [resolvable:$true] %s168_s7  ;;  %s193_s24 = int_to_ptr.vmem [resolvable:$true] %s192_s24 }
 0x145   :  { %s7877_s30 = scalar_lea.hbm %s9736_s12, 32 }
 0x146   :  { %p7878_p8 = scmp.ne.s32.totalorder %s9736_s12, %s7877_s30  ;;  %p7881_p9 = scmp.lt.u32.totalorder %s7877_s30, %s9736_s12 }
 0x148   :  { %p7883_p10 = pnand %p7881_p9, %p7878_p8 }
 0x14a   :  { %7886 = shalt.err (!%p7883_p10)
}
 0x14b   :  { %s7887_s17 = scalar_lea.vmem %s169_s7, 32  ;;  %p7892_p12 = scmp.lt.s32.totalorder %s169_s7, %s169_s7 }
 0x14c   :  { %p7888_p11 = scmp.ne.s32.totalorder %s169_s7, %s7887_s17  ;;  %p7893_p13 = scmp.lt.s32.totalorder %s7887_s17, %s7887_s17 }
 0x14e   :  { %p7894_p0 = por %p7893_p13, %p7892_p12 }
 0x150   :  { %p7895_p1 = pnand %p7894_p0, %p7888_p11 }
 0x152   :  { %7898 = shalt.err (!%p7895_p1)
}
 0x153   :  { %174 = dma.hbm_to_vmem [thread:$0]  %s9736_s12, 32, %s169_s7, [#allocation18], %s8062_s4, %s8062_s4, %s8063_s3  }
 0x154   :  { %s7899_s10 = scalar_lea.hbm %s9738_s14, 32 }
 0x155   :  { %p7900_p2 = scmp.ne.s32.totalorder %s9738_s14, %s7899_s10  ;;  %p7903_p3 = scmp.lt.u32.totalorder %s7899_s10, %s9738_s14 }
 0x157   :  { %p7905_p4 = pnand %p7903_p3, %p7900_p2 }
 0x159   :  { %7908 = shalt.err (!%p7905_p4)
}
 0x15a   :  { %s7909_s18 = scalar_lea.vmem %s193_s24, 32  ;;  %p7914_p6 = scmp.lt.s32.totalorder %s193_s24, %s193_s24 }
 0x15b   :  { %p7910_p5 = scmp.ne.s32.totalorder %s193_s24, %s7909_s18  ;;  %p7915_p7 = scmp.lt.s32.totalorder %s7909_s18, %s7909_s18 }
 0x15d   :  { %p7916_p8 = por %p7915_p7, %p7914_p6 }
 0x15f   :  { %p7917_p9 = pnand %p7916_p8, %p7910_p5 }
 0x161   :  { %7920 = shalt.err (!%p7917_p9)
}
 0x162   :  { %198 = dma.hbm_to_vmem [thread:$0]  %s9738_s14, 32, %s193_s24, [#allocation21], %s8062_s4, %s8062_s4, %s8063_s3  }
 0x163   :  { %s8076_s6 = smov [#allocation25]   ;;  %s8077_s30 = smov [#allocation28]  }
 0x164   :  { %s216_s5 = sshll.u32 %s8076_s6, 4  ;;  %s246_s0 = sshll.u32 %s8077_s30, 4  ;;  %s217_s5 = int_to_ptr.vmem [resolvable:$true] %s216_s5  ;;  %s247_s0 = int_to_ptr.vmem [resolvable:$true] %s246_s0 }
 0x165   :  { %s7921_s13 = scalar_lea.hbm %s9740_s16, 32 }
 0x166   :  { %p7922_p10 = scmp.ne.s32.totalorder %s9740_s16, %s7921_s13  ;;  %p7925_p11 = scmp.lt.u32.totalorder %s7921_s13, %s9740_s16 }
 0x168   :  { %p7927_p12 = pnand %p7925_p11, %p7922_p10 }
 0x16a   :  { %7930 = shalt.err (!%p7927_p12)
}
 0x16b   :  { %s7931_s14 = scalar_lea.vmem %s217_s5, 32  ;;  %p7936_p0 = scmp.lt.s32.totalorder %s217_s5, %s217_s5 }
 0x16c   :  { %p7932_p13 = scmp.ne.s32.totalorder %s217_s5, %s7931_s14  ;;  %p7937_p1 = scmp.lt.s32.totalorder %s7931_s14, %s7931_s14 }
 0x16e   :  { %p7938_p2 = por %p7937_p1, %p7936_p0 }
 0x170   :  { %p7939_p3 = pnand %p7938_p2, %p7932_p13 }
 0x172   :  { %7942 = shalt.err (!%p7939_p3)
}
 0x173   :  { %222 = dma.hbm_to_vmem [thread:$0]  %s9740_s16, 32, %s217_s5, [#allocation24], %s8062_s4, %s8062_s4, %s8063_s3  }
 0x174   :  { %s7943_s2 = scalar_lea.hbm %s9745_s21, 8064 }
 0x175   :  { %p7944_p4 = scmp.ne.s32.totalorder %s9745_s21, %s7943_s2  ;;  %p7947_p5 = scmp.lt.u32.totalorder %s7943_s2, %s9745_s21 }
 0x177   :  { %p7949_p6 = pnand %p7947_p5, %p7944_p4 }
 0x179   :  { %7952 = shalt.err (!%p7949_p6)
}
 0x17a   :  { %s7953_s7 = scalar_lea.vmem %s247_s0, 8064  ;;  %p7958_p8 = scmp.lt.s32.totalorder %s247_s0, %s247_s0 }
 0x17b   :  { %p7954_p7 = scmp.ne.s32.totalorder %s247_s0, %s7953_s7  ;;  %p7959_p9 = scmp.lt.s32.totalorder %s7953_s7, %s7953_s7 }
 0x17d   :  { %p7960_p10 = por %p7959_p9, %p7958_p8 }
 0x17f   :  { %p7961_p11 = pnand %p7960_p10, %p7954_p7 }
 0x181   :  { %7964 = shalt.err (!%p7961_p11)
}
 0x182   :  { %s8078_s16 = smov 384   ;;  %s8079_s3 = smov 24  }
 0x183   :  { %252 = dma.hbm_to_vmem [thread:$0]  %s9745_s21, 8064, %s247_s0, [#allocation27], %s8078_s16, %s8078_s16, %s8079_s3  }
 0x184   :  { %s8080_s30 = smov [#allocation31]   ;;  %s8081_s11 = smov [#allocation34]  }
 0x185   :  { %s268_s26 = sshll.u32 %s8080_s30, 4  ;;  %s293_s13 = sshll.u32 %s8081_s11, 4  ;;  %s269_s26 = int_to_ptr.vmem [resolvable:$true] %s268_s26  ;;  %s294_s13 = int_to_ptr.vmem [resolvable:$true] %s293_s13 }
 0x186   :  { %s7965_s9 = scalar_lea.hbm %s9747_s23, 512 }
 0x187   :  { %p7966_p12 = scmp.ne.s32.totalorder %s9747_s23, %s7965_s9  ;;  %p7969_p13 = scmp.lt.u32.totalorder %s7965_s9, %s9747_s23 }
 0x189   :  { %p7971_p0 = pnand %p7969_p13, %p7966_p12 }
 0x18b   :  { %7974 = shalt.err (!%p7971_p0)
}
 0x18c   :  { %s7975_s21 = scalar_lea.vmem %s269_s26, 512  ;;  %p7980_p2 = scmp.lt.s32.totalorder %s269_s26, %s269_s26 }
 0x18d   :  { %p7976_p1 = scmp.ne.s32.totalorder %s269_s26, %s7975_s21  ;;  %p7981_p3 = scmp.lt.s32.totalorder %s7975_s21, %s7975_s21 }
 0x18f   :  { %p7982_p4 = por %p7981_p3, %p7980_p2 }
 0x191   :  { %p7983_p5 = pnand %p7982_p4, %p7976_p1 }
 0x193   :  { %7986 = shalt.err (!%p7983_p5)
}
 0x194   :  { %274 = dma.hbm_to_vmem [thread:$0]  %s9747_s23, 512, %s269_s26, [#allocation30], %s8058_s28, %s8058_s28, %s8059_s8  }
 0x195   :  { %s7987_s29 = scalar_lea.hbm %s9749_s25, 16 }
 0x196   :  { %p7988_p6 = scmp.ne.s32.totalorder %s9749_s25, %s7987_s29  ;;  %p7991_p7 = scmp.lt.u32.totalorder %s7987_s29, %s9749_s25 }
 0x198   :  { %p7993_p8 = pnand %p7991_p7, %p7988_p6 }
 0x19a   :  { %7996 = shalt.err (!%p7993_p8)
}
 0x19b   :  { %s7997_s16 = scalar_lea.vmem %s294_s13, 16  ;;  %s8001_s3 = scalar_lea.vmem %s294_s13, 32 }
 0x19c   :  { %p7998_p9 = scmp.ne.s32.totalorder %s294_s13, %s7997_s16  ;;  %p8002_p10 = scmp.lt.s32.totalorder %s294_s13, %s294_s13 }
 0x19d   :  { %p8003_p11 = scmp.lt.s32.totalorder %s8001_s3, %s7997_s16 }
 0x19f   :  { %p8004_p12 = por %p8003_p11, %p8002_p10 }
 0x1a1   :  { %p8005_p13 = pnand %p8004_p12, %p7998_p9 }
 0x1a3   :  { %8008 = shalt.err (!%p8005_p13)
}
 0x1a4   :  { %296 = dma.hbm_to_vmem [thread:$0]  %s9749_s25, 16, %s294_s13, [#allocation33]  }
 0x1a5   :  { %8031 = dma.done.wait [#allocation3], 256  }
 0x1a6   :  { %8032 = vsyncadd [#allocation3], 4294967040 }
 0x1a7   :  { %8033 = dma.done.wait [#allocation6], 384  }
 0x1a8   :  { %8034 = vsyncadd [#allocation6], 4294966912 }
 0x1a9   :  { %8035 = dma.done.wait [#allocation9], 48  }
 0x1aa   :  { %8036 = vsyncadd [#allocation9], 4294967248 }
 0x1ab   :  { %8037 = dma.done.wait [#allocation12], 1056  }
 0x1ac   :  { %8038 = vsyncadd [#allocation12], 4294966240 }
 0x1ad   :  { %8039 = dma.done.wait [#allocation15], 64  }
 0x1ae   :  { %8040 = vsyncadd [#allocation15], 4294967232 }
 0x1af   :  { %8041 = dma.done.wait [#allocation18], 1056  }
 0x1b0   :  { %8042 = vsyncadd [#allocation18], 4294966240 }
 0x1b1   :  { %8043 = dma.done.wait [#allocation21], 1056  }
 0x1b2   :  { %8044 = vsyncadd [#allocation21], 4294966240 }
 0x1b3   :  { %8045 = dma.done.wait [#allocation24], 64  }
 0x1b4   :  { %8046 = vsyncadd [#allocation24], 4294967232 }
 0x1b5   :  { %8047 = dma.done.wait [#allocation27], 8320  }
 0x1b6   :  { %8048 = vsyncadd [#allocation27], 4294958976 }
 0x1b7   :  { %8049 = dma.done.wait [#allocation30], 560  }
 0x1b8   :  { %8050 = vsyncadd [#allocation30], 4294966736 }
 0x1b9   :  { %8051 = dma.done.wait [#allocation33], 528  }
 0x1ba   :  { %8052 = vsyncadd [#allocation33], 4294966768  ;;  %vm371_vm0 = vcmask 130048   ;;  %v362_v0 = vld [vmem:[#allocation7] sm:$0xff]  ;;  %v363_v1 = vld [vmem:[#allocation7 + $0x8] sm:$0xff]  ;;  %s9787_s30 = sld [smem:[#allocation48_spill]] }
 0x1bb   :  { %v6638_v3 = vpack.c.bf16 %v363_v1, %v362_v0  ;;  %s9788_s13 = sld [smem:[#allocation53_spill]]  ;;  %v6119_v11 = vld [vmem:[#allocation8] ss:$0 sm:$0xff]  ;;  %v453_v15 = vld [vmem:[#allocation2] sm:$0xff]  ;;  %vm469_vm1 = vcmask 261120   ;;  %v8082_v20 = vmov 0.0  }
 0x1bc   :  { %v454_v16 = vld [vmem:[#allocation2 + $0x8] sm:$0xff]  ;;  %vm8083_vm2 = vmmov 0   ;;  %s8084_s0 = smov 112   ;;  %s8085_s10 = smov 96   ;;  %v8603_v34 = vld [vmem:[#allocation5] sm:$0xff]  ;;  %vm861_vm3 = vcmask 64512  }
 0x1bd   :  { %6639 = vmatprep.subr.bf16.mxu0 %v6638_v3  ;;  %v6122_v21 = vld [vmem:[#allocation10] ss:$0 sm:$0xff]  ;;  %s8086_s15 = smov 80   ;;  %s8087_s2 = smov 48   ;;  %vm2848_vm4 = vcmask 588800   ;;  %vm2850_vm5 = vcmask 850944  }
 0x1be   :  { %6641 = vmatpush3.bf16.msra.mxu0 %v6638_v3  ;;  %s8088_s29 = smov 64   ;;  %s8089_s5 = smov 72   ;;  %vm2933_vm6 = vcmask 326656   ;;  %vm3172_vm7 = vcmask 1041409   ;;  %vm3272_vm8 = vcmask 581632  }
 0x1bf   :  { %6382 = vmatprep.subr.mxu0 %v8082_v20  ;;  %s8090_s17 = smov 104   ;;  %s9789_s9 = sld [smem:[#allocation59_spill]] }
 0x1c0   :  { %v360_v2 = vld [vmem:[%s9787_s30] sm:$0xff]  ;;  %v361_v7 = vld [vmem:[%s9787_s30 + $0x8] sm:$0xff]  ;;  %s9790_s24 = sld [smem:[#allocation60_spill]]  ;;  %s8092_s1 = smov 32  }
 0x1c1   :  { %6368 = vmatprep.mubr.msk.f32.mxu0 %vm371_vm0, %v360_v2  ;;  %v458_v4 = vld [vmem:[%s9788_s13] sm:$0xff]  ;;  %v459_v5 = vld [vmem:[%s9788_s13 + $0x8] sm:$0xff]  ;;  %v460_v8 = vld [vmem:[%s9788_s13 + $0x10] sm:$0xff] }
 0x1c2   :  { %v6642_v6 = vpack.c.bf16 %v459_v5, %v458_v4  ;;  %6369 = vmatmul.mubr.msk.f32.vlgmr.msra.gmra.mrb[0].mxu0 %vm371_vm0, %v361_v7  ;;  %v461_v9 = vld [vmem:[%s9788_s13 + $0x18] sm:$0xff] }
 0x1c3   :  { %v6646_v10 = vpack.c.bf16 %v461_v9, %v460_v8  ;;  %6384 = vmatprep.mubr.msk.f32.mxu0 %vm8083_vm2, %v8082_v20 }
 0x1c4   :  { %6643 = vmatprep.subr.bf16.mxu1 %v6642_v6 }
 0x1c5   :  { %6645 = vmatpush3.bf16.msra.mxu1 %v6642_v6 }
 0x1c6   :  { %6647 = vmatprep.subr.bf16.mxu1 %v6646_v10 }
 0x1c9   :  { %6649 = vmatpush3.bf16.msra.mxu1 %v6646_v10 }
 0x1ca   :  { %6392 = vmatprep.subr.mxu1 %v8082_v20 }
 0x295   :  { %v6370_v12 = vpop.f32.mrb[0].mxu0 }
 0x296   :  { %v450_v13 = vadd.f32 %v6370_v12, %v6119_v11  ;;  %v444_v14 = vpop.f32.mrb[1].mxu0 }
 0x297   :  { %v445_v17 = vadd.f32 %v6119_v11, %v444_v14 }
 0x298   :  { %v8553_v19 = vadd.f32 %v454_v16, %v450_v13 }
 0x299   :  { %v8551_v18 = vadd.f32 %v453_v15, %v445_v17 }
 0x29b   :  { %6379 = vmatprep.mubr.msk.f32.mxu1 %vm469_vm1, %v8551_v18 }
 0x29c   :  { %6380 = vmatmul.mubr.msk.f32.vlgmr.msra.gmra.mrb[0].mxu1 %vm469_vm1, %v8553_v19 }
 0x29d   :  { %6394 = vmatprep.mubr.msk.f32.mxu1 %vm8083_vm2, %v8082_v20 }
 0x36f   :  { %v6381_v22 = vpop.f32.mrb[0].mxu1 }
 0x370   :  { %v542_v23 = vpop.f32.mrb[1].mxu1  ;;  %v8571_v25 = vadd.f32 %v6381_v22, %v6122_v21 }
 0x371   :  { %v8565_v24 = vadd.f32 %v6122_v21, %v542_v23 }
 0x373   :  { %628 = vrot.lane.b32.xlu1 %v8565_v24, %s8084_s0  ;;  %552 = vrot.lane.b32.xlu0 %v8565_v24, %s8085_s10 }
 0x377   :  { %785 = vrot.lane.b32.xlu1 %v8571_v25, %s8086_s15  ;;  %630 = vrot.lane.b32.xlu0 %v8565_v24, %s8086_s15 }
 0x37b   :  { %707 = vrot.lane.b32.xlu1 %v8571_v25, %s8085_s10  ;;  %783 = vrot.lane.b32.xlu0 %v8571_v25, %s8084_s0 }
 0x3e5   :  { %v629_v26 = vpop.permute.xlu1 %628  ;;  %v553_v27 = vpop.permute.xlu0 %552 }
 0x3e6   :  { %6383 = vmatpush3.xpose.msk.msra.mxu0 %vm371_vm0, %v553_v27  ;;  %v1222_v27 = vld [vmem:[#allocation11 + $0x10] sm:$0xff] }
 0x3e7   :  { %6387 = vmatprep.subr.mxu0 %v8082_v20 }
 0x3e9   :  { %v786_v28 = vpop.permute.xlu1 %785  ;;  %6385 = vmatmul.mubr.msk.f32.vlgmr.msra.gmra.mrb[2].mxu0 %vm371_vm0, %v8565_v24  ;;  %v631_v29 = vpop.permute.xlu0 %630 }
 0x3ea   :  { %6388 = vmatpush3.xpose.msk.msra.mxu0 %vm371_vm0, %v631_v29  ;;  %6389 = vmatprep.mubr.msk.f32.mxu0 %vm8083_vm2, %v8082_v20 }
 0x3eb   :  { %6397 = vmatprep.subr.mxu0 %v8082_v20 }
 0x3ed   :  { %v708_v30 = vpop.permute.xlu1 %707  ;;  %6390 = vmatmul.mubr.msk.f32.vlgmr.msra.gmra.mrb[4].mxu0 %vm371_vm0, %v629_v26  ;;  %v784_v31 = vpop.permute.xlu0 %783 }
 0x3ee   :  { %6393 = vmatpush3.xpose.msk.msra.mxu1 %vm371_vm0, %v708_v30  ;;  %6398 = vmatpush3.xpose.msk.msra.mxu0 %vm371_vm0, %v786_v28  ;;  %v1223_v28 = vld [vmem:[#allocation11 + $0x18] sm:$0xff] }
 0x3ef   :  { %6399 = vmatprep.mubr.msk.f32.mxu0 %vm8083_vm2, %v8082_v20  ;;  %6407 = vmatprep.subr.mxu0 %v8082_v20  ;;  %v6654_v29 = vpack.c.bf16 %v1223_v28, %v1222_v27  ;;  %v6142_v27 = vld [vmem:[#allocation19] ss:$0 sm:$0xff] }
 0x3f0   :  { %6402 = vmatprep.subr.mxu1 %v8082_v20 }
 0x3f1   :  { %6395 = vmatmul.mubr.msk.f32.vlgmr.msra.gmra.mrb[2].mxu1 %vm371_vm0, %v8571_v25  ;;  %6400 = vmatmul.mubr.msk.f32.vlgmr.msra.gmra.mrb[6].mxu0 %vm371_vm0, %v784_v31 }
 0x3f2   :  { %6409 = vmatprep.mubr.msk.f32.mxu0 %vm8083_vm2, %v8082_v20  ;;  %6404 = vmatprep.mubr.msk.f32.mxu1 %vm8083_vm2, %v8082_v20 }
 0x4bc   :  { %v624_v32 = vpop.f32.mrb[2].mxu0 }
 0x4bd   :  { %v6386_v33 = vpop.f32.mrb[3].mxu0  ;;  %v625_v38 = vadd.f32 %v624_v32, %v8603_v34 }
 0x4bf   :  { %v862_v46 = vsel %vm861_vm3, %v625_v38, -inf }
 0x4c0   :  { %v702_v35 = vpop.f32.mrb[4].mxu0 }
 0x4c1   :  { %v703_v36 = vadd.f32 %v702_v35, %v8603_v34  ;;  %v6391_v37 = vpop.f32.mrb[5].mxu0 }
 0x4c3   :  { %v865_v39 = vsel %vm861_vm3, %v703_v36, -inf }
 0x4c4   :  { %v779_v40 = vpop.f32.mrb[2].mxu1  ;;  %866 = vmax.xlane.f32.xlu0 %v865_v39  ;;  %v857_v41 = vpop.f32.mrb[6].mxu0 }
 0x4c5   :  { %v858_v42 = vadd.f32 %v857_v41, %v8603_v34  ;;  %v6396_v43 = vpop.f32.mrb[3].mxu1  ;;  %v6401_v44 = vpop.f32.mrb[7].mxu0  ;;  %v780_v45 = vadd.f32 %v779_v40, %v8603_v34 }
 0x4c6   :  { %v6137_v43 = vld [vmem:[#allocation13] ss:$0 sm:$0xff] }
 0x4c7   :  { %v871_v47 = vsel %vm861_vm3, %v858_v42, -inf  ;;  %v868_v48 = vsel %vm861_vm3, %v780_v45, -inf }
 0x4c8   :  { %863 = vmax.xlane.f32.xlu0 %v862_v46  ;;  %872 = vmax.xlane.f32.xlu1 %v871_v47 }
 0x4cc   :  { %869 = vmax.xlane.f32.xlu0 %v868_v48 }
 0x551   :  { %v867_v49 = vpop.xlane.xlu0 %866 }
 0x552   :  { %v875_v50 = vsub.f32 %v703_v36, %v867_v49 }
 0x554   :  { %v880_v51 = vmul.f32 1.442695, %v875_v50 }
 0x555   :  { %v873_v52 = vpop.xlane.xlu1 %872  ;;  %v864_v59 = vpop.xlane.xlu0 %863 }
 0x556   :  { %7323 = vpow2.f32 %v880_v51  ;;  %v877_v53 = vsub.f32 %v858_v42, %v873_v52  ;;  %v874_v60 = vsub.f32 %v625_v38, %v864_v59 }
 0x558   :  { %v884_v54 = vmul.f32 1.442695, %v877_v53  ;;  %v878_v62 = vmul.f32 1.442695, %v874_v60 }
 0x559   :  { %v870_v61 = vpop.xlane.xlu0 %869 }
 0x55a   :  { %7325 = vpow2.f32 %v884_v54  ;;  %v876_v63 = vsub.f32 %v780_v45, %v870_v61  ;;  %v1360_v61 = vld [vmem:[#allocation17 + $0x8] sm:$0xff] }
 0x55b   :  { %7327 = vpow2.f32 %v878_v62  ;;  %v1361_v62 = vld [vmem:[#allocation17 + $0x10] sm:$0xff] }
 0x55c   :  { %v882_v0 = vmul.f32 1.442695, %v876_v63 }
 0x55e   :  { %7329 = vpow2.f32 %v882_v0  ;;  %v1362_v0 = vld [vmem:[#allocation17 + $0x18] sm:$0xff] }
 0x560   :  { %v7324_v55 = vpop.eup %7323 }
 0x561   :  { %v889_v56 = vsel %vm861_vm3, %v7324_v55, 0.0 }
 0x562   :  { %890 = vadd.xlane.f32.xlu1 %v889_v56 }
 0x564   :  { %v7326_v57 = vpop.eup %7325 }
 0x565   :  { %v895_v58 = vsel %vm861_vm3, %v7326_v57, 0.0  ;;  %v7328_v1 = vpop.eup %7327 }
 0x566   :  { %896 = vadd.xlane.f32.xlu0 %v895_v58  ;;  %v886_v2 = vsel %vm861_vm3, %v7328_v1, 0.0 }
 0x568   :  { %v7330_v3 = vpop.eup %7329 }
 0x569   :  { %v892_v4 = vsel %vm861_vm3, %v7330_v3, 0.0 }
 0x573   :  { %982 = vrot.lane.b32.xlu1 %v8565_v24, %s8087_s2 }
 0x57c   :  { %1139 = vrot.lane.b32.xlu0 %v8571_v25, %s8087_s2 }
 0x597   :  { %887 = vadd.xlane.f32.xlu1 %v886_v2  ;;  %v1453_v2 = vld [vmem:[#allocation20] sm:$0xff] }
 0x59b   :  { %893 = vadd.xlane.f32.xlu0 %v892_v4 }
 0x5a8   :  { %906 = vrot.lane.b32.xlu1 %v8565_v24, %s8088_s29  ;;  %v1220_v24 = vld [vmem:[#allocation11] sm:$0xff] }
 0x5b1   :  { %1063 = vrot.lane.b32.xlu0 %v8571_v25, %s8088_s29  ;;  %v1221_v25 = vld [vmem:[#allocation11 + $0x8] sm:$0xff] }
 0x5b2   :  { %v6650_v26 = vpack.c.bf16 %v1221_v25, %v1220_v24  ;;  %v1455_v24 = vld [vmem:[#allocation20 + $0x10] sm:$0xff]  ;;  %v1456_v25 = vld [vmem:[#allocation20 + $0x18] sm:$0xff] }
 0x5ef   :  { %v891_v5 = vpop.xlane.xlu1 %890 }
 0x5f0   :  { %7331 = vrcp.f32 %v891_v5 }
 0x5f3   :  { %v983_v6 = vpop.permute.xlu1 %982  ;;  %v897_v7 = vpop.xlane.xlu0 %896 }
 0x5f4   :  { %7333 = vrcp.f32 %v897_v7  ;;  %6408 = vmatpush3.msra.mxu0 %v983_v6 }
 0x5f5   :  { %6417 = vmatprep.subr.mxu0 %v8082_v20 }
 0x5f7   :  { %v1140_v10 = vpop.permute.xlu0 %1139 }
 0x5fa   :  { %v7332_v8 = vpop.eup %7331 }
 0x5fb   :  { %v903_v9 = vmul.f32 %v7332_v8, %v7324_v55 }
 0x5fd   :  { %6410 = vmatmul.mubr.msk.f32.vlgmr.msra.gmra.mrb[8].mxu0 %vm861_vm3, %v903_v9 }
 0x5fe   :  { %v7334_v11 = vpop.eup %7333  ;;  %6418 = vmatpush3.msra.mxu0 %v1140_v10  ;;  %6419 = vmatprep.mubr.msk.f32.mxu0 %vm8083_vm2, %v8082_v20 }
 0x5ff   :  { %v905_v12 = vmul.f32 %v7334_v11, %v7326_v57  ;;  %6471 = vmatprep.subr.mxu0 %v8082_v20 }
 0x601   :  { %6420 = vmatmul.mubr.msk.f32.vlgmr.msra.gmra.mrb[10].mxu0 %vm861_vm3, %v905_v12  ;;  %v6140_v12 = vld [vmem:[#allocation14] ss:$0 sm:$0xff] }
 0x602   :  { %6473 = vmatprep.mubr.msk.f32.mxu0 %vm8083_vm2, %v8082_v20 }
 0x624   :  { %v888_v13 = vpop.xlane.xlu1 %887 }
 0x625   :  { %7335 = vrcp.f32 %v888_v13 }
 0x628   :  { %v907_v14 = vpop.permute.xlu1 %906  ;;  %v894_v15 = vpop.xlane.xlu0 %893 }
 0x629   :  { %7337 = vrcp.f32 %v894_v15  ;;  %6403 = vmatpush3.msra.mxu1 %v907_v14  ;;  %v6141_v14 = vld [vmem:[#allocation16] ss:$0 sm:$0xff] }
 0x62a   :  { %6412 = vmatprep.subr.mxu1 %v8082_v20 }
 0x62c   :  { %v1064_v21 = vpop.permute.xlu0 %1063 }
 0x62f   :  { %v7336_v16 = vpop.eup %7335 }
 0x630   :  { %v902_v17 = vmul.f32 %v7336_v16, %v7328_v1  ;;  %v6662_v1 = vpack.c.bf16 %v1362_v0, %v1361_v62 }
 0x632   :  { %6405 = vmatmul.mubr.msk.f32.vlgmr.msra.gmra.mrb[4].mxu1 %vm861_vm3, %v902_v17 }
 0x633   :  { %v7338_v22 = vpop.eup %7337  ;;  %6413 = vmatpush3.msra.mxu1 %v1064_v21  ;;  %6414 = vmatprep.mubr.msk.f32.mxu1 %vm8083_vm2, %v8082_v20 }
 0x634   :  { %v904_v23 = vmul.f32 %v7338_v22, %v7330_v3  ;;  %6651 = vmatprep.subr.bf16.mxu1 %v6650_v26  ;;  %v1454_v3 = vld [vmem:[#allocation20 + $0x8] sm:$0xff] }
 0x635   :  { %v6666_v4 = vpack.c.bf16 %v1454_v3, %v1453_v2 }
 0x636   :  { %6415 = vmatmul.mubr.msk.f32.vlgmr.msra.gmra.mrb[6].mxu1 %vm861_vm3, %v904_v23 }
 0x637   :  { %6653 = vmatpush3.bf16.msra.mxu1 %v6650_v26  ;;  %v6670_v26 = vpack.c.bf16 %v1456_v25, %v1455_v24 }
 0x638   :  { %6655 = vmatprep.subr.bf16.mxu1 %v6654_v29 }
 0x63b   :  { %6657 = vmatpush3.bf16.msra.mxu1 %v6654_v29 }
 0x6d0   :  { %v1054_v30 = vpop.f32.mrb[8].mxu0 }
 0x6d1   :  { %v6411_v31 = vpop.f32.mrb[9].mxu0  ;;  %1059 = vrot.lane.b32.xlu1 %v1054_v30, %s8062_s4 }
 0x6d4   :  { %v1211_v32 = vpop.f32.mrb[10].mxu0 }
 0x6d5   :  { %1216 = vrot.lane.b32.xlu1 %v1211_v32, %s8062_s4  ;;  %v6421_v33 = vpop.f32.mrb[11].mxu0 }
 0x705   :  { %v978_v35 = vpop.f32.mrb[4].mxu1 }
 0x706   :  { %v6406_v36 = vpop.f32.mrb[5].mxu1 }
 0x709   :  { %v1135_v37 = vpop.f32.mrb[6].mxu1 }
 0x70a   :  { %v6416_v38 = vpop.f32.mrb[7].mxu1 }
 0x743   :  { %v1060_v39 = vpop.permute.xlu1 %1059 }
 0x744   :  { %v1062_v40 = vsel %vm371_vm0, %v978_v35, %v1060_v39  ;;  %v6145_v35 = vld [vmem:[#allocation22] ss:$0 sm:$0xff] }
 0x745   :  { %6430 = vmatprep.mubr.msk.f32.mxu1 %vm469_vm1, %v1062_v40 }
 0x747   :  { %v1217_v41 = vpop.permute.xlu1 %1216 }
 0x748   :  { %v1219_v42 = vsel %vm371_vm0, %v1135_v37, %v1217_v41 }
 0x749   :  { %6431 = vmatmul.mubr.msk.f32.vlgmr.msra.gmra.mrb[8].mxu1 %vm469_vm1, %v1219_v42 }
 0x81c   :  { %v6432_v44 = vpop.f32.mrb[8].mxu1 }
 0x81d   :  { %v1309_v45 = vadd.f32 %v6432_v44, %v6137_v43  ;;  %v1303_v46 = vpop.f32.mrb[9].mxu1 }
 0x81e   :  { %v1304_v47 = vadd.f32 %v6137_v43, %v1303_v46 }
 0x81f   :  { %v1313_v48 = vadd.f32 %v1309_v45, %v8553_v19 }
 0x820   :  { %v1312_v49 = vadd.f32 %v1304_v47, %v8551_v18  ;;  %v1359_v18 = vld [vmem:[#allocation17] sm:$0xff] }
 0x821   :  { %v1319_v50 = vsel %vm469_vm1, %v1313_v48, 0.0  ;;  %v6658_v63 = vpack.c.bf16 %v1360_v61, %v1359_v18 }
 0x822   :  { %1320 = vadd.xlane.f32.xlu1 %v1319_v50  ;;  %v1316_v51 = vsel %vm469_vm1, %v1312_v49, 0.0 }
 0x823   :  { %1317 = vadd.xlane.f32.xlu0 %v1316_v51  ;;  %6659 = vmatprep.subr.bf16.mxu1 %v6658_v63 }
 0x824   :  { %6661 = vmatpush3.bf16.msra.mxu1 %v6658_v63 }
 0x825   :  { %6663 = vmatprep.subr.bf16.mxu1 %v6662_v1 }
 0x828   :  { %6665 = vmatpush3.bf16.msra.mxu1 %v6662_v1  ;;  %v6148_v1 = vld [vmem:[#allocation23] ss:$0 sm:$0xff] }
 0x829   :  { %6667 = vmatprep.subr.bf16.mxu1 %v6666_v4 }
 0x8af   :  { %v1321_v52 = vpop.xlane.xlu1 %1320 }
 0x8b0   :  { %v1324_v53 = vmul.f32 0.03125, %v1321_v52  ;;  %v1318_v54 = vpop.xlane.xlu0 %1317 }
 0x8b1   :  { %v1323_v55 = vmul.f32 0.03125, %v1318_v54  ;;  %v6150_v54 = vld [vmem:[%s9788_s13 + $0x20] sm:$0xff] }
 0x8b2   :  { %v1326_v56 = vsub.f32 %v1313_v48, %v1324_v53 }
 0x8b3   :  { %v1325_v57 = vsub.f32 %v1312_v49, %v1323_v55  ;;  %v6151_v55 = vld [vmem:[%s9788_s13 + $0x28] sm:$0xff] }
 0x8b4   :  { %v1328_v60 = vmul.f32 %v1326_v56, %v1326_v56 }
 0x8b5   :  { %v1327_v58 = vmul.f32 %v1325_v57, %v1325_v57 }
 0x8b6   :  { %v1332_v19 = vsel %vm469_vm1, %v1328_v60, 0.0 }
 0x8b7   :  { %v1329_v59 = vsel %vm469_vm1, %v1327_v58, 0.0  ;;  %v6153_v58 = vld [vmem:[%s9788_s13 + $0x38] sm:$0xff] }
 0x8b8   :  { %1330 = vadd.xlane.f32.xlu0 %v1329_v59 }
 0x8bc   :  { %1333 = vadd.xlane.f32.xlu0 %v1332_v19 }
 0x945   :  { %v1331_v5 = vpop.xlane.xlu0 %1330 }
 0x946   :  { %v1335_v6 = vmul.f32 0.03125, %v1331_v5  ;;  %v6149_v5 = vld [vmem:[#allocation25] ss:$0 sm:$0xff] }
 0x948   :  { %v1337_v7 = vadd.f32 1e-05, %v1335_v6 }
 0x949   :  { %v1334_v8 = vpop.xlane.xlu0 %1333 }
 0x94a   :  { %7339 = vrsqrt.f32 %v1337_v7  ;;  %v1336_v9 = vmul.f32 0.03125, %v1334_v8 }
 0x94c   :  { %v1338_v10 = vadd.f32 1e-05, %v1336_v9 }
 0x94e   :  { %7341 = vrsqrt.f32 %v1338_v10  ;;  %v6154_v10 = vld [vmem:[#allocation10 + $0x1] ss:$0 sm:$0xff] }
 0x954   :  { %v7340_v11 = vpop.eup %7339 }
 0x955   :  { %v1341_v13 = vmul.f32 %v7340_v11, %v1325_v57  ;;  %v6674_v57 = vpack.c.bf16 %v6151_v55, %v6150_v54 }
 0x957   :  { %v1349_v15 = vmul.f32 %v6140_v12, %v1341_v13 }
 0x958   :  { %v7342_v16 = vpop.eup %7341 }
 0x959   :  { %v1342_v17 = vmul.f32 %v7342_v16, %v1326_v56  ;;  %v1357_v21 = vadd.f32 %v6141_v14, %v1349_v15  ;;  %v6152_v56 = vld [vmem:[%s9788_s13 + $0x30] sm:$0xff] }
 0x95a   :  { %v6678_v59 = vpack.c.bf16 %v6153_v58, %v6152_v56 }
 0x95b   :  { %v1350_v22 = vmul.f32 %v6140_v12, %v1342_v17  ;;  %6441 = vmatprep.mubr.msk.f32.mxu1 %vm469_vm1, %v1357_v21 }
 0x95d   :  { %v1358_v23 = vadd.f32 %v6141_v14, %v1350_v22 }
 0x95f   :  { %6442 = vmatmul.mubr.msk.f32.vlgmr.msra.gmra.mrb[10].mxu1 %vm469_vm1, %v1358_v23 }
 0x960   :  { %6669 = vmatpush3.bf16.msra.mxu1 %v6666_v4 }
 0x961   :  { %6671 = vmatprep.subr.bf16.mxu1 %v6670_v26 }
 0x964   :  { %6673 = vmatpush3.bf16.msra.mxu1 %v6670_v26 }
 0x965   :  { %6675 = vmatprep.subr.bf16.mxu1 %v6674_v57 }
 0xa32   :  { %v6443_v28 = vpop.f32.mrb[10].mxu1 }
 0xa33   :  { %v1448_v29 = vadd.f32 %v6443_v28, %v6142_v27  ;;  %v1442_v30 = vpop.f32.mrb[11].mxu1 }
 0xa34   :  { %v1443_v31 = vadd.f32 %v6142_v27, %v1442_v30 }
 0xa35   :  { %v1452_v33 = vmax.f32 %v1448_v29, 0.0 }
 0xa36   :  { %v1451_v32 = vmax.f32 %v1443_v31, 0.0 }
 0xa38   :  { %6452 = vmatprep.mubr.msk.f32.mxu1 %vm469_vm1, %v1451_v32 }
 0xa39   :  { %6453 = vmatmul.mubr.msk.f32.vlgmr.msra.gmra.mrb[12].mxu1 %vm469_vm1, %v1452_v33 }
 0xa3a   :  { %6677 = vmatpush3.bf16.msra.mxu1 %v6674_v57 }
 0xa3b   :  { %6679 = vmatprep.subr.bf16.mxu1 %v6678_v59 }
 0xa3e   :  { %6681 = vmatpush3.bf16.msra.mxu1 %v6678_v59 }
 0xa3f   :  { %6466 = vmatprep.subr.mxu1 %v8082_v20 }
 0xb0c   :  { %v6454_v36 = vpop.f32.mrb[12].mxu1 }
 0xb0d   :  { %v1542_v37 = vadd.f32 %v6454_v36, %v6145_v35  ;;  %v1536_v38 = vpop.f32.mrb[13].mxu1 }
 0xb0e   :  { %v1537_v39 = vadd.f32 %v6145_v35, %v1536_v38 }
 0xb0f   :  { %v1546_v40 = vadd.f32 %v1542_v37, %v1358_v23 }
 0xb10   :  { %v1545_v41 = vadd.f32 %v1537_v39, %v1357_v21 }
 0xb11   :  { %v1552_v42 = vsel %vm469_vm1, %v1546_v40, 0.0 }
 0xb12   :  { %1553 = vadd.xlane.f32.xlu0 %v1552_v42  ;;  %v1549_v43 = vsel %vm469_vm1, %v1545_v41, 0.0 }
 0xb13   :  { %1550 = vadd.xlane.f32.xlu1 %v1549_v43 }
 0xb9f   :  { %v1554_v44 = vpop.xlane.xlu0 %1553 }
 0xba0   :  { %v1556_v45 = vmul.f32 0.03125, %v1554_v44  ;;  %v1551_v46 = vpop.xlane.xlu1 %1550 }
 0xba1   :  { %v1555_v47 = vmul.f32 0.03125, %v1551_v46 }
 0xba2   :  { %v1558_v48 = vsub.f32 %v1546_v40, %v1556_v45 }
 0xba3   :  { %v1557_v49 = vsub.f32 %v1545_v41, %v1555_v47 }
 0xba4   :  { %v1560_v50 = vmul.f32 %v1558_v48, %v1558_v48 }
 0xba5   :  { %v1559_v51 = vmul.f32 %v1557_v49, %v1557_v49 }
 0xba6   :  { %v1564_v52 = vsel %vm469_vm1, %v1560_v50, 0.0 }
 0xba7   :  { %1565 = vadd.xlane.f32.xlu0 %v1564_v52  ;;  %v1561_v53 = vsel %vm469_vm1, %v1559_v51, 0.0 }
 0xba8   :  { %1562 = vadd.xlane.f32.xlu1 %v1561_v53 }
 0xc34   :  { %v1566_v60 = vpop.xlane.xlu0 %1565 }
 0xc35   :  { %v1568_v19 = vmul.f32 0.03125, %v1566_v60  ;;  %v1563_v18 = vpop.xlane.xlu1 %1562 }
 0xc36   :  { %v1567_v61 = vmul.f32 0.03125, %v1563_v18 }
 0xc37   :  { %v1570_v62 = vadd.f32 1e-05, %v1568_v19 }
 0xc38   :  { %v1569_v63 = vadd.f32 1e-05, %v1567_v61 }
 0xc39   :  { %7343 = vrsqrt.f32 %v1570_v62 }
 0xc3a   :  { %7345 = vrsqrt.f32 %v1569_v63 }
 0xc43   :  { %v7344_v0 = vpop.eup %7343 }
 0xc44   :  { %v7346_v2 = vpop.eup %7345  ;;  %v1574_v3 = vmul.f32 %v7344_v0, %v1558_v48 }
 0xc45   :  { %v1573_v4 = vmul.f32 %v7346_v2, %v1557_v49 }
 0xc46   :  { %v1582_v6 = vmul.f32 %v6148_v1, %v1574_v3 }
 0xc47   :  { %v1581_v7 = vmul.f32 %v6148_v1, %v1573_v4 }
 0xc48   :  { %v8673_v9 = vadd.f32 %v6149_v5, %v1582_v6 }
 0xc49   :  { %v8671_v8 = vadd.f32 %v6149_v5, %v1581_v7 }
 0xc4b   :  { %6463 = vmatprep.mubr.msk.f32.mxu1 %vm469_vm1, %v8671_v8 }
 0xc4c   :  { %6464 = vmatmul.mubr.msk.f32.vlgmr.msra.gmra.mrb[14].mxu1 %vm469_vm1, %v8673_v9 }
 0xc4d   :  { %6468 = vmatprep.mubr.msk.f32.mxu1 %vm8083_vm2, %v8082_v20 }
 0xd1f   :  { %v6465_v11 = vpop.f32.mrb[14].mxu1 }
 0xd20   :  { %v1676_v12 = vpop.f32.mrb[15].mxu1  ;;  %v8687_v14 = vadd.f32 %v6465_v11, %v6154_v10 }
 0xd21   :  { %v8681_v13 = vadd.f32 %v6154_v10, %v1676_v12  ;;  %v2354_v12 = vld [vmem:[#allocation11 + $0x20] sm:$0xff] }
 0xd23   :  { %1762 = vrot.lane.b32.xlu0 %v8681_v13, %s8084_s0  ;;  %1764 = vrot.lane.b32.xlu1 %v8681_v13, %s8086_s15 }
 0xd27   :  { %1686 = vrot.lane.b32.xlu0 %v8681_v13, %s8085_s10  ;;  %1919 = vrot.lane.b32.xlu1 %v8687_v14, %s8086_s15 }
 0xd2b   :  { %1917 = vrot.lane.b32.xlu1 %v8687_v14, %s8084_s0 }
 0xd2f   :  { %1841 = vrot.lane.b32.xlu1 %v8687_v14, %s8085_s10 }
 0xd95   :  { %v1763_v15 = vpop.permute.xlu0 %1762  ;;  %v1765_v16 = vpop.permute.xlu1 %1764 }
 0xd96   :  { %6472 = vmatpush3.xpose.msk.msra.mxu0 %vm371_vm0, %v1765_v16  ;;  %v2357_v16 = vld [vmem:[#allocation11 + $0x38] sm:$0xff] }
 0xd97   :  { %6481 = vmatprep.subr.mxu0 %v8082_v20 }
 0xd99   :  { %v1687_v17 = vpop.permute.xlu0 %1686  ;;  %6474 = vmatmul.mubr.msk.f32.vlgmr.msra.gmra.mrb[12].mxu0 %vm371_vm0, %v1763_v15  ;;  %v1920_v21 = vpop.permute.xlu1 %1919  ;;  %v2356_v15 = vld [vmem:[#allocation11 + $0x30] sm:$0xff] }
 0xd9a   :  { %6467 = vmatpush3.xpose.msk.msra.mxu1 %vm371_vm0, %v1687_v17  ;;  %6482 = vmatpush3.xpose.msk.msra.mxu0 %vm371_vm0, %v1920_v21  ;;  %v6686_v17 = vpack.c.bf16 %v2357_v16, %v2356_v15 }
 0xd9b   :  { %6483 = vmatprep.mubr.msk.f32.mxu0 %vm8083_vm2, %v8082_v20  ;;  %6476 = vmatprep.subr.mxu1 %v8082_v20 }
 0xd9c   :  { %6491 = vmatprep.subr.mxu0 %v8082_v20 }
 0xd9d   :  { %6469 = vmatmul.mubr.msk.f32.vlgmr.msra.gmra.mrb[16].mxu1 %vm371_vm0, %v8681_v13  ;;  %v1918_v22 = vpop.permute.xlu1 %1917 }
 0xd9e   :  { %6484 = vmatmul.mubr.msk.f32.vlgmr.msra.gmra.mrb[14].mxu0 %vm371_vm0, %v1918_v22  ;;  %6478 = vmatprep.mubr.msk.f32.mxu1 %vm8083_vm2, %v8082_v20 }
 0xd9f   :  { %6493 = vmatprep.mubr.msk.f32.mxu0 %vm8083_vm2, %v8082_v20 }
 0xda1   :  { %v1842_v23 = vpop.permute.xlu1 %1841 }
 0xda2   :  { %6477 = vmatpush3.xpose.msk.msra.mxu1 %vm371_vm0, %v1842_v23 }
 0xda3   :  { %6486 = vmatprep.subr.mxu1 %v8082_v20 }
 0xda5   :  { %6479 = vmatmul.mubr.msk.f32.vlgmr.msra.gmra.mrb[18].mxu1 %vm371_vm0, %v8687_v14 }
 0xda6   :  { %6488 = vmatprep.mubr.msk.f32.mxu1 %vm8083_vm2, %v8082_v20 }
 0xe6c   :  { %v1836_v24 = vpop.f32.mrb[12].mxu0 }
 0xe6d   :  { %v1837_v25 = vadd.f32 %v1836_v24, %v8603_v34  ;;  %v6475_v26 = vpop.f32.mrb[13].mxu0 }
 0xe6f   :  { %v1998_v27 = vsel %vm861_vm3, %v1837_v25, -inf }
 0xe70   :  { %v1758_v28 = vpop.f32.mrb[16].mxu1  ;;  %1999 = vmax.xlane.f32.xlu0 %v1998_v27 }
 0xe71   :  { %v1759_v29 = vadd.f32 %v1758_v28, %v8603_v34  ;;  %v6470_v30 = vpop.f32.mrb[17].mxu1  ;;  %v1991_v31 = vpop.f32.mrb[14].mxu0 }
 0xe72   :  { %v1992_v32 = vadd.f32 %v1991_v31, %v8603_v34  ;;  %v6485_v33 = vpop.f32.mrb[15].mxu0 }
 0xe73   :  { %v1995_v35 = vsel %vm861_vm3, %v1759_v29, -inf  ;;  %v6169_v33 = vld [vmem:[#allocation13 + $0x1] ss:$0 sm:$0xff] }
 0xe74   :  { %1996 = vmax.xlane.f32.xlu0 %v1995_v35  ;;  %v2004_v36 = vsel %vm861_vm3, %v1992_v32, -inf }
 0xe75   :  { %2005 = vmax.xlane.f32.xlu1 %v2004_v36 }
 0xe78   :  { %v1913_v37 = vpop.f32.mrb[18].mxu1 }
 0xe79   :  { %v1914_v38 = vadd.f32 %v1913_v37, %v8603_v34  ;;  %v6480_v39 = vpop.f32.mrb[19].mxu1 }
 0xe7b   :  { %v2001_v40 = vsel %vm861_vm3, %v1914_v38, -inf }
 0xe7c   :  { %2002 = vmax.xlane.f32.xlu0 %v2001_v40 }
 0xefd   :  { %v2000_v41 = vpop.xlane.xlu0 %1999 }
 0xefe   :  { %v2008_v42 = vsub.f32 %v1837_v25, %v2000_v41 }
 0xf00   :  { %v2013_v43 = vmul.f32 1.442695, %v2008_v42 }
 0xf01   :  { %v1997_v34 = vpop.xlane.xlu0 %1996 }
 0xf02   :  { %7347 = vpow2.f32 %v2013_v43  ;;  %v2006_v44 = vpop.xlane.xlu1 %2005  ;;  %v2007_v51 = vsub.f32 %v1759_v29, %v1997_v34 }
 0xf03   :  { %v2010_v45 = vsub.f32 %v1992_v32, %v2006_v44 }
 0xf04   :  { %v2011_v53 = vmul.f32 1.442695, %v2007_v51  ;;  %v2497_v51 = vld [vmem:[#allocation17 + $0x28] sm:$0xff] }
 0xf05   :  { %v2017_v46 = vmul.f32 1.442695, %v2010_v45 }
 0xf07   :  { %7349 = vpow2.f32 %v2017_v46 }
 0xf08   :  { %7351 = vpow2.f32 %v2011_v53 }
 0xf09   :  { %v2003_v52 = vpop.xlane.xlu0 %2002 }
 0xf0a   :  { %v2009_v54 = vsub.f32 %v1914_v38, %v2003_v52  ;;  %v2498_v52 = vld [vmem:[#allocation17 + $0x30] sm:$0xff] }
 0xf0c   :  { %v7348_v47 = vpop.eup %7347  ;;  %v2015_v55 = vmul.f32 1.442695, %v2009_v54  ;;  %v2499_v54 = vld [vmem:[#allocation17 + $0x38] sm:$0xff] }
 0xf0d   :  { %v2022_v48 = vsel %vm861_vm3, %v7348_v47, 0.0 }
 0xf0e   :  { %2023 = vadd.xlane.f32.xlu1 %v2022_v48  ;;  %7353 = vpow2.f32 %v2015_v55  ;;  %v6694_v55 = vpack.c.bf16 %v2499_v54, %v2498_v52  ;;  %v2871_v52 = vld [vmem:[#allocation28 + $0x90] sm:$0xff]  ;;  %v2878_v54 = vld [vmem:[#allocation28 + $0xc8] sm:$0xff] }
 0xf11   :  { %v7350_v49 = vpop.eup %7349 }
 0xf12   :  { %v2028_v50 = vsel %vm861_vm3, %v7350_v49, 0.0  ;;  %v7352_v56 = vpop.eup %7351 }
 0xf13   :  { %2029 = vadd.xlane.f32.xlu0 %v2028_v50  ;;  %v2019_v57 = vsel %vm861_vm3, %v7352_v56, 0.0 }
 0xf18   :  { %v7354_v58 = vpop.eup %7353 }
 0xf19   :  { %v2025_v59 = vsel %vm861_vm3, %v7354_v58, 0.0 }
 0xf1f   :  { %2115 = vrot.lane.b32.xlu1 %v8681_v13, %s8087_s2 }
 0xf29   :  { %2272 = vrot.lane.b32.xlu0 %v8687_v14, %s8087_s2  ;;  %s8093_s2 = smov 40  }
 0xf43   :  { %2020 = vadd.xlane.f32.xlu1 %v2019_v57  ;;  %v2593_v57 = vld [vmem:[#allocation20 + $0x28] sm:$0xff] }
 0xf48   :  { %2026 = vadd.xlane.f32.xlu0 %v2025_v59 }
 0xf54   :  { %2039 = vrot.lane.b32.xlu1 %v8681_v13, %s8088_s29  ;;  %v2355_v13 = vld [vmem:[#allocation11 + $0x28] sm:$0xff] }
 0xf5e   :  { %2196 = vrot.lane.b32.xlu0 %v8687_v14, %s8088_s29  ;;  %v6682_v14 = vpack.c.bf16 %v2355_v13, %v2354_v12  ;;  %v2595_v12 = vld [vmem:[#allocation20 + $0x38] sm:$0xff] }
 0xf9b   :  { %v2024_v60 = vpop.xlane.xlu1 %2023 }
 0xf9c   :  { %7355 = vrcp.f32 %v2024_v60 }
 0xf9f   :  { %v2116_v19 = vpop.permute.xlu1 %2115 }
 0xfa0   :  { %v2030_v18 = vpop.xlane.xlu0 %2029  ;;  %6492 = vmatpush3.msra.mxu0 %v2116_v19 }
 0xfa1   :  { %7357 = vrcp.f32 %v2030_v18  ;;  %6501 = vmatprep.subr.mxu0 %v8082_v20 }
 0xfa4   :  { %v2273_v63 = vpop.permute.xlu0 %2272 }
 0xfa6   :  { %v7356_v61 = vpop.eup %7355 }
 0xfa7   :  { %v2036_v62 = vmul.f32 %v7356_v61, %v7348_v47 }
 0xfa9   :  { %6494 = vmatmul.mubr.msk.f32.vlgmr.msra.gmra.mrb[16].mxu0 %vm861_vm3, %v2036_v62 }
 0xfaa   :  { %6502 = vmatpush3.msra.mxu0 %v2273_v63  ;;  %6503 = vmatprep.mubr.msk.f32.mxu0 %vm8083_vm2, %v8082_v20 }
 0xfab   :  { %v7358_v0 = vpop.eup %7357 }
 0xfac   :  { %v2038_v1 = vmul.f32 %v7358_v0, %v7350_v49  ;;  %v6172_v0 = vld [vmem:[#allocation14 + $0x1] ss:$0 sm:$0xff] }
 0xfae   :  { %6504 = vmatmul.mubr.msk.f32.vlgmr.msra.gmra.mrb[18].mxu0 %vm861_vm3, %v2038_v1 }
 0xfd0   :  { %v2021_v2 = vpop.xlane.xlu1 %2020 }
 0xfd1   :  { %7359 = vrcp.f32 %v2021_v2  ;;  %v6173_v2 = vld [vmem:[#allocation16 + $0x1] ss:$0 sm:$0xff] }
 0xfd4   :  { %v2040_v3 = vpop.permute.xlu1 %2039 }
 0xfd5   :  { %v2027_v4 = vpop.xlane.xlu0 %2026  ;;  %6487 = vmatpush3.msra.mxu1 %v2040_v3 }
 0xfd6   :  { %7361 = vrcp.f32 %v2027_v4  ;;  %6496 = vmatprep.subr.mxu1 %v8082_v20 }
 0xfd9   :  { %v2197_v7 = vpop.permute.xlu0 %2196 }
 0xfdb   :  { %v7360_v5 = vpop.eup %7359 }
 0xfdc   :  { %v2035_v6 = vmul.f32 %v7360_v5, %v7352_v56  ;;  %v2592_v56 = vld [vmem:[#allocation20 + $0x20] sm:$0xff] }
 0xfde   :  { %6489 = vmatmul.mubr.msk.f32.vlgmr.msra.gmra.mrb[20].mxu1 %vm861_vm3, %v2035_v6 }
 0xfdf   :  { %6497 = vmatpush3.msra.mxu1 %v2197_v7  ;;  %6498 = vmatprep.mubr.msk.f32.mxu1 %vm8083_vm2, %v8082_v20 }
 0xfe0   :  { %v7362_v10 = vpop.eup %7361  ;;  %6683 = vmatprep.subr.bf16.mxu1 %v6682_v14 }
 0xfe1   :  { %v2037_v11 = vmul.f32 %v7362_v10, %v7354_v58  ;;  %v6698_v58 = vpack.c.bf16 %v2593_v57, %v2592_v56 }
 0xfe3   :  { %6499 = vmatmul.mubr.msk.f32.vlgmr.msra.gmra.mrb[22].mxu1 %vm861_vm3, %v2037_v11  ;;  %v2594_v11 = vld [vmem:[#allocation20 + $0x30] sm:$0xff] }
 0xfe4   :  { %6685 = vmatpush3.bf16.msra.mxu1 %v6682_v14  ;;  %v6702_v13 = vpack.c.bf16 %v2595_v12, %v2594_v11  ;;  %v6174_v14 = vld [vmem:[#allocation19 + $0x1] ss:$0 sm:$0xff]  ;;  %v2895_v12 = vld [vmem:[#allocation28 + $0x150] sm:$0xff] }
 0xfe5   :  { %6687 = vmatprep.subr.bf16.mxu1 %v6686_v17 }
 0xfe8   :  { %6689 = vmatpush3.bf16.msra.mxu1 %v6686_v17 }
 0xfe9   :  { %6699 = vmatprep.subr.bf16.mxu1 %v6698_v58 }
0x107c   :  { %v2187_v21 = vpop.f32.mrb[16].mxu0 }
0x107d   :  { %2192 = vrot.lane.b32.xlu1 %v2187_v21, %s8062_s4  ;;  %v6495_v22 = vpop.f32.mrb[17].mxu0 }
0x1081   :  { %v2344_v23 = vpop.f32.mrb[18].mxu0 }
0x1082   :  { %2349 = vrot.lane.b32.xlu1 %v2344_v23, %s8062_s4  ;;  %v6505_v24 = vpop.f32.mrb[19].mxu0 }
0x1083   :  { %v6177_v24 = vld [vmem:[#allocation22 + $0x1] ss:$0 sm:$0xff] }
0x10b1   :  { %v2111_v25 = vpop.f32.mrb[20].mxu1 }
0x10b2   :  { %v6490_v26 = vpop.f32.mrb[21].mxu1 }
0x10b6   :  { %v2268_v27 = vpop.f32.mrb[22].mxu1 }
0x10b7   :  { %v6500_v28 = vpop.f32.mrb[23].mxu1 }
0x10ef   :  { %v2193_v29 = vpop.permute.xlu1 %2192 }
0x10f0   :  { %v2195_v30 = vsel %vm371_vm0, %v2111_v25, %v2193_v29 }
0x10f1   :  { %6514 = vmatprep.mubr.msk.f32.mxu1 %vm469_vm1, %v2195_v30 }
0x10f4   :  { %v2350_v31 = vpop.permute.xlu1 %2349 }
0x10f5   :  { %v2352_v32 = vsel %vm371_vm0, %v2268_v27, %v2350_v31 }
0x10f6   :  { %6515 = vmatmul.mubr.msk.f32.vlgmr.msra.gmra.mrb[24].mxu1 %vm469_vm1, %v2352_v32 }
0x10f7   :  { %6701 = vmatpush3.bf16.msra.mxu1 %v6698_v58  ;;  %v2877_v58 = vld [vmem:[#allocation28 + $0xc0] sm:$0xff] }
0x10f8   :  { %6703 = vmatprep.subr.bf16.mxu1 %v6702_v13 }
0x10fb   :  { %6705 = vmatpush3.bf16.msra.mxu1 %v6702_v13  ;;  %v2898_v13 = vld [vmem:[#allocation28 + $0x168] sm:$0xff] }
0x11c9   :  { %v6516_v35 = vpop.f32.mrb[24].mxu1 }
0x11ca   :  { %v2444_v36 = vadd.f32 %v6516_v35, %v6169_v33  ;;  %v2438_v37 = vpop.f32.mrb[25].mxu1  ;;  %v2857_v35 = vld [vmem:[#allocation28 + $0x20] sm:$0xff] }
0x11cb   :  { %v2439_v38 = vadd.f32 %v6169_v33, %v2438_v37  ;;  %v2854_v33 = vld [vmem:[#allocation28 + $0x8] sm:$0xff]  ;;  %v2853_v37 = vld [vmem:[#allocation28] sm:$0xff] }
0x11cc   :  { %v2448_v39 = vadd.f32 %v2444_v36, %v8673_v9  ;;  %v8773_v36 = vpack.c.bf16 %v2857_v35, %v2854_v33  ;;  %v2904_v33 = vld [vmem:[#allocation28 + $0x198] sm:$0xff] }
0x11cd   :  { %v2447_v40 = vadd.f32 %v2439_v38, %v8671_v8  ;;  %v2496_v8 = vld [vmem:[#allocation17 + $0x20] sm:$0xff]  ;;  %v2856_v38 = vld [vmem:[#allocation28 + $0x18] sm:$0xff] }
0x11ce   :  { %v2456_v41 = vsel %vm469_vm1, %v2448_v39, 0.0  ;;  %v6690_v53 = vpack.c.bf16 %v2497_v51, %v2496_v8  ;;  %6715 = vmatprep.subr.bf16.mxu1 %v8773_v36 }
0x11cf   :  { %2457 = vadd.xlane.f32.xlu1 %v2456_v41  ;;  %v2453_v42 = vsel %vm469_vm1, %v2447_v40, 0.0  ;;  %v2863_v41 = vld [vmem:[#allocation28 + $0x50] sm:$0xff] }
0x11d0   :  { %2454 = vadd.xlane.f32.xlu0 %v2453_v42  ;;  %6691 = vmatprep.subr.bf16.mxu0 %v6690_v53  ;;  %v2859_v42 = vld [vmem:[#allocation28 + $0x30] sm:$0xff] }
0x11d1   :  { %6693 = vmatpush3.bf16.msra.mxu0 %v6690_v53  ;;  %v2874_v53 = vld [vmem:[#allocation28 + $0xa8] sm:$0xff] }
0x11d2   :  { %6695 = vmatprep.subr.bf16.mxu0 %v6694_v55  ;;  %v8793_v56 = vpack.c.bf16 %v2874_v53, %v2871_v52  ;;  %v2735_v52 = vld [vmem:[#allocation32 + $0x10] sm:$0xff] }
0x11d5   :  { %6697 = vmatpush3.bf16.msra.mxu0 %v6694_v55  ;;  %v2881_v55 = vld [vmem:[#allocation28 + $0xe0] sm:$0xff] }
0x11d6   :  { %v8796_v57 = vpack.c.bf16 %v2881_v55, %v2878_v54  ;;  %v2736_v54 = vld [vmem:[#allocation32 + $0x18] sm:$0xff] }
0x11d7   :  { %v6710_v55 = vpack.c.bf16 %v2736_v54, %v2735_v52  ;;  %v2882_v52 = vld [vmem:[#allocation28 + $0xe8] sm:$0xff]  ;;  %v2885_v54 = vld [vmem:[#allocation28 + $0x100] sm:$0xff] }
0x125c   :  { %v2458_v43 = vpop.xlane.xlu1 %2457 }
0x125d   :  { %v2460_v44 = vmul.f32 0.03125, %v2458_v43  ;;  %v2455_v45 = vpop.xlane.xlu0 %2454  ;;  %v2862_v43 = vld [vmem:[#allocation28 + $0x48] sm:$0xff] }
0x125e   :  { %v2459_v46 = vmul.f32 0.03125, %v2455_v45  ;;  %v2866_v45 = vld [vmem:[#allocation28 + $0x68] sm:$0xff] }
0x125f   :  { %v2462_v47 = vsub.f32 %v2448_v39, %v2460_v44  ;;  %v2860_v39 = vld [vmem:[#allocation28 + $0x38] sm:$0xff] }
0x1260   :  { %v2461_v48 = vsub.f32 %v2447_v40, %v2459_v46  ;;  %v8775_v40 = vpack.c.bf16 %v2856_v38, %v2853_v37  ;;  %v8778_v44 = vpack.c.bf16 %v2863_v41, %v2860_v39  ;;  %v2869_v46 = vld [vmem:[#allocation28 + $0x80] sm:$0xff]  ;;  %v2908_v37 = vld [vmem:[#allocation28 + $0x1b8] sm:$0xff]  ;;  %v2911_v38 = vld [vmem:[#allocation28 + $0x1d0] sm:$0xff] }
0x1261   :  { %v2464_v34 = vmul.f32 %v2462_v47, %v2462_v47  ;;  %v8842_v39 = vpack.c.bf16 %v2911_v38, %v2908_v37  ;;  %v2907_v41 = vld [vmem:[#allocation28 + $0x1b0] sm:$0xff]  ;;  %v2861_v37 = vld [vmem:[#allocation28 + $0x40] sm:$0xff]  ;;  %v2864_v38 = vld [vmem:[#allocation28 + $0x58] sm:$0xff] }
0x1262   :  { %v2463_v49 = vmul.f32 %v2461_v48, %v2461_v48 }
0x1263   :  { %v2468_v9 = vsel %vm469_vm1, %v2464_v34, 0.0  ;;  %v2872_v34 = vld [vmem:[#allocation28 + $0x98] sm:$0xff] }
0x1264   :  { %v2465_v50 = vsel %vm469_vm1, %v2463_v49, 0.0  ;;  %v2865_v49 = vld [vmem:[#allocation28 + $0x60] sm:$0xff] }
0x1265   :  { %2466 = vadd.xlane.f32.xlu0 %v2465_v50  ;;  %v2868_v50 = vld [vmem:[#allocation28 + $0x78] sm:$0xff] }
0x1266   :  { %v8787_v8 = vpack.c.bf16 %v2868_v50, %v2865_v49  ;;  %v8856_v49 = vld [vmem:[#allocation28 + $0x1e8] sm:$0xff]  ;;  %v8858_v50 = vld [vmem:[#allocation28 + $0x1e0] sm:$0xff] }
0x1269   :  { %2469 = vadd.xlane.f32.xlu0 %v2468_v9  ;;  %v2875_v9 = vld [vmem:[#allocation28 + $0xb0] sm:$0xff] }
0x126a   :  { %v8790_v51 = vpack.c.bf16 %v2875_v9, %v2872_v34  ;;  %v2733_v34 = vld [vmem:[#allocation32] sm:$0xff]  ;;  %v2734_v9 = vld [vmem:[#allocation32 + $0x8] sm:$0xff] }
0x126b   :  { %v6706_v53 = vpack.c.bf16 %v2734_v9, %v2733_v34  ;;  %v2879_v9 = vld [vmem:[#allocation28 + $0xd0] sm:$0xff] }
0x126d   :  { %6707 = vmatprep.subr.bf16.mxu0 %v6706_v53 }
0x12f2   :  { %v2467_v59 = vpop.xlane.xlu0 %2466 }
0x12f3   :  { %v2471_v60 = vmul.f32 0.03125, %v2467_v59  ;;  %v2880_v59 = vld [vmem:[#allocation28 + $0xd8] sm:$0xff] }
0x12f5   :  { %v2473_v19 = vadd.f32 1e-05, %v2471_v60  ;;  %v2884_v60 = vld [vmem:[#allocation28 + $0xf8] sm:$0xff] }
0x12f6   :  { %v2470_v18 = vpop.xlane.xlu0 %2469 }
0x12f7   :  { %7363 = vrsqrt.f32 %v2473_v19  ;;  %v2472_v61 = vmul.f32 0.03125, %v2470_v18  ;;  %v2887_v19 = vld [vmem:[#allocation28 + $0x110] sm:$0xff]  ;;  %v8799_v18 = vpack.c.bf16 %v2880_v59, %v2877_v58  ;;  %v8091_v58 = vmov 0.0|0.0  }
0x12f9   :  { %v2474_v62 = vadd.f32 1e-05, %v2472_v61  ;;  %v8802_v61 = vpack.c.bf16 %v2887_v19, %v2884_v60 }
0x12fb   :  { %7365 = vrsqrt.f32 %v2474_v62  ;;  %v2883_v62 = vld [vmem:[#allocation28 + $0xf0] sm:$0xff] }
0x1301   :  { %v7364_v63 = vpop.eup %7363 }
0x1302   :  { %v2477_v1 = vmul.f32 %v7364_v63, %v2461_v48  ;;  %v8784_v48 = vpack.c.bf16 %v2869_v46, %v2866_v45  ;;  %v2886_v63 = vld [vmem:[#allocation28 + $0x108] sm:$0xff]  ;;  %v6186_v45 = vld [vmem:[%s9743_s19 + $0x4] sm:$0x3] }
0x1304   :  { %v2485_v3 = vmul.f32 %v6172_v0, %v2477_v1  ;;  %v2893_v1 = vld [vmem:[#allocation28 + $0x140] sm:$0xff] }
0x1305   :  { %v7366_v4 = vpop.eup %7365 }
0x1306   :  { %v2478_v5 = vmul.f32 %v7366_v4, %v2462_v47  ;;  %v2493_v6 = vadd.f32 %v6173_v2, %v2485_v3  ;;  %v8781_v47 = vpack.c.bf16 %v2862_v43, %v2859_v42  ;;  %v2889_v4 = vld [vmem:[#allocation28 + $0x120] sm:$0xff]  ;;  %v2910_v42 = vld [vmem:[#allocation28 + $0x1c8] sm:$0xff]  ;;  %v6185_v43 = vld [vmem:[%s9743_s19 + $0x2] sm:$0x3] }
0x1307   :  { %v8850_v46 = vpack.c.bf16 %v2910_v42, %v2907_v41  ;;  %v2870_v41 = vld [vmem:[#allocation28 + $0x88] sm:$0xff] }
0x1308   :  { %v2486_v7 = vmul.f32 %v6172_v0, %v2478_v5  ;;  %6525 = vmatprep.mubr.msk.f32.mxu0 %vm469_vm1, %v2493_v6  ;;  %v2890_v0 = vld [vmem:[#allocation28 + $0x128] sm:$0xff]  ;;  %v2892_v5 = vld [vmem:[#allocation28 + $0x138] sm:$0xff] }
0x1309   :  { %v8808_v3 = vpack.c.bf16 %v2893_v1, %v2890_v0  ;;  %v2835_v0 = vld [vmem:[%s9789_s9] sm:$0x3] }
0x130a   :  { %v2494_v10 = vadd.f32 %v6173_v2, %v2486_v7  ;;  %v8805_v2 = vpack.c.bf16 %v2886_v63, %v2883_v62  ;;  %v2899_v7 = vld [vmem:[#allocation28 + $0x170] sm:$0xff] }
0x130c   :  { %6526 = vmatmul.mubr.msk.f32.vlgmr.msra.gmra.mrb[20].mxu0 %vm469_vm1, %v2494_v10 }
0x130d   :  { %6709 = vmatpush3.bf16.msra.mxu0 %v6706_v53  ;;  %v8896_v53 = vpack.c.bf16 %v2882_v52, %v2879_v9 }
0x130e   :  { %6711 = vmatprep.subr.bf16.mxu0 %v6710_v55 }
0x1311   :  { %6713 = vmatpush3.bf16.msra.mxu0 %v6710_v55  ;;  %v2888_v55 = vld [vmem:[#allocation28 + $0x118] sm:$0xff] }
0x1312   :  { %6754 = vmatprep.subr.bf16.mxu0 %v8091_v58 }
0x13df   :  { %v6527_v15 = vpop.f32.mrb[20].mxu0 }
0x13e0   :  { %v2586_v16 = vadd.f32 %v6527_v15, %v6174_v14  ;;  %v2580_v17 = vpop.f32.mrb[21].mxu0 }
0x13e1   :  { %v2581_v21 = vadd.f32 %v6174_v14, %v2580_v17  ;;  %v8817_v14 = vpack.c.bf16 %v2898_v13, %v2895_v12 }
0x13e2   :  { %v2590_v23 = vmax.f32 %v2586_v16, 0.0 }
0x13e3   :  { %v2589_v22 = vmax.f32 %v2581_v21, 0.0 }
0x13e5   :  { %6536 = vmatprep.mubr.msk.f32.mxu1 %vm469_vm1, %v2589_v22 }
0x13e6   :  { %6537 = vmatmul.mubr.msk.f32.vlgmr.msra.gmra.mrb[26].mxu1 %vm469_vm1, %v2590_v23 }
0x13e7   :  { %6717 = vmatpush1.bf16.msra.mxu1 %v8775_v40 }
0x13e8   :  { %6719 = vmatprep.subr.bf16.mxu1 %v8778_v44 }
0x13eb   :  { %6721 = vmatpush1.bf16.msra.mxu1 %v8781_v47 }
0x13ec   :  { %6723 = vmatprep.subr.bf16.mxu1 %v8784_v48 }
0x13ef   :  { %6725 = vmatpush1.bf16.msra.mxu1 %v8787_v8 }
0x13f0   :  { %6727 = vmatprep.subr.bf16.mxu1 %v8790_v51 }
0x13f3   :  { %6729 = vmatpush1.bf16.msra.mxu1 %v8793_v56 }
0x13f4   :  { %6731 = vmatprep.subr.bf16.mxu1 %v8796_v57 }
0x13f7   :  { %6733 = vmatpush1.bf16.msra.mxu1 %v8799_v18 }
0x13f8   :  { %6735 = vmatprep.subr.bf16.mxu1 %v8802_v61 }
0x13fb   :  { %6737 = vmatpush1.bf16.msra.mxu1 %v8805_v2 }
0x13fc   :  { %6739 = vmatprep.subr.bf16.mxu1 %v8808_v3 }
0x14b9   :  { %v6538_v25 = vpop.f32.mrb[26].mxu1 }
0x14ba   :  { %v2682_v26 = vadd.f32 %v6538_v25, %v6177_v24  ;;  %v2676_v27 = vpop.f32.mrb[27].mxu1 }
0x14bb   :  { %v2677_v28 = vadd.f32 %v6177_v24, %v2676_v27 }
0x14bc   :  { %v8765_v29 = vadd.f32 %v2682_v26, %v2494_v10  ;;  %v8811_v10 = vpack.c.bf16 %v2892_v5, %v2889_v4 }
0x14bd   :  { %v8767_v30 = vadd.f32 %v2677_v28, %v2493_v6  ;;  %v2896_v6 = vld [vmem:[#allocation28 + $0x158] sm:$0xff]  ;;  %v2902_v28 = vld [vmem:[#allocation28 + $0x188] sm:$0xff] }
0x14be   :  { %v2694_v31 = vsel %vm469_vm1, %v8765_v29, 0.0  ;;  %v8814_v11 = vpack.c.bf16 %v2899_v7, %v2896_v6  ;;  %6741 = vmatpush1.bf16.msra.mxu1 %v8811_v10 }
0x14bf   :  { %2695 = vadd.xlane.f32.xlu0 %v2694_v31  ;;  %v2691_v32 = vsel %vm469_vm1, %v8767_v30, 0.0  ;;  %v2905_v31 = vld [vmem:[#allocation28 + $0x1a0] sm:$0xff] }
0x14c0   :  { %2692 = vadd.xlane.f32.xlu1 %v2691_v32  ;;  %6743 = vmatprep.subr.bf16.mxu1 %v8814_v11  ;;  %v8833_v32 = vpack.c.bf16 %v2905_v31, %v2902_v28  ;;  %v2858_v28 = vld [vmem:[#allocation28 + $0x28] sm:$0xff] }
0x14c2   :  { %6745 = vmatpush1.bf16.msra.mxu1 %v8817_v14 }
0x14c3   :  { %6747 = vmatprep.subr.bf16.mxu1 %v8833_v32 }
0x154c   :  { %v2696_v15 = vpop.xlane.xlu0 %2695 }
0x154d   :  { %v2698_v16 = vmul.f32 0.03125, %v2696_v15  ;;  %v2693_v17 = vpop.xlane.xlu1 %2692 }
0x154e   :  { %v2697_v21 = vmul.f32 0.03125, %v2693_v17 }
0x154f   :  { %v8822_v22 = vsub.f32 %v8765_v29, %v2698_v16  ;;  %v2901_v29 = vld [vmem:[#allocation28 + $0x180] sm:$0xff]  ;;  %v6180_v16 = vld [vmem:[#allocation23 + $0x1] ss:$0 sm:$0xff] }
0x1550   :  { %v8825_v23 = vsub.f32 %v8767_v30, %v2697_v21  ;;  %v2825_v30 = vld [vmem:[%s9743_s19] sm:$0x3]  ;;  %v8838_v35 = vpack.c.bf16 %v2904_v33, %v2901_v29 }
0x1551   :  { %v2702_v24 = vmul.f32 %v8822_v22, %v8822_v22 }
0x1552   :  { %v2701_v25 = vmul.f32 %v8825_v23, %v8825_v23  ;;  %6749 = vmatpush1.bf16.msra.mxu1 %v8838_v35 }
0x1553   :  { %v2706_v26 = vsel %vm469_vm1, %v2702_v24, 0.0  ;;  %6751 = vmatprep.subr.bf16.mxu1 %v8842_v39 }
0x1554   :  { %2707 = vadd.xlane.f32.xlu0 %v2706_v26  ;;  %v2703_v27 = vsel %vm469_vm1, %v2701_v25, 0.0  ;;  %v6181_v25 = vld [vmem:[#allocation25 + $0x1] ss:$0 sm:$0xff] }
0x1555   :  { %2704 = vadd.xlane.f32.xlu1 %v2703_v27  ;;  %v2855_v27 = vld [vmem:[#allocation28 + $0x10] sm:$0xff] }
0x1556   :  { %6753 = vmatpush1.bf16.msra.mxu1 %v8850_v46  ;;  %v8878_v33 = vpack.c.bf16 %v2858_v28, %v2855_v27 }
0x1557   :  { %2977 = vmatprep.subr.mxu1 %v8856_v49 }
0x155a   :  { %2978 = vmatpush1.msra.mxu1 %v8858_v50 }
0x155b   :  { %6784 = vmatprep.subr.bf16.mxu1 %v8091_v58 }
0x1566   :  { %2837 = vrot.lane.b32.xlu1 %v2825_v30, %s8089_s5 }
0x156a   :  { %2841 = vrot.lane.b32.xlu0 %v6185_v43, %s8090_s17  ;;  %2845 = vrot.lane.b32.xlu1 %v6186_v45, %s8059_s8  ;;  %v2873_v43 = vld [vmem:[#allocation28 + $0xa0] sm:$0xff]  ;;  %v2876_v45 = vld [vmem:[#allocation28 + $0xb8] sm:$0xff] }
0x156b   :  { %v8892_v34 = vpack.c.bf16 %v2876_v45, %v2873_v43 }
0x15e1   :  { %v2708_v59 = vpop.xlane.xlu0 %2707 }
0x15e2   :  { %v2710_v60 = vmul.f32 0.03125, %v2708_v59  ;;  %v2705_v19 = vpop.xlane.xlu1 %2704  ;;  %v8900_v59 = vpack.c.bf16 %v2888_v55, %v2885_v54 }
0x15e3   :  { %v2709_v62 = vmul.f32 0.03125, %v2705_v19  ;;  %v2894_v19 = vld [vmem:[#allocation28 + $0x148] sm:$0xff] }
0x15e4   :  { %v2712_v63 = vadd.f32 1e-05, %v2710_v60  ;;  %v2891_v60 = vld [vmem:[#allocation28 + $0x130] sm:$0xff] }
0x15e5   :  { %v2711_v1 = vadd.f32 1e-05, %v2709_v62  ;;  %v2842_v6 = vpop.permute.xlu0 %2841  ;;  %v8904_v62 = vpack.c.bf16 %v2894_v19, %v2891_v60 }
0x15e6   :  { %7367 = vrsqrt.f32 %v2712_v63  ;;  %v2838_v4 = vpop.permute.xlu1 %2837  ;;  %v2897_v63 = vld [vmem:[#allocation28 + $0x160] sm:$0xff] }
0x15e7   :  { %7369 = vrsqrt.f32 %v2711_v1  ;;  %v2849_v5 = vsel %vm2848_vm4, %v2835_v0, %v2838_v4  ;;  %v2900_v0 = vld [vmem:[#allocation28 + $0x178] sm:$0xff]  ;;  %v2903_v4 = vld [vmem:[#allocation28 + $0x190] sm:$0xff] }
0x15e8   :  { %v8869_v12 = vsel %vm2850_vm5, %v2849_v5, %v2842_v6  ;;  %v8908_v1 = vpack.c.bf16 %v2900_v0, %v2897_v63  ;;  %v2906_v5 = vld [vmem:[#allocation28 + $0x1a8] sm:$0xff] }
0x15ea   :  { %v2846_v7 = vpop.permute.xlu1 %2845 }
0x15eb   :  { %v2852_v13 = vsel %vm861_vm3, %v2842_v6, %v2846_v7  ;;  %v8912_v6 = vpack.c.bf16 %v2906_v5, %v2903_v4  ;;  %v2909_v7 = vld [vmem:[#allocation28 + $0x1c0] sm:$0xff] }
0x15ec   :  { %6189 = vmatprep.mubr.msk.f32.mxu1 %vm2933_vm6, %v2852_v13 }
0x15ed   :  { %3002 = vmatmul.mubr.f32.vlgmr.msra.gmra.mrb[28].mxu1 %v8869_v12 }
0x15ee   :  { %6558 = vmatprep.mubr.msk.f32.mxu1 %vm8083_vm2, %v8082_v20 }
0x15f0   :  { %v7368_v15 = vpop.eup %7367 }
0x15f1   :  { %v7370_v17 = vpop.eup %7369  ;;  %v2716_v21 = vmul.f32 %v7368_v15, %v8822_v22  ;;  %v8883_v22 = vpack.c.bf16 %v2864_v38, %v2861_v37 }
0x15f2   :  { %v2715_v24 = vmul.f32 %v7370_v17, %v8825_v23  ;;  %v2867_v23 = vld [vmem:[#allocation28 + $0x70] sm:$0xff] }
0x15f3   :  { %v2724_v26 = vmul.f32 %v6180_v16, %v2716_v21  ;;  %v8888_v42 = vpack.c.bf16 %v2870_v41, %v2867_v23 }
0x15f4   :  { %v2723_v31 = vmul.f32 %v6180_v16, %v2715_v24  ;;  %v8921_v16 = vld [vmem:[#allocation28 + $0x1f0] sm:$0xff] }
0x15f5   :  { %v2732_v30 = vadd.f32 %v6181_v25, %v2724_v26 }
0x15f6   :  { %v2731_v29 = vadd.f32 %v6181_v25, %v2723_v31 }
0x15f8   :  { %6547 = vmatprep.mubr.msk.f32.mxu0 %vm469_vm1, %v2731_v29  ;;  %v2830_v29 = vld [vmem:[%s9790_s24] sm:$0x3] }
0x15f9   :  { %6548 = vmatmul.mubr.msk.f32.vlgmr.msra.gmra.mrb[22].mxu0 %vm469_vm1, %v2732_v30 }
0x15fa   :  { %6756 = vmatpush1.bf16.msra.mxu0 %v8878_v33  ;;  %6190 = vmatprep.mubr.msk.f32.mxu0 %vm2933_vm6, %v2852_v13  ;;  %v2912_v13 = vld [vmem:[#allocation28 + $0x1d8] sm:$0xff] }
0x15fb   :  { %6757 = vmatprep.subr.bf16.mxu0 %v8091_v58  ;;  %v8916_v15 = vpack.c.bf16 %v2912_v13, %v2909_v7 }
0x15fe   :  { %6759 = vmatpush1.bf16.msra.mxu0 %v8883_v22 }
0x15ff   :  { %6760 = vmatprep.subr.bf16.mxu0 %v8091_v58 }
0x1602   :  { %6762 = vmatpush1.bf16.msra.mxu0 %v8888_v42 }
0x1603   :  { %6763 = vmatprep.subr.bf16.mxu0 %v8091_v58 }
0x1606   :  { %6765 = vmatpush1.bf16.msra.mxu0 %v8892_v34 }
0x1607   :  { %6766 = vmatprep.subr.bf16.mxu0 %v8091_v58 }
0x160a   :  { %6768 = vmatpush1.bf16.msra.mxu0 %v8896_v53 }
0x160b   :  { %6769 = vmatprep.subr.bf16.mxu0 %v8091_v58 }
0x160e   :  { %6771 = vmatpush1.bf16.msra.mxu0 %v8900_v59 }
0x160f   :  { %6772 = vmatprep.subr.bf16.mxu0 %v8091_v58 }
0x1612   :  { %6774 = vmatpush1.bf16.msra.mxu0 %v8904_v62 }
0x1613   :  { %6775 = vmatprep.subr.bf16.mxu0 %v8091_v58 }
0x1616   :  { %6777 = vmatpush1.bf16.msra.mxu0 %v8908_v1 }
0x1617   :  { %6778 = vmatprep.subr.bf16.mxu0 %v8091_v58 }
0x161a   :  { %6780 = vmatpush1.bf16.msra.mxu0 %v8912_v6 }
0x161b   :  { %6781 = vmatprep.subr.bf16.mxu0 %v8091_v58 }
0x161e   :  { %6783 = vmatpush1.bf16.msra.mxu0 %v8916_v15 }
0x161f   :  { %3048 = vmatprep.subr.mxu0 %v8082_v20 }
0x1622   :  { %3049 = vmatpush1.msra.mxu0 %v8921_v16 }
0x1623   :  { %3073 = vmatmul.mubr.f32.vlgmr.msra.gmra.mrb[24].mxu0 %v8869_v12  ;;  %6791 = vmatprep.subr.bf16.mxu0 %v8773_v36 }
0x1624   :  { %6793 = vmatpush1.bf16.msra.mxu0 %v8775_v40 }
0x1625   :  { %6795 = vmatprep.subr.bf16.mxu0 %v8778_v44 }
0x1628   :  { %6797 = vmatpush1.bf16.msra.mxu0 %v8781_v47  ;;  %v2918_v47 = vlaneseq }
0x1629   :  { %6799 = vmatprep.subr.bf16.mxu0 %v8784_v48 }
0x162a   :  { %v8948_v48 = vshrl.u32 %v2918_v47, 7 }
0x162c   :  { %6801 = vmatpush1.bf16.msra.mxu0 %v8787_v8  ;;  %v8951_v8 = vsub.s32 0, %v8948_v48  ;;  %v8988_v54 = vsub.s32 2, %v8948_v48  ;;  %v8991_v55 = vsub.s32 1, %v8948_v48 }
0x162d   :  { %6803 = vmatprep.subr.bf16.mxu0 %v8790_v51  ;;  %v2916_v51 = vld [vmem:[#allocation29] sm:$0x7] }
0x162e   :  { %v2929_v60 = vrot.slane %v2916_v51, %v8988_v54  ;;  %v2925_v19 = vrot.slane %v2916_v51, %v8991_v55 }
0x1630   :  { %6805 = vmatpush1.bf16.msra.mxu0 %v8793_v56  ;;  %v2921_v56 = vrot.slane %v2916_v51, %v8951_v8 }
0x1631   :  { %6807 = vmatprep.subr.bf16.mxu0 %v8796_v57 }
0x1634   :  { %6809 = vmatpush1.bf16.msra.mxu0 %v8799_v18 }
0x1635   :  { %6811 = vmatprep.subr.bf16.mxu0 %v8802_v61 }
0x1638   :  { %6813 = vmatpush1.bf16.msra.mxu0 %v8805_v2  ;;  %v6182_v2 = vld [vmem:[#allocation34] ss:$0 sm:$0xff] }
0x1639   :  { %6815 = vmatprep.subr.bf16.mxu0 %v8808_v3 }
0x163c   :  { %6817 = vmatpush1.bf16.msra.mxu0 %v8811_v10 }
0x163d   :  { %6819 = vmatprep.subr.bf16.mxu0 %v8814_v11 }
0x1640   :  { %6821 = vmatpush1.bf16.msra.mxu0 %v8817_v14 }
0x1641   :  { %6823 = vmatprep.subr.bf16.mxu0 %v8833_v32 }
0x1644   :  { %6825 = vmatpush1.bf16.msra.mxu0 %v8838_v35  ;;  %v6188_v35 = vld [vmem:[%s9790_s24 + $0x4] sm:$0x3] }
0x1645   :  { %6827 = vmatprep.subr.bf16.mxu0 %v8842_v39 }
0x1648   :  { %6829 = vmatpush1.bf16.msra.mxu0 %v8850_v46 }
0x1649   :  { %3419 = vmatprep.subr.mxu0 %v8856_v49 }
0x164c   :  { %3420 = vmatpush1.msra.mxu0 %v8858_v50 }
0x164d   :  { %6860 = vmatprep.subr.bf16.mxu0 %v8091_v58 }
0x16c0   :  { %v3003_v57 = vpop.f32.mrb[28].mxu1 }
0x16c1   :  { %v3004_v18 = vadd.f32 %v3003_v57, %v2921_v56  ;;  %v3005_v61 = vpop.f32.mrb[29].mxu1 }
0x16c2   :  { %v3006_v5 = vadd.f32 %v3005_v61, %v2925_v19 }
0x16c3   :  { %7371 = vtanh.f32 %v3004_v18  ;;  %v6191_v47 = vmul.f32 -1.442695, %v3004_v18 }
0x16c4   :  { %v6192_v61 = vmul.f32 -1.442695, %v3006_v5 }
0x16cc   :  { %v6549_v3 = vpop.f32.mrb[22].mxu0 }
0x16cd   :  { %v7372_v10 = vpop.eup %7371  ;;  %v2822_v11 = vadd.f32 %v6549_v3, %v6182_v2  ;;  %v2816_v14 = vpop.f32.mrb[23].mxu0 }
0x16ce   :  { %v2817_v32 = vadd.f32 %v6182_v2, %v2816_v14  ;;  %3105 = vrot.lane.b32.xlu0 %v7372_v10, %s8088_s29 }
0x16cf   :  { %v3171_v39 = vrot.slane %v2822_v11, 7  ;;  %v4026_v46 = vrot.slane %v2822_v11, 1  ;;  %v4453_v49 = vrot.slane %v2822_v11, 2  ;;  %v4880_v50 = vrot.slane %v2822_v11, 3 }
0x16d0   :  { %v3599_v12 = vrot.slane %v2817_v32, 1  ;;  %v4025_v17 = vrot.slane %v2817_v32, 2  ;;  %v4452_v21 = vrot.slane %v2817_v32, 3  ;;  %v4879_v25 = vrot.slane %v2817_v32, 4 }
0x16d1   :  { %v8959_v24 = vsel %vm3172_vm7, %v3171_v39, %v2817_v32  ;;  %v5306_v26 = vrot.slane %v2817_v32, 5  ;;  %v5307_v37 = vrot.slane %v2822_v11, 4  ;;  %v5733_v38 = vrot.slane %v2817_v32, 6 }
0x16d2   :  { %3142 = vrot.lane.b32.xlu0 %v6188_v35, %s8092_s1  ;;  %v8963_v27 = vsel %vm3172_vm7, %v2822_v11, %v3599_v12  ;;  %v8966_v28 = vsel %vm3172_vm7, %v4026_v46, %v4025_v17  ;;  %v8969_v31 = vsel %vm3172_vm7, %v4453_v49, %v4452_v21  ;;  %v8975_v30 = vsel %vm3172_vm7, %v4880_v50, %v4879_v25  ;;  %v6187_v49 = vld [vmem:[%s9790_s24 + $0x2] sm:$0x3] }
0x16d3   :  { %v5734_v23 = vrot.slane %v2822_v11, 5  ;;  %v5989_v41 = vrot.slane %v2817_v32, 7  ;;  %v5990_v43 = vrot.slane %v2822_v11, 6  ;;  %v8978_v45 = vsel %vm3172_vm7, %v5307_v37, %v5306_v26 }
0x16d5   :  { %v8982_v9 = vsel %vm3172_vm7, %v5734_v23, %v5733_v38  ;;  %v8985_v52 = vsel %vm3172_vm7, %v5990_v43, %v5989_v41 }
0x16d6   :  { %3100 = vrot.lane.b32.xlu0 %v2830_v29, %s8092_s1 }
0x16f6   :  { %v3074_v63 = vpop.f32.mrb[24].mxu0 }
0x16f7   :  { %v3075_v0 = vadd.f32 %v3074_v63, %v2929_v60  ;;  %v3076_v4 = vpop.f32.mrb[25].mxu0 }
0x16f9   :  { %7373 = vtanh.f32 %v3075_v0  ;;  %v6193_v10 = vmul.f32 -1.442695, %v3075_v0 }
0x16fa   :  { %7375 = vtanh.f32 %v3006_v5 }
0x16fb   :  { %7377 = vpow2.f32 %v6191_v47  ;;  %v3164_v47 = vld [vmem:[#allocation31 + $0x10] sm:$0xff] }
0x1703   :  { %v7374_v7 = vpop.eup %7373 }
0x1704   :  { %3147 = vrot.lane.b32.xlu1 %v7374_v7, %s8088_s29  ;;  %v7376_v13 = vpop.eup %7375  ;;  %v3162_v7 = vld [vmem:[#allocation31] sm:$0xff] }
0x1705   :  { %v7378_v56 = vpop.eup %7377 }
0x1706   :  { %v3087_v57 = vadd.f32 1.0, %v7378_v56 }
0x1708   :  { %3126 = vrot.lane.b32.xlu1 %v7376_v13, %s8088_s29  ;;  %7379 = vrcp.f32 %v3087_v57  ;;  %v3163_v13 = vld [vmem:[#allocation31 + $0x8] sm:$0xff]  ;;  %v3165_v57 = vld [vmem:[#allocation31 + $0x18] sm:$0xff] }
0x1709   :  { %7381 = vpow2.f32 %v6193_v10  ;;  %v9016_v56 = vpack.c.bf16 %v3163_v13, %v3162_v7 }
0x170a   :  { %7383 = vpow2.f32 %v6192_v61 }
0x170b   :  { %6786 = vmatpush3.bf16.msra.mxu1 %v9016_v56 }
0x170c   :  { %6787 = vmatprep.subr.bf16.mxu1 %v8091_v58 }
0x1712   :  { %v7380_v2 = vpop.eup %7379 }
0x1713   :  { %v7382_v11 = vpop.eup %7381 }
0x1714   :  { %v3089_v14 = vadd.f32 1.0, %v7382_v11  ;;  %v7384_v32 = vpop.eup %7383 }
0x1715   :  { %v3088_v35 = vadd.f32 1.0, %v7384_v32 }
0x1716   :  { %7385 = vrcp.f32 %v3089_v14 }
0x1717   :  { %7387 = vrcp.f32 %v3088_v35  ;;  %v3276_v35 = vld [vmem:[#allocation26 + $0x9] sm:$0x1] }
0x1720   :  { %v7386_v18 = vpop.eup %7385 }
0x1721   :  { %v7388_v12 = vpop.eup %7387 }
0x1740   :  { %v3106_v3 = vpop.permute.xlu0 %3105 }
0x1741   :  { %v3108_v51 = vmul.f32 %v7380_v2, %v3106_v3  ;;  %v9019_v3 = vpack.c.bf16 %v3165_v57, %v3164_v47 }
0x1743   :  { %3110 = vrot.lane.b32.xlu0 %v3108_v51, %s8092_s1  ;;  %6789 = vmatpush3.bf16.msra.mxu1 %v9019_v3 }
0x1744   :  { %v3143_v21 = vpop.permute.xlu0 %3142  ;;  %6830 = vmatprep.subr.bf16.mxu1 %v8091_v58 }
0x1745   :  { %v3145_v23 = vmul.f32 %v7386_v18, %v3143_v21 }
0x1748   :  { %v3101_v25 = vpop.permute.xlu0 %3100 }
0x1749   :  { %v3103_v26 = vmul.f32 %v7380_v2, %v3101_v25 }
0x1776   :  { %v3148_v39 = vpop.permute.xlu1 %3147 }
0x1777   :  { %v3150_v46 = vmul.f32 %v7386_v18, %v3148_v39 }
0x1779   :  { %3152 = vrot.lane.b32.xlu1 %v3150_v46, %s8092_s1  ;;  %v3279_v46 = vrot.slane %v3276_v35, 7 }
0x177a   :  { %v3127_v50 = vpop.permute.xlu1 %3126 }
0x177b   :  { %v3129_v17 = vmul.f32 %v7388_v12, %v3127_v50 }
0x177d   :  { %3121 = vrot.lane.b32.xlu1 %v6187_v49, %s8092_s1  ;;  %v3275_v49 = vld [vmem:[#allocation26 + $0x1] sm:$0x1] }
0x1781   :  { %3131 = vrot.lane.b32.xlu1 %v3129_v17, %s8092_s1 }
0x17b5   :  { %v3111_v29 = vpop.permute.xlu0 %3110 }
0x17b6   :  { %v9004_v37 = vadd.f32 %v3111_v29, %v3103_v26  ;;  %v8094_v26 = vmov 1966171168  }
0x17b7   :  { %v3249_v29 = vunpack.c.l.s4 %v8094_v26 }
0x17b8   :  { %7389 = vtanh.f32 %v9004_v37 }
0x17c2   :  { %v7390_v38 = vpop.eup %7389 }
0x17c3   :  { %3116 = vrot.lane.b32.xlu1 %v7390_v38, %s8088_s29  ;;  %v3250_v38 = vunpack.c.0.s8 %v3249_v29 }
0x17eb   :  { %v3153_v41 = vpop.permute.xlu1 %3152 }
0x17ec   :  { %v9008_v43 = vadd.f32 %v3153_v41, %v3145_v23  ;;  %v9066_v23 = vsub.s32 %v3250_v38, %v8948_v48 }
0x17ee   :  { %7391 = vtanh.f32 %v9008_v43 }
0x17ef   :  { %v3122_v60 = vpop.permute.xlu1 %3121 }
0x17f0   :  { %v3124_v19 = vmul.f32 %v7388_v12, %v3122_v60 }
0x17f3   :  { %v3132_v63 = vpop.permute.xlu1 %3131 }
0x17f4   :  { %v9011_v0 = vadd.f32 %v3132_v63, %v3124_v19 }
0x17f6   :  { %7393 = vtanh.f32 %v9011_v0 }
0x17f8   :  { %v7392_v4 = vpop.eup %7391 }
0x17f9   :  { %3158 = vrot.lane.b32.xlu0 %v7392_v4, %s8088_s29  ;;  %v3359_v4 = vld [vmem:[#allocation29] sm:$0x7] }
0x17fa   :  { %v3372_v47 = vrot.slane %v3359_v4, %v8988_v54  ;;  %v3368_v57 = vrot.slane %v3359_v4, %v8991_v55 }
0x1800   :  { %v7394_v5 = vpop.eup %7393 }
0x1801   :  { %3137 = vrot.lane.b32.xlu0 %v7394_v5, %s8088_s29 }
0x1835   :  { %v3117_v51 = vpop.permute.xlu1 %3116 }
0x1836   :  { %v3119_v10 = vmul.f32 %v7380_v2, %v3117_v51 }
0x1838   :  { %3283 = vrot.lane.b32.xlu0 %v3119_v10, %s8090_s17 }
0x186b   :  { %v3159_v61 = vpop.permute.xlu0 %3158 }
0x186c   :  { %v3161_v11 = vmul.f32 %v7386_v18, %v3159_v61  ;;  %v3280_v18 = vsel %vm3172_vm7, %v3279_v46, %v3275_v49 }
0x186e   :  { %3167 = vrot.lane.b32.xlu1 %v3161_v11, %s8092_s1  ;;  %3290 = vrot.lane.b32.xlu0 %v3161_v11, %s8093_s2 }
0x1873   :  { %v3138_v14 = vpop.permute.xlu0 %3137 }
0x1874   :  { %v3140_v32 = vmul.f32 %v7388_v12, %v3138_v14 }
0x1876   :  { %3287 = vrot.lane.b32.xlu1 %v3140_v32, %s8059_s8 }
0x18aa   :  { %v3284_v2 = vpop.permute.xlu0 %3283 }
0x18ab   :  { %v3293_v50 = vsel %vm2848_vm4, %v3280_v18, %v3284_v2 }
0x18e0   :  { %v3168_v39 = vpop.permute.xlu1 %3167  ;;  %v3291_v12 = vpop.permute.xlu0 %3290 }
0x18e1   :  { %6559 = vmatmul.mubr.msk.f32.vlgmr.msra.gmra.mrb[30].mxu1 %vm469_vm1, %v3168_v39 }
0x18e2   :  { %6832 = vmatpush1.bf16.msra.mxu1 %v8878_v33 }
0x18e3   :  { %6833 = vmatprep.subr.bf16.mxu1 %v8091_v58 }
0x18e6   :  { %6835 = vmatpush1.bf16.msra.mxu1 %v8883_v22 }
0x18e7   :  { %6836 = vmatprep.subr.bf16.mxu1 %v8091_v58 }
0x18e8   :  { %v3288_v17 = vpop.permute.xlu1 %3287 }
0x18e9   :  { %v3294_v21 = vsel %vm2850_vm5, %v3293_v50, %v3288_v17  ;;  %v3295_v25 = vsel %vm861_vm3, %v3288_v17, %v3291_v12 }
0x18ea   :  { %6838 = vmatpush1.bf16.msra.mxu1 %v8888_v42  ;;  %6195 = vmatprep.mubr.msk.f32.mxu0 %vm2933_vm6, %v3295_v25 }
0x18eb   :  { %6196 = vmatprep.mubr.msk.f32.mxu1 %vm2933_vm6, %v3295_v25  ;;  %3444 = vmatmul.mubr.f32.vlgmr.msra.gmra.mrb[26].mxu0 %v3294_v21 }
0x18ec   :  { %6839 = vmatprep.subr.bf16.mxu1 %v8091_v58  ;;  %6862 = vmatpush3.bf16.msra.mxu0 %v9016_v56 }
0x18ed   :  { %6863 = vmatprep.subr.bf16.mxu0 %v8091_v58  ;;  %6569 = vmatprep.mubr.msk.f32.mxu0 %vm8083_vm2, %v8082_v20 }
0x18ee   :  { %6841 = vmatpush1.bf16.msra.mxu1 %v8892_v34 }
0x18ef   :  { %6842 = vmatprep.subr.bf16.mxu1 %v8091_v58 }
0x18f0   :  { %6865 = vmatpush3.bf16.msra.mxu0 %v9019_v3 }
0x18f1   :  { %6906 = vmatprep.subr.bf16.mxu0 %v8091_v58 }
0x18f2   :  { %6844 = vmatpush1.bf16.msra.mxu1 %v8896_v53 }
0x18f3   :  { %6845 = vmatprep.subr.bf16.mxu1 %v8091_v58 }
0x18f6   :  { %6847 = vmatpush1.bf16.msra.mxu1 %v8900_v59 }
0x18f7   :  { %6848 = vmatprep.subr.bf16.mxu1 %v8091_v58 }
0x18fa   :  { %6850 = vmatpush1.bf16.msra.mxu1 %v8904_v62 }
0x18fb   :  { %6851 = vmatprep.subr.bf16.mxu1 %v8091_v58 }
0x18fe   :  { %6853 = vmatpush1.bf16.msra.mxu1 %v8908_v1 }
0x18ff   :  { %6854 = vmatprep.subr.bf16.mxu1 %v8091_v58 }
0x1902   :  { %6856 = vmatpush1.bf16.msra.mxu1 %v8912_v6 }
0x1903   :  { %6857 = vmatprep.subr.bf16.mxu1 %v8091_v58 }
0x1906   :  { %6859 = vmatpush1.bf16.msra.mxu1 %v8916_v15 }
0x1907   :  { %3490 = vmatprep.subr.mxu1 %v8082_v20 }
0x190a   :  { %3491 = vmatpush1.msra.mxu1 %v8921_v16 }
0x190b   :  { %3515 = vmatmul.mubr.f32.vlgmr.msra.gmra.mrb[32].mxu1 %v3294_v21  ;;  %6867 = vmatprep.subr.bf16.mxu1 %v8773_v36 }
0x190c   :  { %6869 = vmatpush1.bf16.msra.mxu1 %v8775_v40 }
0x190d   :  { %6871 = vmatprep.subr.bf16.mxu1 %v8778_v44  ;;  %v3364_v44 = vrot.slane %v3359_v4, %v8951_v8 }
0x19b4   :  { %v3243_v41 = vpop.f32.mrb[30].mxu1 }
0x19b5   :  { %v3244_v60 = vadd.f32 %v3243_v41, %v8959_v24  ;;  %v6560_v19 = vpop.f32.mrb[31].mxu1 }
0x19b7   :  { %v3254_v63 = vrot.slane %v3244_v60, %v9066_v23 }
0x19b9   :  { %v3255_v5 = vcombine.high %v3254_v63, %v3254_v63  ;;  %v3262_v36 = vrot.slane %v3254_v63, %v9066_v23 }
0x19bb   :  { %v3269_v40 = vrot.slane %v3255_v5, %v9066_v23  ;;  %3273 = vst.msk [vmem:[#allocation35] sm:$0x1] %vm3272_vm8, %v3262_v36 }
0x19bd   :  { %3274 = vst.msk [vmem:[#allocation35 + $0x8] sm:$0x1] %vm3272_vm8, %v3269_v40 }
0x19be   :  { %v3445_v48 = vpop.f32.mrb[26].mxu0 }
0x19bf   :  { %v3446_v7 = vadd.f32 %v3445_v48, %v3364_v44  ;;  %v3447_v13 = vpop.f32.mrb[27].mxu0 }
0x19c0   :  { %v3448_v11 = vadd.f32 %v3447_v13, %v3368_v57 }
0x19c1   :  { %7395 = vtanh.f32 %v3446_v7  ;;  %v6197_v35 = vmul.f32 -1.442695, %v3446_v7 }
0x19c2   :  { %v6198_v12 = vmul.f32 -1.442695, %v3448_v11 }
0x19cb   :  { %v7396_v24 = vpop.eup %7395 }
0x19cc   :  { %3543 = vrot.lane.b32.xlu0 %v7396_v24, %s8088_s29 }
0x19de   :  { %v3516_v51 = vpop.f32.mrb[32].mxu1 }
0x19df   :  { %v3517_v10 = vadd.f32 %v3516_v51, %v3372_v47  ;;  %v3518_v61 = vpop.f32.mrb[33].mxu1  ;;  %v3731_v51 = vld [vmem:[#allocation28 + $0x48] sm:$0xff] }
0x19e0   :  { %v3735_v61 = vld [vmem:[#allocation28 + $0x68] sm:$0xff] }
0x19e1   :  { %7397 = vtanh.f32 %v3517_v10  ;;  %v6199_v18 = vmul.f32 -1.442695, %v3517_v10 }
0x19e2   :  { %7399 = vtanh.f32 %v3448_v11  ;;  %v3738_v11 = vld [vmem:[#allocation28 + $0x80] sm:$0xff] }
0x19e3   :  { %7401 = vpow2.f32 %v6197_v35  ;;  %v3741_v35 = vld [vmem:[#allocation28 + $0x98] sm:$0xff] }
0x19eb   :  { %v7398_v14 = vpop.eup %7397 }
0x19ec   :  { %3577 = vrot.lane.b32.xlu1 %v7398_v14, %s8088_s29  ;;  %v7400_v32 = vpop.eup %7399  ;;  %v3734_v14 = vld [vmem:[#allocation28 + $0x60] sm:$0xff] }
0x19ed   :  { %v7402_v39 = vpop.eup %7401 }
0x19ee   :  { %v3529_v46 = vadd.f32 1.0, %v7402_v39  ;;  %v3744_v39 = vld [vmem:[#allocation28 + $0xb0] sm:$0xff] }
0x19f0   :  { %3560 = vrot.lane.b32.xlu1 %v7400_v32, %s8088_s29  ;;  %7403 = vrcp.f32 %v3529_v46  ;;  %v3737_v32 = vld [vmem:[#allocation28 + $0x78] sm:$0xff] }
0x19f1   :  { %7405 = vpow2.f32 %v6199_v18  ;;  %v9115_v46 = vpack.c.bf16 %v3737_v32, %v3734_v14  ;;  %v3740_v18 = vld [vmem:[#allocation28 + $0x90] sm:$0xff] }
0x19f2   :  { %7407 = vpow2.f32 %v6198_v12  ;;  %v3747_v12 = vld [vmem:[#allocation28 + $0xc8] sm:$0xff]  ;;  %v3764_v32 = vld [vmem:[#allocation28 + $0x150] sm:$0xff] }
0x19fa   :  { %v9080_v49 = vpop.eup %7403 }
0x19fb   :  { %v7406_v17 = vpop.eup %7405  ;;  %v3541_v4 = vmul.f32 %v9080_v49, %v9004_v37 }
0x19fc   :  { %v3531_v21 = vadd.f32 1.0, %v7406_v17  ;;  %v7408_v25 = vpop.eup %7407  ;;  %v3750_v17 = vld [vmem:[#allocation28 + $0xe0] sm:$0xff] }
0x19fd   :  { %v3530_v26 = vadd.f32 1.0, %v7408_v25  ;;  %v9124_v25 = vpack.c.bf16 %v3750_v17, %v3747_v12  ;;  %v3770_v17 = vld [vmem:[#allocation28 + $0x180] sm:$0xff] }
0x19fe   :  { %7409 = vrcp.f32 %v3531_v21 }
0x19ff   :  { %7411 = vrcp.f32 %v3530_v26  ;;  %v3746_v26 = vld [vmem:[#allocation28 + $0xc0] sm:$0xff] }
0x1a08   :  { %v9084_v29 = vpop.eup %7409 }
0x1a09   :  { %v9088_v60 = vpop.eup %7411  ;;  %v3575_v44 = vmul.f32 %v9084_v29, %v9008_v43  ;;  %v3728_v43 = vld [vmem:[#allocation28 + $0x30] sm:$0xff] }
0x1a0a   :  { %v3558_v13 = vmul.f32 %v9088_v60, %v9011_v0  ;;  %v9110_v10 = vpack.c.bf16 %v3731_v51, %v3728_v43  ;;  %v9113_v0 = vpack.c.bf16 %v3738_v11, %v3735_v61  ;;  %v3758_v43 = vld [vmem:[#allocation28 + $0x120] sm:$0xff]  ;;  %v3761_v51 = vld [vmem:[#allocation28 + $0x138] sm:$0xff]  ;;  %v3768_v11 = vld [vmem:[#allocation28 + $0x170] sm:$0xff] }
0x1a0b   :  { %v3765_v61 = vld [vmem:[#allocation28 + $0x158] sm:$0xff]  ;;  %v9141_v14 = vpack.c.bf16 %v3761_v51, %v3758_v43 }
0x1a0c   :  { %6873 = vmatpush1.bf16.msra.mxu1 %v9110_v10 }
0x1a0d   :  { %6875 = vmatprep.subr.bf16.mxu1 %v9113_v0 }
0x1a10   :  { %6877 = vmatpush1.bf16.msra.mxu1 %v9115_v46 }
0x1a3e   :  { %v3544_v2 = vpop.permute.xlu0 %3543 }
0x1a3f   :  { %v3546_v50 = vmul.f32 %v9080_v49, %v3544_v2  ;;  %v9117_v2 = vpack.c.bf16 %v3744_v39, %v3741_v35  ;;  %v3767_v35 = vld [vmem:[#allocation28 + $0x168] sm:$0xff] }
0x1a40   :  { %v3771_v39 = vld [vmem:[#allocation28 + $0x188] sm:$0xff] }
0x1a41   :  { %3548 = vrot.lane.b32.xlu1 %v3546_v50, %s8092_s1  ;;  %v3743_v50 = vld [vmem:[#allocation28 + $0xa8] sm:$0xff]  ;;  %6879 = vmatprep.subr.bf16.mxu1 %v9117_v2 }
0x1a42   :  { %v9121_v21 = vpack.c.bf16 %v3743_v50, %v3740_v18  ;;  %v3774_v18 = vld [vmem:[#allocation28 + $0x1a0] sm:$0xff]  ;;  %v9147_v50 = vpack.c.bf16 %v3767_v35, %v3764_v32  ;;  %v3702_v32 = vld [vmem:[#allocation26 + $0xa] sm:$0x1] }
0x1a43   :  { %v9150_v12 = vpack.c.bf16 %v3774_v18, %v3771_v39  ;;  %v3705_v35 = vrot.slane %v3702_v32, 7  ;;  %v3701_v39 = vld [vmem:[#allocation26 + $0x2] sm:$0x1] }
0x1a44   :  { %6881 = vmatpush1.bf16.msra.mxu1 %v9121_v21 }
0x1a45   :  { %6883 = vmatprep.subr.bf16.mxu1 %v9124_v25 }
0x1a5e   :  { %v3578_v38 = vpop.permute.xlu1 %3577 }
0x1a5f   :  { %v3580_v41 = vmul.f32 %v9084_v29, %v3578_v38  ;;  %v3749_v38 = vld [vmem:[#allocation28 + $0xd8] sm:$0xff] }
0x1a61   :  { %3582 = vrot.lane.b32.xlu0 %v3580_v41, %s8092_s1  ;;  %v3753_v41 = vld [vmem:[#allocation28 + $0xf8] sm:$0xff] }
0x1a62   :  { %v3561_v19 = vpop.permute.xlu1 %3560 }
0x1a63   :  { %v3563_v63 = vmul.f32 %v9088_v60, %v3561_v19  ;;  %v3756_v19 = vld [vmem:[#allocation28 + $0x110] sm:$0xff] }
0x1a65   :  { %3565 = vrot.lane.b32.xlu0 %v3563_v63, %s8092_s1  ;;  %v9127_v63 = vpack.c.bf16 %v3749_v38, %v3746_v26  ;;  %v3773_v26 = vld [vmem:[#allocation28 + $0x198] sm:$0xff] }
0x1a66   :  { %v9153_v38 = vpack.c.bf16 %v3773_v26, %v3770_v17  ;;  %v3706_v26 = vsel %vm3172_vm7, %v3705_v35, %v3701_v39 }
0x1a67   :  { %6885 = vmatpush1.bf16.msra.mxu1 %v9127_v63 }
0x1ab3   :  { %v3549_v5 = vpop.permute.xlu1 %3548 }
0x1ab4   :  { %v9094_v36 = vadd.f32 %v3549_v5, %v3541_v4  ;;  %v9130_v5 = vpack.c.bf16 %v3756_v19, %v3753_v41  ;;  %v3777_v41 = vld [vmem:[#allocation28 + $0x1b8] sm:$0xff]  ;;  %v3780_v19 = vld [vmem:[#allocation28 + $0x1d0] sm:$0xff] }
0x1ab6   :  { %7413 = vtanh.f32 %v9094_v36  ;;  %6887 = vmatprep.subr.bf16.mxu1 %v9130_v5 }
0x1ac0   :  { %v7414_v40 = vpop.eup %7413 }
0x1ac1   :  { %3554 = vrot.lane.b32.xlu0 %v7414_v40, %s8088_s29  ;;  %v3752_v40 = vld [vmem:[#allocation28 + $0xf0] sm:$0xff] }
0x1ad3   :  { %v3583_v48 = vpop.permute.xlu0 %3582 }
0x1ad4   :  { %v9100_v7 = vadd.f32 %v3583_v48, %v3575_v44  ;;  %v3755_v44 = vld [vmem:[#allocation28 + $0x108] sm:$0xff] }
0x1ad6   :  { %7415 = vtanh.f32 %v9100_v7 }
0x1ad7   :  { %v3566_v37 = vpop.permute.xlu0 %3565 }
0x1ad8   :  { %v9105_v24 = vadd.f32 %v3566_v37, %v3558_v13  ;;  %v3759_v13 = vld [vmem:[#allocation28 + $0x128] sm:$0xff]  ;;  %v3762_v37 = vld [vmem:[#allocation28 + $0x140] sm:$0xff] }
0x1ada   :  { %7417 = vtanh.f32 %v9105_v24 }
0x1ae0   :  { %v7416_v47 = vpop.eup %7415 }
0x1ae1   :  { %3588 = vrot.lane.b32.xlu1 %v7416_v47, %s8088_s29  ;;  %v9135_v47 = vpack.c.bf16 %v3755_v44, %v3752_v40  ;;  %v3776_v40 = vld [vmem:[#allocation28 + $0x1b0] sm:$0xff]  ;;  %v3779_v44 = vld [vmem:[#allocation28 + $0x1c8] sm:$0xff] }
0x1ae3   :  { %6889 = vmatpush1.bf16.msra.mxu1 %v9135_v47 }
0x1ae4   :  { %v7418_v57 = vpop.eup %7417 }
0x1ae5   :  { %3571 = vrot.lane.b32.xlu1 %v7418_v57, %s8088_s29  ;;  %v9138_v57 = vpack.c.bf16 %v3762_v37, %v3759_v13  ;;  %v9163_v13 = vld [vmem:[#allocation28 + $0x1e8] sm:$0xff]  ;;  %v9166_v37 = vld [vmem:[#allocation28 + $0x1e0] sm:$0xff] }
0x1ae7   :  { %6891 = vmatprep.subr.bf16.mxu1 %v9138_v57 }
0x1ae8   :  { %6893 = vmatpush1.bf16.msra.mxu1 %v9141_v14 }
0x1b33   :  { %v3555_v4 = vpop.permute.xlu0 %3554 }
0x1b34   :  { %v3557_v48 = vmul.f32 %v9080_v49, %v3555_v4  ;;  %v9144_v49 = vpack.c.bf16 %v3768_v11, %v3765_v61  ;;  %v9157_v4 = vpack.c.bf16 %v3780_v19, %v3777_v41 }
0x1b36   :  { %3709 = vrot.lane.b32.xlu1 %v3557_v48, %s8090_s17  ;;  %6895 = vmatprep.subr.bf16.mxu1 %v9144_v49  ;;  %v9160_v48 = vpack.c.bf16 %v3779_v44, %v3776_v40 }
0x1b37   :  { %6897 = vmatpush1.bf16.msra.mxu1 %v9147_v50 }
0x1b38   :  { %6899 = vmatprep.subr.bf16.mxu1 %v9150_v12 }
0x1b3b   :  { %6901 = vmatpush1.bf16.msra.mxu1 %v9153_v38 }
0x1b3c   :  { %6903 = vmatprep.subr.bf16.mxu1 %v9157_v4 }
0x1b3f   :  { %6905 = vmatpush1.bf16.msra.mxu1 %v9160_v48 }
0x1b40   :  { %3845 = vmatprep.subr.mxu1 %v9163_v13 }
0x1b43   :  { %3846 = vmatpush1.msra.mxu1 %v9166_v37 }
0x1b44   :  { %6936 = vmatprep.subr.bf16.mxu1 %v8091_v58 }
0x1b53   :  { %v3589_v43 = vpop.permute.xlu1 %3588 }
0x1b54   :  { %v3591_v51 = vmul.f32 %v9084_v29, %v3589_v43 }
0x1b56   :  { %3597 = vrot.lane.b32.xlu0 %v3591_v51, %s8092_s1  ;;  %3716 = vrot.lane.b32.xlu1 %v3591_v51, %s8093_s2 }
0x1b57   :  { %v3572_v61 = vpop.permute.xlu1 %3571 }
0x1b58   :  { %v3574_v11 = vmul.f32 %v9088_v60, %v3572_v61 }
0x1b5a   :  { %3713 = vrot.lane.b32.xlu0 %v3574_v11, %s8059_s8 }
0x1ba8   :  { %v3710_v18 = vpop.permute.xlu1 %3709 }
0x1ba9   :  { %v3719_v29 = vsel %vm2848_vm4, %v3706_v26, %v3710_v18 }
0x1bc8   :  { %v3598_v17 = vpop.permute.xlu0 %3597  ;;  %v3717_v41 = vpop.permute.xlu1 %3716 }
0x1bc9   :  { %6570 = vmatmul.mubr.msk.f32.vlgmr.msra.gmra.mrb[28].mxu0 %vm469_vm1, %v3598_v17 }
0x1bca   :  { %6908 = vmatpush1.bf16.msra.mxu0 %v8878_v33 }
0x1bcb   :  { %6909 = vmatprep.subr.bf16.mxu0 %v8091_v58 }
0x1bcc   :  { %v3714_v19 = vpop.permute.xlu0 %3713 }
0x1bcd   :  { %v3720_v60 = vsel %vm2850_vm5, %v3719_v29, %v3714_v19  ;;  %v3721_v40 = vsel %vm861_vm3, %v3714_v19, %v3717_v41 }
0x1bce   :  { %6911 = vmatpush1.bf16.msra.mxu0 %v8883_v22  ;;  %6201 = vmatprep.mubr.msk.f32.mxu1 %vm2933_vm6, %v3721_v40  ;;  %v3785_v22 = vld [vmem:[#allocation29] sm:$0x7] }
0x1bcf   :  { %6202 = vmatprep.mubr.msk.f32.mxu0 %vm2933_vm6, %v3721_v40  ;;  %3870 = vmatmul.mubr.f32.vlgmr.msra.gmra.mrb[34].mxu1 %v3720_v60  ;;  %v3794_v44 = vrot.slane %v3785_v22, %v8991_v55 }
0x1bd0   :  { %6912 = vmatprep.subr.bf16.mxu0 %v8091_v58  ;;  %6938 = vmatpush3.bf16.msra.mxu1 %v9016_v56 }
0x1bd1   :  { %6939 = vmatprep.subr.bf16.mxu1 %v8091_v58  ;;  %6580 = vmatprep.mubr.msk.f32.mxu1 %vm8083_vm2, %v8082_v20 }
0x1bd2   :  { %6914 = vmatpush1.bf16.msra.mxu0 %v8888_v42 }
0x1bd3   :  { %6915 = vmatprep.subr.bf16.mxu0 %v8091_v58 }
0x1bd4   :  { %6941 = vmatpush3.bf16.msra.mxu1 %v9019_v3 }
0x1bd5   :  { %6982 = vmatprep.subr.bf16.mxu1 %v8091_v58 }
0x1bd6   :  { %6917 = vmatpush1.bf16.msra.mxu0 %v8892_v34 }
0x1bd7   :  { %6918 = vmatprep.subr.bf16.mxu0 %v8091_v58 }
0x1bda   :  { %6920 = vmatpush1.bf16.msra.mxu0 %v8896_v53 }
0x1bdb   :  { %6921 = vmatprep.subr.bf16.mxu0 %v8091_v58 }
0x1bde   :  { %6923 = vmatpush1.bf16.msra.mxu0 %v8900_v59  ;;  %v3790_v59 = vrot.slane %v3785_v22, %v8951_v8 }
0x1bdf   :  { %6924 = vmatprep.subr.bf16.mxu0 %v8091_v58 }
0x1be2   :  { %6926 = vmatpush1.bf16.msra.mxu0 %v8904_v62 }
0x1be3   :  { %6927 = vmatprep.subr.bf16.mxu0 %v8091_v58 }
0x1be6   :  { %6929 = vmatpush1.bf16.msra.mxu0 %v8908_v1 }
0x1be7   :  { %6930 = vmatprep.subr.bf16.mxu0 %v8091_v58 }
0x1bea   :  { %6932 = vmatpush1.bf16.msra.mxu0 %v8912_v6 }
0x1beb   :  { %6933 = vmatprep.subr.bf16.mxu0 %v8091_v58 }
0x1bee   :  { %6935 = vmatpush1.bf16.msra.mxu0 %v8916_v15 }
0x1bef   :  { %3916 = vmatprep.subr.mxu0 %v8082_v20 }
0x1bf2   :  { %3917 = vmatpush1.msra.mxu0 %v8921_v16 }
0x1bf3   :  { %3941 = vmatmul.mubr.f32.vlgmr.msra.gmra.mrb[30].mxu0 %v3720_v60 }
0x1c9c   :  { %v3670_v33 = vpop.f32.mrb[28].mxu0 }
0x1c9d   :  { %v3671_v42 = vadd.f32 %v3670_v33, %v8963_v27  ;;  %v6571_v34 = vpop.f32.mrb[29].mxu0  ;;  %v3798_v27 = vrot.slane %v3785_v22, %v8988_v54 }
0x1c9f   :  { %v3681_v53 = vrot.slane %v3671_v42, %v9066_v23 }
0x1ca1   :  { %v3682_v62 = vcombine.high %v3681_v53, %v3681_v53  ;;  %v3689_v1 = vrot.slane %v3681_v53, %v9066_v23 }
0x1ca2   :  { %v3871_v6 = vpop.f32.mrb[34].mxu1 }
0x1ca3   :  { %v3696_v15 = vrot.slane %v3682_v62, %v9066_v23  ;;  %3699 = vst.msk [vmem:[#allocation35 + $0x1] sm:$0x1] %vm3272_vm8, %v3689_v1  ;;  %v3872_v56 = vadd.f32 %v3871_v6, %v3790_v59  ;;  %v3873_v16 = vpop.f32.mrb[35].mxu1 }
0x1ca4   :  { %v3874_v11 = vadd.f32 %v3873_v16, %v3794_v44 }
0x1ca5   :  { %3700 = vst.msk [vmem:[#allocation35 + $0x9] sm:$0x1] %vm3272_vm8, %v3696_v15  ;;  %7419 = vtanh.f32 %v3872_v56  ;;  %v6203_v39 = vmul.f32 -1.442695, %v3872_v56 }
0x1ca6   :  { %v6204_v60 = vmul.f32 -1.442695, %v3874_v11 }
0x1caf   :  { %v7420_v3 = vpop.eup %7419 }
0x1cb0   :  { %3969 = vrot.lane.b32.xlu1 %v7420_v3, %s8088_s29 }
0x1cc6   :  { %v3942_v43 = vpop.f32.mrb[30].mxu0 }
0x1cc7   :  { %v3943_v51 = vadd.f32 %v3942_v43, %v3798_v27  ;;  %v3944_v61 = vpop.f32.mrb[31].mxu0 }
0x1cc9   :  { %7421 = vtanh.f32 %v3943_v51  ;;  %v6205_v19 = vmul.f32 -1.442695, %v3943_v51 }
0x1cca   :  { %7423 = vtanh.f32 %v3874_v11 }
0x1ccb   :  { %7425 = vpow2.f32 %v6203_v39 }
0x1cd3   :  { %v7422_v32 = vpop.eup %7421 }
0x1cd4   :  { %4003 = vrot.lane.b32.xlu0 %v7422_v32, %s8088_s29  ;;  %v7424_v35 = vpop.eup %7423  ;;  %v4153_v32 = vld [vmem:[#allocation28 + $0x20] sm:$0xff] }
0x1cd5   :  { %v7426_v18 = vpop.eup %7425 }
0x1cd6   :  { %v3955_v17 = vadd.f32 1.0, %v7426_v18  ;;  %v4149_v18 = vld [vmem:[#allocation28] sm:$0xff] }
0x1cd8   :  { %3986 = vrot.lane.b32.xlu0 %v7424_v35, %s8088_s29  ;;  %7427 = vrcp.f32 %v3955_v17  ;;  %v4152_v17 = vld [vmem:[#allocation28 + $0x18] sm:$0xff] }
0x1cd9   :  { %7429 = vpow2.f32 %v6205_v19 }
0x1cda   :  { %7431 = vpow2.f32 %v6204_v60 }
0x1ce2   :  { %v7428_v26 = vpop.eup %7427 }
0x1ce3   :  { %v7430_v40 = vpop.eup %7429  ;;  %v3967_v15 = vmul.f32 %v7428_v26, %v9094_v36  ;;  %v4150_v36 = vld [vmem:[#allocation28 + $0x8] sm:$0xff] }
0x1ce4   :  { %v3957_v33 = vadd.f32 1.0, %v7430_v40  ;;  %v7432_v22 = vpop.eup %7431  ;;  %v9237_v35 = vpack.c.bf16 %v4153_v32, %v4150_v36  ;;  %v4166_v36 = vld [vmem:[#allocation28 + $0x88] sm:$0xff] }
0x1ce5   :  { %v3956_v42 = vadd.f32 1.0, %v7432_v22 }
0x1ce6   :  { %7433 = vrcp.f32 %v3957_v33  ;;  %6943 = vmatprep.subr.bf16.mxu0 %v9237_v35 }
0x1ce7   :  { %7435 = vrcp.f32 %v3956_v42 }
0x1cf0   :  { %v7434_v34 = vpop.eup %7433 }
0x1cf1   :  { %v7436_v62 = vpop.eup %7435  ;;  %v4001_v27 = vmul.f32 %v7434_v34, %v9100_v7 }
0x1cf2   :  { %v3984_v51 = vmul.f32 %v7436_v62, %v9105_v24  ;;  %v9242_v24 = vpack.c.bf16 %v4152_v17, %v4149_v18 }
0x1cf4   :  { %6945 = vmatpush1.bf16.msra.mxu0 %v9242_v24 }
0x1d22   :  { %v3970_v29 = vpop.permute.xlu1 %3969 }
0x1d23   :  { %v3972_v41 = vmul.f32 %v7428_v26, %v3970_v29  ;;  %v4156_v29 = vld [vmem:[#allocation28 + $0x38] sm:$0xff] }
0x1d25   :  { %3974 = vrot.lane.b32.xlu0 %v3972_v41, %s8092_s1  ;;  %v4159_v41 = vld [vmem:[#allocation28 + $0x50] sm:$0xff] }
0x1d26   :  { %v9245_v19 = vpack.c.bf16 %v4159_v41, %v4156_v29  ;;  %v4169_v41 = vld [vmem:[#allocation28 + $0xa0] sm:$0xff] }
0x1d28   :  { %6947 = vmatprep.subr.bf16.mxu0 %v9245_v19 }
0x1d29   :  { %6949 = vmatpush1.bf16.msra.mxu0 %v9110_v10 }
0x1d2a   :  { %6951 = vmatprep.subr.bf16.mxu0 %v9113_v0 }
0x1d2d   :  { %6953 = vmatpush1.bf16.msra.mxu0 %v9115_v46 }
0x1d2e   :  { %6955 = vmatprep.subr.bf16.mxu0 %v9117_v2 }
0x1d31   :  { %6957 = vmatpush1.bf16.msra.mxu0 %v9121_v21 }
0x1d32   :  { %6959 = vmatprep.subr.bf16.mxu0 %v9124_v25 }
0x1d35   :  { %6961 = vmatpush1.bf16.msra.mxu0 %v9127_v63 }
0x1d36   :  { %6963 = vmatprep.subr.bf16.mxu0 %v9130_v5 }
0x1d39   :  { %6965 = vmatpush1.bf16.msra.mxu0 %v9135_v47 }
0x1d3a   :  { %6967 = vmatprep.subr.bf16.mxu0 %v9138_v57 }
0x1d3d   :  { %6969 = vmatpush1.bf16.msra.mxu0 %v9141_v14 }
0x1d3e   :  { %6971 = vmatprep.subr.bf16.mxu0 %v9144_v49 }
0x1d41   :  { %6973 = vmatpush1.bf16.msra.mxu0 %v9147_v50 }
0x1d42   :  { %6975 = vmatprep.subr.bf16.mxu0 %v9150_v12 }
0x1d45   :  { %6977 = vmatpush1.bf16.msra.mxu0 %v9153_v38 }
0x1d46   :  { %v4004_v53 = vpop.permute.xlu0 %4003  ;;  %6979 = vmatprep.subr.bf16.mxu0 %v9157_v4 }
0x1d47   :  { %v4006_v59 = vmul.f32 %v7434_v34, %v4004_v53  ;;  %v4129_v53 = vld [vmem:[#allocation26 + $0xb] sm:$0x1] }
0x1d49   :  { %4008 = vrot.lane.b32.xlu1 %v4006_v59, %s8092_s1  ;;  %6981 = vmatpush1.bf16.msra.mxu0 %v9160_v48  ;;  %v4151_v59 = vld [vmem:[#allocation28 + $0x10] sm:$0xff] }
0x1d4a   :  { %v3987_v1 = vpop.permute.xlu0 %3986  ;;  %4272 = vmatprep.subr.mxu0 %v9163_v13 }
0x1d4b   :  { %v3989_v6 = vmul.f32 %v7436_v62, %v3987_v1  ;;  %v4154_v1 = vld [vmem:[#allocation28 + $0x28] sm:$0xff] }
0x1d4d   :  { %3991 = vrot.lane.b32.xlu1 %v3989_v6, %s8092_s1  ;;  %4273 = vmatpush1.msra.mxu0 %v9166_v37  ;;  %v4132_v6 = vrot.slane %v4129_v53, 7  ;;  %v4184_v53 = vld [vmem:[#allocation28 + $0x118] sm:$0xff] }
0x1d4e   :  { %7012 = vmatprep.subr.bf16.mxu0 %v8091_v58 }
0x1d97   :  { %v3975_v56 = vpop.permute.xlu0 %3974 }
0x1d98   :  { %v9225_v16 = vadd.f32 %v3975_v56, %v3967_v15  ;;  %v4128_v15 = vld [vmem:[#allocation26 + $0x3] sm:$0x1]  ;;  %v9272_v56 = vpack.c.bf16 %v4154_v1, %v4151_v59 }
0x1d99   :  { %v4187_v1 = vld [vmem:[#allocation28 + $0x130] sm:$0xff] }
0x1d9a   :  { %7437 = vtanh.f32 %v9225_v16 }
0x1da4   :  { %v7438_v3 = vpop.eup %7437 }
0x1da5   :  { %3980 = vrot.lane.b32.xlu1 %v7438_v3, %s8088_s29  ;;  %v4157_v3 = vld [vmem:[#allocation28 + $0x40] sm:$0xff] }
0x1dbb   :  { %v4009_v44 = vpop.permute.xlu1 %4008 }
0x1dbc   :  { %v9230_v43 = vadd.f32 %v4009_v44, %v4001_v27  ;;  %v4160_v27 = vld [vmem:[#allocation28 + $0x58] sm:$0xff] }
0x1dbe   :  { %7439 = vtanh.f32 %v9230_v43 }
0x1dbf   :  { %v3992_v61 = vpop.permute.xlu1 %3991 }
0x1dc0   :  { %v9234_v11 = vadd.f32 %v3992_v61, %v3984_v51  ;;  %v4163_v61 = vld [vmem:[#allocation28 + $0x70] sm:$0xff] }
0x1dc1   :  { %v9285_v29 = vpack.c.bf16 %v4166_v36, %v4163_v61  ;;  %v4205_v36 = vld [vmem:[#allocation28 + $0x1c0] sm:$0xff] }
0x1dc2   :  { %7441 = vtanh.f32 %v9234_v11 }
0x1dc8   :  { %v7440_v39 = vpop.eup %7439 }
0x1dc9   :  { %4014 = vrot.lane.b32.xlu0 %v7440_v39, %s8088_s29 }
0x1dcc   :  { %v7442_v7 = vpop.eup %7441 }
0x1dcd   :  { %3997 = vrot.lane.b32.xlu0 %v7442_v7, %s8088_s29 }
0x1e17   :  { %v3981_v60 = vpop.permute.xlu1 %3980 }
0x1e18   :  { %v3983_v40 = vmul.f32 %v7428_v26, %v3981_v60  ;;  %v4172_v60 = vld [vmem:[#allocation28 + $0xb8] sm:$0xff] }
0x1e1a   :  { %4136 = vrot.lane.b32.xlu0 %v3983_v40, %s8090_s17  ;;  %v9292_v40 = vpack.c.bf16 %v4172_v60, %v4169_v41 }
0x1e3b   :  { %v4015_v26 = vpop.permute.xlu0 %4014 }
0x1e3c   :  { %v4017_v33 = vmul.f32 %v7434_v34, %v4015_v26  ;;  %v4133_v34 = vsel %vm3172_vm7, %v4132_v6, %v4128_v15  ;;  %v4175_v26 = vld [vmem:[#allocation28 + $0xd0] sm:$0xff]  ;;  %v4190_v6 = vld [vmem:[#allocation28 + $0x148] sm:$0xff] }
0x1e3d   :  { %v9304_v15 = vpack.c.bf16 %v4190_v6, %v4187_v1 }
0x1e3e   :  { %4023 = vrot.lane.b32.xlu1 %v4017_v33, %s8092_s1  ;;  %4143 = vrot.lane.b32.xlu0 %v4017_v33, %s8093_s2  ;;  %v4178_v33 = vld [vmem:[#allocation28 + $0xe8] sm:$0xff] }
0x1e3f   :  { %v3998_v22 = vpop.permute.xlu0 %3997 }
0x1e40   :  { %v4000_v42 = vmul.f32 %v7436_v62, %v3998_v22  ;;  %v9277_v62 = vpack.c.bf16 %v4160_v27, %v4157_v3  ;;  %v9296_v22 = vpack.c.bf16 %v4178_v33, %v4175_v26  ;;  %v4193_v3 = vld [vmem:[#allocation28 + $0x160] sm:$0xff]  ;;  %v4196_v27 = vld [vmem:[#allocation28 + $0x178] sm:$0xff] }
0x1e42   :  { %4140 = vrot.lane.b32.xlu1 %v4000_v42, %s8059_s8  ;;  %v4181_v42 = vld [vmem:[#allocation28 + $0x100] sm:$0xff] }
0x1e43   :  { %v9300_v59 = vpack.c.bf16 %v4184_v53, %v4181_v42 }
0x1e8c   :  { %v4137_v44 = vpop.permute.xlu0 %4136 }
0x1e8d   :  { %v4146_v32 = vsel %vm2848_vm4, %v4133_v34, %v4137_v44  ;;  %v9308_v44 = vpack.c.bf16 %v4196_v27, %v4193_v3  ;;  %v4202_v34 = vld [vmem:[#allocation28 + $0x1a8] sm:$0xff] }
0x1eb0   :  { %v4024_v51 = vpop.permute.xlu1 %4023  ;;  %v4144_v39 = vpop.permute.xlu0 %4143 }
0x1eb1   :  { %6581 = vmatmul.mubr.msk.f32.vlgmr.msra.gmra.mrb[36].mxu1 %vm469_vm1, %v4024_v51  ;;  %v4199_v51 = vld [vmem:[#allocation28 + $0x190] sm:$0xff] }
0x1eb2   :  { %6984 = vmatpush1.bf16.msra.mxu1 %v9272_v56  ;;  %v9312_v61 = vpack.c.bf16 %v4202_v34, %v4199_v51 }
0x1eb3   :  { %6985 = vmatprep.subr.bf16.mxu1 %v8091_v58 }
0x1eb4   :  { %v4141_v7 = vpop.permute.xlu1 %4140 }
0x1eb5   :  { %v4147_v18 = vsel %vm2850_vm5, %v4146_v32, %v4141_v7  ;;  %v4148_v17 = vsel %vm861_vm3, %v4141_v7, %v4144_v39  ;;  %v4208_v32 = vld [vmem:[#allocation28 + $0x1d8] sm:$0xff]  ;;  %v9321_v7 = vld [vmem:[#allocation28 + $0x1f0] sm:$0xff] }
0x1eb6   :  { %6987 = vmatpush1.bf16.msra.mxu1 %v9277_v62  ;;  %6207 = vmatprep.mubr.msk.f32.mxu0 %vm2933_vm6, %v4148_v17  ;;  %v9316_v39 = vpack.c.bf16 %v4208_v32, %v4205_v36 }
0x1eb7   :  { %6208 = vmatprep.mubr.msk.f32.mxu1 %vm2933_vm6, %v4148_v17  ;;  %4297 = vmatmul.mubr.f32.vlgmr.msra.gmra.mrb[32].mxu0 %v4147_v18 }
0x1eb8   :  { %6988 = vmatprep.subr.bf16.mxu1 %v8091_v58  ;;  %6591 = vmatprep.mubr.msk.f32.mxu0 %vm8083_vm2, %v8082_v20 }
0x1eba   :  { %6990 = vmatpush1.bf16.msra.mxu1 %v9285_v29 }
0x1ebb   :  { %6991 = vmatprep.subr.bf16.mxu1 %v8091_v58 }
0x1ebe   :  { %6993 = vmatpush1.bf16.msra.mxu1 %v9292_v40 }
0x1ebf   :  { %6994 = vmatprep.subr.bf16.mxu1 %v8091_v58 }
0x1ec2   :  { %6996 = vmatpush1.bf16.msra.mxu1 %v9296_v22 }
0x1ec3   :  { %6997 = vmatprep.subr.bf16.mxu1 %v8091_v58 }
0x1ec6   :  { %6999 = vmatpush1.bf16.msra.mxu1 %v9300_v59 }
0x1ec7   :  { %7000 = vmatprep.subr.bf16.mxu1 %v8091_v58 }
0x1eca   :  { %7002 = vmatpush1.bf16.msra.mxu1 %v9304_v15 }
0x1ecb   :  { %7003 = vmatprep.subr.bf16.mxu1 %v8091_v58 }
0x1ece   :  { %7005 = vmatpush1.bf16.msra.mxu1 %v9308_v44 }
0x1ecf   :  { %7006 = vmatprep.subr.bf16.mxu1 %v8091_v58 }
0x1ed2   :  { %7008 = vmatpush1.bf16.msra.mxu1 %v9312_v61 }
0x1ed3   :  { %7009 = vmatprep.subr.bf16.mxu1 %v8091_v58 }
0x1ed6   :  { %7011 = vmatpush1.bf16.msra.mxu1 %v9316_v39 }
0x1ed7   :  { %4343 = vmatprep.subr.mxu1 %v8082_v20 }
0x1eda   :  { %4344 = vmatpush1.msra.mxu1 %v9321_v7 }
0x1edb   :  { %4368 = vmatmul.mubr.f32.vlgmr.msra.gmra.mrb[38].mxu1 %v4147_v18  ;;  %7019 = vmatprep.subr.bf16.mxu1 %v9237_v35 }
0x1edc   :  { %7021 = vmatpush1.bf16.msra.mxu1 %v9242_v24 }
0x1edd   :  { %7023 = vmatprep.subr.bf16.mxu1 %v9245_v19 }
0x1ee0   :  { %7025 = vmatpush1.bf16.msra.mxu1 %v9110_v10 }
0x1ee1   :  { %7027 = vmatprep.subr.bf16.mxu1 %v9113_v0  ;;  %v4212_v0 = vld [vmem:[#allocation29] sm:$0x7] }
0x1ee4   :  { %7029 = vmatpush1.bf16.msra.mxu1 %v9115_v46 }
0x1ee5   :  { %7031 = vmatprep.subr.bf16.mxu1 %v9117_v2 }
0x1ee8   :  { %7033 = vmatpush1.bf16.msra.mxu1 %v9121_v21 }
0x1ee9   :  { %7035 = vmatprep.subr.bf16.mxu1 %v9124_v25  ;;  %v4217_v25 = vrot.slane %v4212_v0, %v8951_v8 }
0x1eec   :  { %7037 = vmatpush1.bf16.msra.mxu1 %v9127_v63 }
0x1eed   :  { %7039 = vmatprep.subr.bf16.mxu1 %v9130_v5 }
0x1ef0   :  { %7041 = vmatpush1.bf16.msra.mxu1 %v9135_v47 }
0x1ef1   :  { %7043 = vmatprep.subr.bf16.mxu1 %v9138_v57 }
0x1ef4   :  { %7045 = vmatpush1.bf16.msra.mxu1 %v9141_v14 }
0x1ef5   :  { %7047 = vmatprep.subr.bf16.mxu1 %v9144_v49 }
0x1ef8   :  { %7049 = vmatpush1.bf16.msra.mxu1 %v9147_v50 }
0x1ef9   :  { %7051 = vmatprep.subr.bf16.mxu1 %v9150_v12  ;;  %v4221_v12 = vrot.slane %v4212_v0, %v8991_v55 }
0x1efc   :  { %7053 = vmatpush1.bf16.msra.mxu1 %v9153_v38 }
0x1efd   :  { %7055 = vmatprep.subr.bf16.mxu1 %v9157_v4 }
0x1f00   :  { %7057 = vmatpush1.bf16.msra.mxu1 %v9160_v48 }
0x1f01   :  { %4699 = vmatprep.subr.mxu1 %v9163_v13 }
0x1f04   :  { %4700 = vmatpush1.msra.mxu1 %v9166_v37 }
0x1f05   :  { %7088 = vmatprep.subr.bf16.mxu1 %v8091_v58 }
0x1f84   :  { %v4097_v10 = vpop.f32.mrb[36].mxu1 }
0x1f85   :  { %v4098_v46 = vadd.f32 %v4097_v10, %v8966_v28  ;;  %v6582_v2 = vpop.f32.mrb[37].mxu1  ;;  %v4225_v28 = vrot.slane %v4212_v0, %v8988_v54 }
0x1f87   :  { %v4108_v21 = vrot.slane %v4098_v46, %v9066_v23 }
0x1f89   :  { %v4109_v63 = vcombine.high %v4108_v21, %v4108_v21  ;;  %v4116_v5 = vrot.slane %v4108_v21, %v9066_v23 }
0x1f8a   :  { %v4298_v47 = vpop.f32.mrb[32].mxu0 }
0x1f8b   :  { %v4123_v57 = vrot.slane %v4109_v63, %v9066_v23  ;;  %4126 = vst.msk [vmem:[#allocation35 + $0x2] sm:$0x1] %vm3272_vm8, %v4116_v5  ;;  %v4299_v14 = vadd.f32 %v4298_v47, %v4217_v25  ;;  %v4300_v49 = vpop.f32.mrb[33].mxu0 }
0x1f8c   :  { %v4301_v13 = vadd.f32 %v4300_v49, %v4221_v12  ;;  %v4445_v12 = vld [vmem:[#allocation31] sm:$0xff] }
0x1f8d   :  { %4127 = vst.msk [vmem:[#allocation35 + $0xa] sm:$0x1] %vm3272_vm8, %v4123_v57  ;;  %7443 = vtanh.f32 %v4299_v14  ;;  %v6209_v17 = vmul.f32 -1.442695, %v4299_v14 }
0x1f8e   :  { %v6210_v1 = vmul.f32 -1.442695, %v4301_v13 }
0x1f97   :  { %v7444_v50 = vpop.eup %7443 }
0x1f98   :  { %4396 = vrot.lane.b32.xlu0 %v7444_v50, %s8088_s29 }
0x1fae   :  { %v4369_v38 = vpop.f32.mrb[38].mxu1 }
0x1faf   :  { %v4370_v4 = vadd.f32 %v4369_v38, %v4225_v28  ;;  %v4371_v48 = vpop.f32.mrb[39].mxu1  ;;  %v4447_v38 = vld [vmem:[#allocation31 + $0x10] sm:$0xff] }
0x1fb0   :  { %v4448_v48 = vld [vmem:[#allocation31 + $0x18] sm:$0xff] }
0x1fb1   :  { %7445 = vtanh.f32 %v4370_v4  ;;  %v6211_v53 = vmul.f32 -1.442695, %v4370_v4 }
0x1fb2   :  { %7447 = vtanh.f32 %v4301_v13 }
0x1fb3   :  { %7449 = vpow2.f32 %v6209_v17 }
0x1fbb   :  { %v7446_v37 = vpop.eup %7445 }
0x1fbc   :  { %4430 = vrot.lane.b32.xlu1 %v7446_v37, %s8088_s29  ;;  %v7448_v18 = vpop.eup %7447 }
0x1fbd   :  { %v7450_v41 = vpop.eup %7449 }
0x1fbe   :  { %v4382_v60 = vadd.f32 1.0, %v7450_v41 }
0x1fc0   :  { %4413 = vrot.lane.b32.xlu1 %v7448_v18, %s8088_s29  ;;  %7451 = vrcp.f32 %v4382_v60 }
0x1fc1   :  { %7453 = vpow2.f32 %v6211_v53  ;;  %v4555_v53 = vld [vmem:[#allocation26 + $0x4] sm:$0x1] }
0x1fc2   :  { %7455 = vpow2.f32 %v6210_v1 }
0x1fca   :  { %v7452_v26 = vpop.eup %7451 }
0x1fcb   :  { %v7454_v6 = vpop.eup %7453  ;;  %v4394_v2 = vmul.f32 %v7452_v26, %v9225_v16 }
0x1fcc   :  { %v4384_v3 = vadd.f32 1.0, %v7454_v6  ;;  %v7456_v27 = vpop.eup %7455 }
0x1fcd   :  { %v4383_v51 = vadd.f32 1.0, %v7456_v27 }
0x1fce   :  { %7457 = vrcp.f32 %v4384_v3 }
0x1fcf   :  { %7459 = vrcp.f32 %v4383_v51 }
0x1fd8   :  { %v7458_v34 = vpop.eup %7457 }
0x1fd9   :  { %v7460_v10 = vpop.eup %7459  ;;  %v4428_v5 = vmul.f32 %v7458_v34, %v9230_v43  ;;  %v4446_v43 = vld [vmem:[#allocation31 + $0x8] sm:$0xff] }
0x1fda   :  { %v4411_v14 = vmul.f32 %v7460_v10, %v9234_v11  ;;  %v9377_v4 = vpack.c.bf16 %v4446_v43, %v4445_v12  ;;  %v9380_v11 = vpack.c.bf16 %v4448_v48, %v4447_v38 }
0x1fdc   :  { %7014 = vmatpush3.bf16.msra.mxu0 %v9377_v4 }
0x1fdd   :  { %7015 = vmatprep.subr.bf16.mxu0 %v8091_v58 }
0x1fe0   :  { %7017 = vmatpush3.bf16.msra.mxu0 %v9380_v11 }
0x1fe1   :  { %7058 = vmatprep.subr.bf16.mxu0 %v8091_v58 }
0x200a   :  { %v4397_v33 = vpop.permute.xlu0 %4396 }
0x200b   :  { %v4399_v42 = vmul.f32 %v7452_v26, %v4397_v33  ;;  %v4556_v33 = vld [vmem:[#allocation26 + $0xc] sm:$0x1] }
0x200d   :  { %4401 = vrot.lane.b32.xlu1 %v4399_v42, %s8092_s1  ;;  %v4559_v42 = vrot.slane %v4556_v33, 7 }
0x200f   :  { %v4560_v3 = vsel %vm3172_vm7, %v4559_v42, %v4555_v53 }
0x202e   :  { %v4431_v36 = vpop.permute.xlu1 %4430 }
0x202f   :  { %v4433_v32 = vmul.f32 %v7458_v34, %v4431_v36 }
0x2031   :  { %4435 = vrot.lane.b32.xlu0 %v4433_v32, %s8092_s1 }
0x2032   :  { %v4414_v0 = vpop.permute.xlu1 %4413 }
0x2033   :  { %v4416_v46 = vmul.f32 %v7460_v10, %v4414_v0 }
0x2035   :  { %4418 = vrot.lane.b32.xlu0 %v4416_v46, %s8092_s1 }
0x207f   :  { %v4402_v21 = vpop.permute.xlu1 %4401 }
0x2080   :  { %v9363_v25 = vadd.f32 %v4402_v21, %v4394_v2 }
0x2082   :  { %7461 = vtanh.f32 %v9363_v25 }
0x208c   :  { %v7462_v63 = vpop.eup %7461 }
0x208d   :  { %4407 = vrot.lane.b32.xlu0 %v7462_v63, %s8088_s29 }
0x20a3   :  { %v4436_v47 = vpop.permute.xlu0 %4435 }
0x20a4   :  { %v9368_v57 = vadd.f32 %v4436_v47, %v4428_v5 }
0x20a6   :  { %7463 = vtanh.f32 %v9368_v57 }
0x20a7   :  { %v4419_v49 = vpop.permute.xlu0 %4418 }
0x20a8   :  { %v9372_v50 = vadd.f32 %v4419_v49, %v4411_v14 }
0x20aa   :  { %7465 = vtanh.f32 %v9372_v50 }
0x20b0   :  { %v7464_v16 = vpop.eup %7463 }
0x20b1   :  { %4441 = vrot.lane.b32.xlu1 %v7464_v16, %s8088_s29 }
0x20b4   :  { %v7466_v28 = vpop.eup %7465 }
0x20b5   :  { %4424 = vrot.lane.b32.xlu1 %v7466_v28, %s8088_s29 }
0x20ff   :  { %v4408_v13 = vpop.permute.xlu0 %4407 }
0x2100   :  { %v4410_v37 = vmul.f32 %v7452_v26, %v4408_v13 }
0x2102   :  { %4563 = vrot.lane.b32.xlu1 %v4410_v37, %s8090_s17 }
0x2123   :  { %v4442_v18 = vpop.permute.xlu1 %4441 }
0x2124   :  { %v4444_v17 = vmul.f32 %v7458_v34, %v4442_v18 }
0x2126   :  { %4450 = vrot.lane.b32.xlu0 %v4444_v17, %s8092_s1  ;;  %4570 = vrot.lane.b32.xlu1 %v4444_v17, %s8093_s2 }
0x2127   :  { %v4425_v41 = vpop.permute.xlu1 %4424 }
0x2128   :  { %v4427_v60 = vmul.f32 %v7460_v10, %v4425_v41  ;;  %v4639_v10 = vld [vmem:[#allocation29] sm:$0x7] }
0x2129   :  { %v4644_v21 = vrot.slane %v4639_v10, %v8951_v8  ;;  %v4648_v49 = vrot.slane %v4639_v10, %v8991_v55 }
0x212a   :  { %4567 = vrot.lane.b32.xlu0 %v4427_v60, %s8059_s8 }
0x2174   :  { %v4564_v1 = vpop.permute.xlu1 %4563 }
0x2175   :  { %v4573_v26 = vsel %vm2848_vm4, %v4560_v3, %v4564_v1 }
0x2198   :  { %v4451_v6 = vpop.permute.xlu0 %4450  ;;  %v4571_v27 = vpop.permute.xlu1 %4570 }
0x2199   :  { %6592 = vmatmul.mubr.msk.f32.vlgmr.msra.gmra.mrb[34].mxu0 %vm469_vm1, %v4451_v6 }
0x219a   :  { %7060 = vmatpush1.bf16.msra.mxu0 %v9272_v56 }
0x219b   :  { %7061 = vmatprep.subr.bf16.mxu0 %v8091_v58 }
0x219c   :  { %v4568_v51 = vpop.permute.xlu0 %4567 }
0x219d   :  { %v4574_v34 = vsel %vm2850_vm5, %v4573_v26, %v4568_v51  ;;  %v4575_v36 = vsel %vm861_vm3, %v4568_v51, %v4571_v27 }
0x219e   :  { %7063 = vmatpush1.bf16.msra.mxu0 %v9277_v62  ;;  %6213 = vmatprep.mubr.msk.f32.mxu1 %vm2933_vm6, %v4575_v36 }
0x219f   :  { %6214 = vmatprep.mubr.msk.f32.mxu0 %vm2933_vm6, %v4575_v36  ;;  %4724 = vmatmul.mubr.f32.vlgmr.msra.gmra.mrb[40].mxu1 %v4574_v34 }
0x21a0   :  { %7064 = vmatprep.subr.bf16.mxu0 %v8091_v58  ;;  %7090 = vmatpush3.bf16.msra.mxu1 %v9377_v4 }
0x21a1   :  { %7091 = vmatprep.subr.bf16.mxu1 %v8091_v58  ;;  %6602 = vmatprep.mubr.msk.f32.mxu1 %vm8083_vm2, %v8082_v20 }
0x21a2   :  { %7066 = vmatpush1.bf16.msra.mxu0 %v9285_v29 }
0x21a3   :  { %7067 = vmatprep.subr.bf16.mxu0 %v8091_v58 }
0x21a4   :  { %7093 = vmatpush3.bf16.msra.mxu1 %v9380_v11 }
0x21a5   :  { %7134 = vmatprep.subr.bf16.mxu1 %v8091_v58 }
0x21a6   :  { %7069 = vmatpush1.bf16.msra.mxu0 %v9292_v40 }
0x21a7   :  { %7070 = vmatprep.subr.bf16.mxu0 %v8091_v58 }
0x21aa   :  { %7072 = vmatpush1.bf16.msra.mxu0 %v9296_v22 }
0x21ab   :  { %7073 = vmatprep.subr.bf16.mxu0 %v8091_v58 }
0x21ae   :  { %7075 = vmatpush1.bf16.msra.mxu0 %v9300_v59 }
0x21af   :  { %7076 = vmatprep.subr.bf16.mxu0 %v8091_v58 }
0x21b2   :  { %7078 = vmatpush1.bf16.msra.mxu0 %v9304_v15 }
0x21b3   :  { %7079 = vmatprep.subr.bf16.mxu0 %v8091_v58 }
0x21b6   :  { %7081 = vmatpush1.bf16.msra.mxu0 %v9308_v44 }
0x21b7   :  { %7082 = vmatprep.subr.bf16.mxu0 %v8091_v58 }
0x21ba   :  { %7084 = vmatpush1.bf16.msra.mxu0 %v9312_v61 }
0x21bb   :  { %7085 = vmatprep.subr.bf16.mxu0 %v8091_v58 }
0x21be   :  { %7087 = vmatpush1.bf16.msra.mxu0 %v9316_v39 }
0x21bf   :  { %4770 = vmatprep.subr.mxu0 %v8082_v20 }
0x21c2   :  { %4771 = vmatpush1.msra.mxu0 %v9321_v7 }
0x21c3   :  { %4795 = vmatmul.mubr.f32.vlgmr.msra.gmra.mrb[36].mxu0 %v4574_v34  ;;  %7095 = vmatprep.subr.bf16.mxu0 %v9237_v35 }
0x21c4   :  { %7097 = vmatpush1.bf16.msra.mxu0 %v9242_v24 }
0x21c5   :  { %7099 = vmatprep.subr.bf16.mxu0 %v9245_v19 }
0x226c   :  { %v4524_v32 = vpop.f32.mrb[34].mxu0 }
0x226d   :  { %v4525_v0 = vadd.f32 %v4524_v32, %v8969_v31  ;;  %v6593_v46 = vpop.f32.mrb[35].mxu0  ;;  %v4652_v31 = vrot.slane %v4639_v10, %v8988_v54 }
0x226f   :  { %v4535_v2 = vrot.slane %v4525_v0, %v9066_v23 }
0x2271   :  { %v4536_v63 = vcombine.high %v4535_v2, %v4535_v2  ;;  %v4543_v5 = vrot.slane %v4535_v2, %v9066_v23 }
0x2272   :  { %v4725_v47 = vpop.f32.mrb[40].mxu1 }
0x2273   :  { %v4550_v14 = vrot.slane %v4536_v63, %v9066_v23  ;;  %4553 = vst.msk [vmem:[#allocation35 + $0x3] sm:$0x1] %vm3272_vm8, %v4543_v5  ;;  %v4726_v35 = vadd.f32 %v4725_v47, %v4644_v21  ;;  %v4727_v24 = vpop.f32.mrb[41].mxu1 }
0x2274   :  { %v4728_v43 = vadd.f32 %v4727_v24, %v4648_v49 }
0x2275   :  { %4554 = vst.msk [vmem:[#allocation35 + $0xb] sm:$0x1] %vm3272_vm8, %v4550_v14  ;;  %7467 = vtanh.f32 %v4726_v35  ;;  %v6215_v13 = vmul.f32 -1.442695, %v4726_v35 }
0x2276   :  { %v6216_v42 = vmul.f32 -1.442695, %v4728_v43 }
0x227f   :  { %v7468_v19 = vpop.eup %7467 }
0x2280   :  { %4823 = vrot.lane.b32.xlu1 %v7468_v19, %s8088_s29  ;;  %v5012_v19 = vld [vmem:[#allocation28 + $0x48] sm:$0xff] }
0x2296   :  { %v4796_v16 = vpop.f32.mrb[36].mxu0 }
0x2297   :  { %v4797_v28 = vadd.f32 %v4796_v16, %v4652_v31  ;;  %v4798_v12 = vpop.f32.mrb[37].mxu0  ;;  %v5016_v31 = vld [vmem:[#allocation28 + $0x68] sm:$0xff]  ;;  %v5019_v16 = vld [vmem:[#allocation28 + $0x80] sm:$0xff] }
0x2298   :  { %v5018_v12 = vld [vmem:[#allocation28 + $0x78] sm:$0xff] }
0x2299   :  { %7469 = vtanh.f32 %v4797_v28  ;;  %v6217_v33 = vmul.f32 -1.442695, %v4797_v28  ;;  %v5015_v28 = vld [vmem:[#allocation28 + $0x60] sm:$0xff] }
0x229a   :  { %7471 = vtanh.f32 %v4728_v43  ;;  %v5022_v43 = vld [vmem:[#allocation28 + $0x98] sm:$0xff] }
0x229b   :  { %7473 = vpow2.f32 %v6215_v13 }
0x22a3   :  { %v7470_v38 = vpop.eup %7469 }
0x22a4   :  { %4857 = vrot.lane.b32.xlu0 %v7470_v38, %s8088_s29  ;;  %v7472_v48 = vpop.eup %7471  ;;  %v5025_v38 = vld [vmem:[#allocation28 + $0xb0] sm:$0xff] }
0x22a5   :  { %v7474_v37 = vpop.eup %7473  ;;  %v9476_v13 = vpack.c.bf16 %v5025_v38, %v5022_v43 }
0x22a6   :  { %v4809_v18 = vadd.f32 1.0, %v7474_v37  ;;  %v5021_v37 = vld [vmem:[#allocation28 + $0x90] sm:$0xff] }
0x22a8   :  { %4840 = vrot.lane.b32.xlu0 %v7472_v48, %s8088_s29  ;;  %7475 = vrcp.f32 %v4809_v18  ;;  %v9473_v48 = vpack.c.bf16 %v5018_v12, %v5015_v28  ;;  %v5024_v18 = vld [vmem:[#allocation28 + $0xa8] sm:$0xff]  ;;  %v5055_v12 = vld [vmem:[#allocation28 + $0x1a0] sm:$0xff] }
0x22a9   :  { %7477 = vpow2.f32 %v6217_v33  ;;  %v9479_v33 = vpack.c.bf16 %v5024_v18, %v5021_v37  ;;  %v5052_v28 = vld [vmem:[#allocation28 + $0x188] sm:$0xff]  ;;  %v5051_v37 = vld [vmem:[#allocation28 + $0x180] sm:$0xff]  ;;  %v5054_v18 = vld [vmem:[#allocation28 + $0x198] sm:$0xff] }
0x22aa   :  { %7479 = vpow2.f32 %v6216_v42  ;;  %v9508_v38 = vpack.c.bf16 %v5055_v12, %v5052_v28 }
0x22b2   :  { %v9438_v17 = vpop.eup %7475 }
0x22b3   :  { %v7478_v53 = vpop.eup %7477  ;;  %v4821_v10 = vmul.f32 %v9438_v17, %v9363_v25 }
0x22b4   :  { %v4811_v1 = vadd.f32 1.0, %v7478_v53  ;;  %v7480_v6 = vpop.eup %7479  ;;  %v5027_v53 = vld [vmem:[#allocation28 + $0xc0] sm:$0xff] }
0x22b5   :  { %v4810_v3 = vadd.f32 1.0, %v7480_v6  ;;  %v5034_v6 = vld [vmem:[#allocation28 + $0xf8] sm:$0xff] }
0x22b6   :  { %7481 = vrcp.f32 %v4811_v1  ;;  %v5030_v1 = vld [vmem:[#allocation28 + $0xd8] sm:$0xff] }
0x22b7   :  { %7483 = vrcp.f32 %v4810_v3  ;;  %v5037_v3 = vld [vmem:[#allocation28 + $0x110] sm:$0xff] }
0x22c0   :  { %v9442_v26 = vpop.eup %7481 }
0x22c1   :  { %v9446_v34 = vpop.eup %7483  ;;  %v4855_v21 = vmul.f32 %v9442_v26, %v9368_v57  ;;  %v5009_v57 = vld [vmem:[#allocation28 + $0x30] sm:$0xff] }
0x22c2   :  { %v4838_v47 = vmul.f32 %v9446_v34, %v9372_v50  ;;  %v9468_v49 = vpack.c.bf16 %v5012_v19, %v5009_v57  ;;  %v9470_v50 = vpack.c.bf16 %v5019_v16, %v5016_v31  ;;  %v5045_v31 = vld [vmem:[#allocation28 + $0x150] sm:$0xff]  ;;  %v5048_v16 = vld [vmem:[#allocation28 + $0x168] sm:$0xff] }
0x22c3   :  { %v9505_v43 = vpack.c.bf16 %v5048_v16, %v5045_v31 }
0x22c4   :  { %7101 = vmatpush1.bf16.msra.mxu0 %v9468_v49 }
0x22c5   :  { %7103 = vmatprep.subr.bf16.mxu0 %v9470_v50 }
0x22c8   :  { %7105 = vmatpush1.bf16.msra.mxu0 %v9473_v48 }
0x22c9   :  { %7107 = vmatprep.subr.bf16.mxu0 %v9476_v13 }
0x22cc   :  { %7109 = vmatpush1.bf16.msra.mxu0 %v9479_v33 }
0x22f2   :  { %v4824_v41 = vpop.permute.xlu1 %4823 }
0x22f3   :  { %v4826_v60 = vmul.f32 %v9438_v17, %v4824_v41  ;;  %v5028_v41 = vld [vmem:[#allocation28 + $0xc8] sm:$0xff] }
0x22f5   :  { %4828 = vrot.lane.b32.xlu0 %v4826_v60, %s8092_s1  ;;  %v5031_v60 = vld [vmem:[#allocation28 + $0xe0] sm:$0xff] }
0x22f6   :  { %v9482_v42 = vpack.c.bf16 %v5031_v60, %v5028_v41  ;;  %v9511_v41 = vpack.c.bf16 %v5054_v18, %v5051_v37  ;;  %v5058_v60 = vld [vmem:[#allocation28 + $0x1b8] sm:$0xff] }
0x22f8   :  { %7111 = vmatprep.subr.bf16.mxu0 %v9482_v42 }
0x2316   :  { %v4858_v27 = vpop.permute.xlu0 %4857 }
0x2317   :  { %v4860_v51 = vmul.f32 %v9442_v26, %v4858_v27 }
0x2319   :  { %4862 = vrot.lane.b32.xlu1 %v4860_v51, %s8092_s1 }
0x231a   :  { %v4841_v36 = vpop.permute.xlu0 %4840 }
0x231b   :  { %v4843_v32 = vmul.f32 %v9446_v34, %v4841_v36  ;;  %v9486_v36 = vpack.c.bf16 %v5030_v1, %v5027_v53  ;;  %v5061_v53 = vld [vmem:[#allocation28 + $0x1d0] sm:$0xff] }
0x231c   :  { %v9515_v1 = vpack.c.bf16 %v5061_v53, %v5058_v60 }
0x231d   :  { %4845 = vrot.lane.b32.xlu1 %v4843_v32, %s8092_s1  ;;  %v9489_v32 = vpack.c.bf16 %v5037_v3, %v5034_v6  ;;  %7113 = vmatpush1.bf16.msra.mxu0 %v9486_v36  ;;  %v5057_v6 = vld [vmem:[#allocation28 + $0x1b0] sm:$0xff]  ;;  %v5060_v3 = vld [vmem:[#allocation28 + $0x1c8] sm:$0xff] }
0x231f   :  { %7115 = vmatprep.subr.bf16.mxu0 %v9489_v32 }
0x2367   :  { %v4829_v0 = vpop.permute.xlu0 %4828 }
0x2368   :  { %v9452_v46 = vadd.f32 %v4829_v0, %v4821_v10  ;;  %v5033_v10 = vld [vmem:[#allocation28 + $0xf0] sm:$0xff]  ;;  %v5036_v0 = vld [vmem:[#allocation28 + $0x108] sm:$0xff] }
0x236a   :  { %7485 = vtanh.f32 %v9452_v46 }
0x2374   :  { %v7486_v2 = vpop.eup %7485 }
0x2375   :  { %4834 = vrot.lane.b32.xlu1 %v7486_v2, %s8088_s29  ;;  %v5040_v2 = vld [vmem:[#allocation28 + $0x128] sm:$0xff] }
0x238b   :  { %v4863_v63 = vpop.permute.xlu1 %4862 }
0x238c   :  { %v9458_v5 = vadd.f32 %v4863_v63, %v4855_v21  ;;  %v5043_v21 = vld [vmem:[#allocation28 + $0x140] sm:$0xff]  ;;  %v9493_v63 = vpack.c.bf16 %v5036_v0, %v5033_v10 }
0x238d   :  { %v9524_v10 = vld [vmem:[#allocation28 + $0x1e0] sm:$0xff] }
0x238e   :  { %7487 = vtanh.f32 %v9458_v5  ;;  %7117 = vmatpush1.bf16.msra.mxu0 %v9493_v63 }
0x238f   :  { %v4846_v25 = vpop.permute.xlu1 %4845 }
0x2390   :  { %v9463_v14 = vadd.f32 %v4846_v25, %v4838_v47  ;;  %v5039_v47 = vld [vmem:[#allocation28 + $0x120] sm:$0xff]  ;;  %v5042_v25 = vld [vmem:[#allocation28 + $0x138] sm:$0xff] }
0x2391   :  { %v9499_v57 = vpack.c.bf16 %v5042_v25, %v5039_v47  ;;  %v4983_v25 = vld [vmem:[#allocation26 + $0xd] sm:$0x1] }
0x2392   :  { %7489 = vtanh.f32 %v9463_v14 }
0x2398   :  { %v7488_v35 = vpop.eup %7487 }
0x2399   :  { %4868 = vrot.lane.b32.xlu0 %v7488_v35, %s8088_s29  ;;  %v5046_v35 = vld [vmem:[#allocation28 + $0x158] sm:$0xff] }
0x239c   :  { %v7490_v24 = vpop.eup %7489 }
0x239d   :  { %4851 = vrot.lane.b32.xlu0 %v7490_v24, %s8088_s29  ;;  %v5049_v24 = vld [vmem:[#allocation28 + $0x170] sm:$0xff] }
0x239e   :  { %v9502_v19 = vpack.c.bf16 %v5049_v24, %v5046_v35  ;;  %v4986_v35 = vrot.slane %v4983_v25, 7  ;;  %v4982_v24 = vld [vmem:[#allocation26 + $0x5] sm:$0x1] }
0x23a0   :  { %v4987_v28 = vsel %vm3172_vm7, %v4986_v35, %v4982_v24 }
0x23e7   :  { %v4835_v27 = vpop.permute.xlu1 %4834 }
0x23e8   :  { %v4837_v51 = vmul.f32 %v9438_v17, %v4835_v27  ;;  %v9496_v17 = vpack.c.bf16 %v5043_v21, %v5040_v2  ;;  %v9518_v27 = vpack.c.bf16 %v5060_v3, %v5057_v6 }
0x23ea   :  { %4990 = vrot.lane.b32.xlu0 %v4837_v51, %s8090_s17  ;;  %7119 = vmatprep.subr.bf16.mxu0 %v9496_v17  ;;  %v9521_v51 = vld [vmem:[#allocation28 + $0x1e8] sm:$0xff] }
0x23eb   :  { %7121 = vmatpush1.bf16.msra.mxu0 %v9499_v57 }
0x23ec   :  { %7123 = vmatprep.subr.bf16.mxu0 %v9502_v19 }
0x23ef   :  { %7125 = vmatpush1.bf16.msra.mxu0 %v9505_v43 }
0x23f0   :  { %7127 = vmatprep.subr.bf16.mxu0 %v9508_v38 }
0x23f3   :  { %7129 = vmatpush1.bf16.msra.mxu0 %v9511_v41 }
0x23f4   :  { %7131 = vmatprep.subr.bf16.mxu0 %v9515_v1 }
0x23f7   :  { %7133 = vmatpush1.bf16.msra.mxu0 %v9518_v27 }
0x23f8   :  { %5126 = vmatprep.subr.mxu0 %v9521_v51 }
0x23fb   :  { %5127 = vmatpush1.msra.mxu0 %v9524_v10 }
0x23fc   :  { %7164 = vmatprep.subr.bf16.mxu0 %v8091_v58 }
0x240b   :  { %v4869_v0 = vpop.permute.xlu0 %4868 }
0x240c   :  { %v4871_v2 = vmul.f32 %v9442_v26, %v4869_v0 }
0x240e   :  { %4877 = vrot.lane.b32.xlu1 %v4871_v2, %s8092_s1  ;;  %4997 = vrot.lane.b32.xlu0 %v4871_v2, %s8093_s2 }
0x240f   :  { %v4852_v21 = vpop.permute.xlu0 %4851 }
0x2410   :  { %v4854_v47 = vmul.f32 %v9446_v34, %v4852_v21 }
0x2412   :  { %4994 = vrot.lane.b32.xlu1 %v4854_v47, %s8059_s8 }
0x245c   :  { %v4991_v31 = vpop.permute.xlu0 %4990 }
0x245d   :  { %v5000_v26 = vsel %vm2848_vm4, %v4987_v28, %v4991_v31 }
0x2480   :  { %v4878_v16 = vpop.permute.xlu1 %4877  ;;  %v4998_v12 = vpop.permute.xlu0 %4997 }
0x2481   :  { %6603 = vmatmul.mubr.msk.f32.vlgmr.msra.gmra.mrb[42].mxu1 %vm469_vm1, %v4878_v16 }
0x2482   :  { %7136 = vmatpush1.bf16.msra.mxu1 %v9272_v56 }
0x2483   :  { %7137 = vmatprep.subr.bf16.mxu1 %v8091_v58 }
0x2484   :  { %v4995_v37 = vpop.permute.xlu1 %4994 }
0x2485   :  { %v5001_v34 = vsel %vm2850_vm5, %v5000_v26, %v4995_v37  ;;  %v5002_v18 = vsel %vm861_vm3, %v4995_v37, %v4998_v12 }
0x2486   :  { %7139 = vmatpush1.bf16.msra.mxu1 %v9277_v62  ;;  %6219 = vmatprep.mubr.msk.f32.mxu0 %vm2933_vm6, %v5002_v18  ;;  %v5066_v62 = vld [vmem:[#allocation29] sm:$0x7] }
0x2487   :  { %6220 = vmatprep.mubr.msk.f32.mxu1 %vm2933_vm6, %v5002_v18  ;;  %5151 = vmatmul.mubr.f32.vlgmr.msra.gmra.mrb[38].mxu0 %v5001_v34  ;;  %v5075_v60 = vrot.slane %v5066_v62, %v8991_v55 }
0x2488   :  { %7140 = vmatprep.subr.bf16.mxu1 %v8091_v58  ;;  %7166 = vmatpush3.bf16.msra.mxu0 %v9377_v4 }
0x2489   :  { %7167 = vmatprep.subr.bf16.mxu0 %v8091_v58  ;;  %6613 = vmatprep.mubr.msk.f32.mxu0 %vm8083_vm2, %v8082_v20 }
0x248a   :  { %7142 = vmatpush1.bf16.msra.mxu1 %v9285_v29 }
0x248b   :  { %7143 = vmatprep.subr.bf16.mxu1 %v8091_v58 }
0x248c   :  { %7169 = vmatpush3.bf16.msra.mxu0 %v9380_v11 }
0x248d   :  { %7210 = vmatprep.subr.bf16.mxu0 %v8091_v58 }
0x248e   :  { %7145 = vmatpush1.bf16.msra.mxu1 %v9292_v40 }
0x248f   :  { %7146 = vmatprep.subr.bf16.mxu1 %v8091_v58 }
0x2492   :  { %7148 = vmatpush1.bf16.msra.mxu1 %v9296_v22 }
0x2493   :  { %7149 = vmatprep.subr.bf16.mxu1 %v8091_v58 }
0x2496   :  { %7151 = vmatpush1.bf16.msra.mxu1 %v9300_v59  ;;  %v5071_v59 = vrot.slane %v5066_v62, %v8951_v8 }
0x2497   :  { %7152 = vmatprep.subr.bf16.mxu1 %v8091_v58 }
0x249a   :  { %7154 = vmatpush1.bf16.msra.mxu1 %v9304_v15 }
0x249b   :  { %7155 = vmatprep.subr.bf16.mxu1 %v8091_v58 }
0x249e   :  { %7157 = vmatpush1.bf16.msra.mxu1 %v9308_v44 }
0x249f   :  { %7158 = vmatprep.subr.bf16.mxu1 %v8091_v58 }
0x24a2   :  { %7160 = vmatpush1.bf16.msra.mxu1 %v9312_v61 }
0x24a3   :  { %7161 = vmatprep.subr.bf16.mxu1 %v8091_v58 }
0x24a6   :  { %7163 = vmatpush1.bf16.msra.mxu1 %v9316_v39 }
0x24a7   :  { %5197 = vmatprep.subr.mxu1 %v8082_v20 }
0x24aa   :  { %5198 = vmatpush1.msra.mxu1 %v9321_v7 }
0x24ab   :  { %5222 = vmatmul.mubr.f32.vlgmr.msra.gmra.mrb[44].mxu1 %v5001_v34 }
0x2554   :  { %v4951_v56 = vpop.f32.mrb[42].mxu1 }
0x2555   :  { %v4952_v29 = vadd.f32 %v4951_v56, %v8975_v30  ;;  %v6604_v40 = vpop.f32.mrb[43].mxu1  ;;  %v5079_v30 = vrot.slane %v5066_v62, %v8988_v54 }
0x2557   :  { %v4962_v22 = vrot.slane %v4952_v29, %v9066_v23 }
0x2559   :  { %v4963_v15 = vcombine.high %v4962_v22, %v4962_v22  ;;  %v4970_v44 = vrot.slane %v4962_v22, %v9066_v23 }
0x255a   :  { %v5152_v61 = vpop.f32.mrb[38].mxu0 }
0x255b   :  { %v4977_v39 = vrot.slane %v4963_v15, %v9066_v23  ;;  %4980 = vst.msk [vmem:[#allocation35 + $0x4] sm:$0x1] %vm3272_vm8, %v4970_v44  ;;  %v5153_v4 = vadd.f32 %v5152_v61, %v5071_v59  ;;  %v5154_v7 = vpop.f32.mrb[39].mxu0 }
0x255c   :  { %v5155_v0 = vadd.f32 %v5154_v7, %v5075_v60 }
0x255d   :  { %4981 = vst.msk [vmem:[#allocation35 + $0xc] sm:$0x1] %vm3272_vm8, %v4977_v39  ;;  %7491 = vtanh.f32 %v5153_v4  ;;  %v6221_v47 = vmul.f32 -1.442695, %v5153_v4 }
0x255e   :  { %v6222_v26 = vmul.f32 -1.442695, %v5155_v0 }
0x2567   :  { %v7492_v11 = vpop.eup %7491 }
0x2568   :  { %5250 = vrot.lane.b32.xlu0 %v7492_v11, %s8088_s29 }
0x257e   :  { %v5223_v53 = vpop.f32.mrb[44].mxu1 }
0x257f   :  { %v5224_v6 = vadd.f32 %v5223_v53, %v5079_v30  ;;  %v5225_v3 = vpop.f32.mrb[45].mxu1 }
0x2581   :  { %7493 = vtanh.f32 %v5224_v6  ;;  %v6223_v28 = vmul.f32 -1.442695, %v5224_v6  ;;  %v5434_v6 = vld [vmem:[#allocation28 + $0x20] sm:$0xff] }
0x2582   :  { %7495 = vtanh.f32 %v5155_v0 }
0x2583   :  { %7497 = vpow2.f32 %v6221_v47 }
0x258b   :  { %v7494_v2 = vpop.eup %7493 }
0x258c   :  { %5284 = vrot.lane.b32.xlu1 %v7494_v2, %s8088_s29  ;;  %v7496_v21 = vpop.eup %7495  ;;  %v5430_v2 = vld [vmem:[#allocation28] sm:$0xff] }
0x258d   :  { %v7498_v25 = vpop.eup %7497 }
0x258e   :  { %v5236_v35 = vadd.f32 1.0, %v7498_v25  ;;  %v5437_v25 = vld [vmem:[#allocation28 + $0x38] sm:$0xff] }
0x2590   :  { %5267 = vrot.lane.b32.xlu1 %v7496_v21, %s8088_s29  ;;  %7499 = vrcp.f32 %v5236_v35  ;;  %v5433_v21 = vld [vmem:[#allocation28 + $0x18] sm:$0xff] }
0x2591   :  { %7501 = vpow2.f32 %v6223_v28  ;;  %v7172_v47 = vpack.c.bf16 %v5433_v21, %v5430_v2  ;;  %v5492_v21 = vld [vmem:[#allocation28 + $0x1f0] sm:$0xff] }
0x2592   :  { %7503 = vpow2.f32 %v6222_v26 }
0x259a   :  { %v7500_v24 = vpop.eup %7499 }
0x259b   :  { %v7502_v12 = vpop.eup %7501  ;;  %v5248_v15 = vmul.f32 %v7500_v24, %v9452_v46  ;;  %v5431_v46 = vld [vmem:[#allocation28 + $0x8] sm:$0xff] }
0x259c   :  { %v5238_v37 = vadd.f32 1.0, %v7502_v12  ;;  %v7504_v34 = vpop.eup %7503  ;;  %v7170_v3 = vpack.c.bf16 %v5434_v6, %v5431_v46  ;;  %v5480_v46 = vld [vmem:[#allocation28 + $0x190] sm:$0xff]  ;;  %v5483_v6 = vld [vmem:[#allocation28 + $0x1a8] sm:$0xff] }
0x259d   :  { %v5237_v18 = vadd.f32 1.0, %v7504_v34  ;;  %v5450_v34 = vld [vmem:[#allocation28 + $0xa0] sm:$0xff] }
0x259e   :  { %7505 = vrcp.f32 %v5238_v37  ;;  %7171 = vmatprep.subr.bf16.mxu1 %v7170_v3  ;;  %v7235_v3 = vpack.c.bf16 %v5483_v6, %v5480_v46 }
0x259f   :  { %7507 = vrcp.f32 %v5237_v18  ;;  %7173 = vmatpush1.bf16.msra.mxu1 %v7172_v47  ;;  %v5453_v18 = vld [vmem:[#allocation28 + $0xb8] sm:$0xff] }
0x25a8   :  { %v7506_v56 = vpop.eup %7505 }
0x25a9   :  { %v7508_v40 = vpop.eup %7507  ;;  %v5282_v4 = vmul.f32 %v7506_v56, %v9458_v5 }
0x25aa   :  { %v5265_v30 = vmul.f32 %v7508_v40, %v9463_v14  ;;  %v5440_v14 = vld [vmem:[#allocation28 + $0x50] sm:$0xff] }
0x25ab   :  { %v7174_v35 = vpack.c.bf16 %v5440_v14, %v5437_v25  ;;  %v5493_v25 = vld [vmem:[#allocation29] sm:$0x7] }
0x25ad   :  { %7175 = vmatprep.subr.bf16.mxu1 %v7174_v35 }
0x25ae   :  { %7177 = vmatpush1.bf16.msra.mxu1 %v9468_v49 }
0x25af   :  { %7179 = vmatprep.subr.bf16.mxu1 %v9470_v50 }
0x25b2   :  { %7181 = vmatpush1.bf16.msra.mxu1 %v9473_v48 }
0x25b3   :  { %7183 = vmatprep.subr.bf16.mxu1 %v9476_v13 }
0x25b6   :  { %7185 = vmatpush1.bf16.msra.mxu1 %v9479_v33  ;;  %v5410_v33 = vld [vmem:[#allocation26 + $0xe] sm:$0x1] }
0x25b7   :  { %7187 = vmatprep.subr.bf16.mxu1 %v9482_v42  ;;  %v5432_v42 = vld [vmem:[#allocation28 + $0x10] sm:$0xff] }
0x25ba   :  { %7189 = vmatpush1.bf16.msra.mxu1 %v9486_v36  ;;  %v5435_v36 = vld [vmem:[#allocation28 + $0x28] sm:$0xff] }
0x25bb   :  { %7191 = vmatprep.subr.bf16.mxu1 %v9489_v32  ;;  %v5413_v32 = vrot.slane %v5410_v33, 7 }
0x25be   :  { %7193 = vmatpush1.bf16.msra.mxu1 %v9493_v63  ;;  %v5409_v63 = vld [vmem:[#allocation26 + $0x6] sm:$0x1] }
0x25bf   :  { %7195 = vmatprep.subr.bf16.mxu1 %v9496_v17  ;;  %v9621_v17 = vpack.c.bf16 %v5435_v36, %v5432_v42 }
0x25c2   :  { %7197 = vmatpush1.bf16.msra.mxu1 %v9499_v57  ;;  %v5438_v57 = vld [vmem:[#allocation28 + $0x40] sm:$0xff] }
0x25c3   :  { %7199 = vmatprep.subr.bf16.mxu1 %v9502_v19  ;;  %v5441_v19 = vld [vmem:[#allocation28 + $0x58] sm:$0xff] }
0x25c6   :  { %7201 = vmatpush1.bf16.msra.mxu1 %v9505_v43 }
0x25c7   :  { %7203 = vmatprep.subr.bf16.mxu1 %v9508_v38 }
0x25ca   :  { %7205 = vmatpush1.bf16.msra.mxu1 %v9511_v41  ;;  %v5414_v41 = vsel %vm3172_vm7, %v5413_v32, %v5409_v63 }
0x25cb   :  { %7207 = vmatprep.subr.bf16.mxu1 %v9515_v1  ;;  %v7214_v1 = vpack.c.bf16 %v5441_v19, %v5438_v57 }
0x25ce   :  { %7209 = vmatpush1.bf16.msra.mxu1 %v9518_v27  ;;  %v5444_v27 = vld [vmem:[#allocation28 + $0x70] sm:$0xff] }
0x25cf   :  { %5553 = vmatprep.subr.mxu1 %v9521_v51  ;;  %v5447_v51 = vld [vmem:[#allocation28 + $0x88] sm:$0xff] }
0x25d0   :  { %v7217_v37 = vpack.c.bf16 %v5447_v51, %v5444_v27 }
0x25d2   :  { %5554 = vmatpush1.msra.mxu1 %v9524_v10 }
0x25d3   :  { %7240 = vmatprep.subr.bf16.mxu1 %v8091_v58 }
0x25da   :  { %v5251_v31 = vpop.permute.xlu0 %5250 }
0x25db   :  { %v5253_v16 = vmul.f32 %v7500_v24, %v5251_v31 }
0x25dd   :  { %5255 = vrot.lane.b32.xlu1 %v5253_v16, %s8092_s1 }
0x25fe   :  { %v5285_v62 = vpop.permute.xlu1 %5284 }
0x25ff   :  { %v5287_v29 = vmul.f32 %v7506_v56, %v5285_v62  ;;  %v5456_v62 = vld [vmem:[#allocation28 + $0xd0] sm:$0xff] }
0x2601   :  { %5289 = vrot.lane.b32.xlu0 %v5287_v29, %s8092_s1  ;;  %v5459_v29 = vld [vmem:[#allocation28 + $0xe8] sm:$0xff] }
0x2602   :  { %v5268_v22 = vpop.permute.xlu1 %5267 }
0x2603   :  { %v5270_v59 = vmul.f32 %v7508_v40, %v5268_v22  ;;  %v5462_v22 = vld [vmem:[#allocation28 + $0x100] sm:$0xff] }
0x2605   :  { %5272 = vrot.lane.b32.xlu0 %v5270_v59, %s8092_s1  ;;  %v5465_v59 = vld [vmem:[#allocation28 + $0x118] sm:$0xff] }
0x264f   :  { %v5256_v44 = vpop.permute.xlu1 %5255 }
0x2650   :  { %v9583_v61 = vadd.f32 %v5256_v44, %v5248_v15  ;;  %v7226_v15 = vpack.c.bf16 %v5465_v59, %v5462_v22  ;;  %v5468_v44 = vld [vmem:[#allocation28 + $0x130] sm:$0xff] }
0x2652   :  { %7509 = vtanh.f32 %v9583_v61 }
0x265c   :  { %v7510_v39 = vpop.eup %7509 }
0x265d   :  { %5261 = vrot.lane.b32.xlu0 %v7510_v39, %s8088_s29  ;;  %v5471_v39 = vld [vmem:[#allocation28 + $0x148] sm:$0xff] }
0x2673   :  { %v5290_v7 = vpop.permute.xlu0 %5289 }
0x2674   :  { %v9588_v11 = vadd.f32 %v5290_v7, %v5282_v4  ;;  %v7229_v4 = vpack.c.bf16 %v5471_v39, %v5468_v44  ;;  %v5474_v7 = vld [vmem:[#allocation28 + $0x160] sm:$0xff] }
0x2676   :  { %7511 = vtanh.f32 %v9588_v11 }
0x2677   :  { %v5273_v60 = vpop.permute.xlu0 %5272 }
0x2678   :  { %v9592_v53 = vadd.f32 %v5273_v60, %v5265_v30  ;;  %v5477_v30 = vld [vmem:[#allocation28 + $0x178] sm:$0xff] }
0x2679   :  { %v7232_v60 = vpack.c.bf16 %v5477_v30, %v5474_v7 }
0x267a   :  { %7513 = vtanh.f32 %v9592_v53 }
0x2680   :  { %v7512_v0 = vpop.eup %7511 }
0x2681   :  { %5295 = vrot.lane.b32.xlu1 %v7512_v0, %s8088_s29  ;;  %v5486_v0 = vld [vmem:[#allocation28 + $0x1c0] sm:$0xff] }
0x2684   :  { %v7514_v5 = vpop.eup %7513 }
0x2685   :  { %5278 = vrot.lane.b32.xlu1 %v7514_v5, %s8088_s29  ;;  %v5489_v5 = vld [vmem:[#allocation28 + $0x1d8] sm:$0xff] }
0x2686   :  { %v7238_v2 = vpack.c.bf16 %v5489_v5, %v5486_v0 }
0x26cf   :  { %v5262_v31 = vpop.permute.xlu0 %5261 }
0x26d0   :  { %v5264_v16 = vmul.f32 %v7500_v24, %v5262_v31 }
0x26d2   :  { %5417 = vrot.lane.b32.xlu1 %v5264_v16, %s8090_s17  ;;  %v5498_v16 = vrot.slane %v5493_v25, %v8951_v8  ;;  %v5506_v8 = vrot.slane %v5493_v25, %v8988_v54 }
0x26f3   :  { %v5296_v49 = vpop.permute.xlu1 %5295 }
0x26f4   :  { %v5298_v50 = vmul.f32 %v7506_v56, %v5296_v49  ;;  %v7220_v56 = vpack.c.bf16 %v5453_v18, %v5450_v34  ;;  %v5502_v49 = vrot.slane %v5493_v25, %v8991_v55  ;;  %v5836_v25 = vld [vmem:[#allocation26 + $0x7] sm:$0x1] }
0x26f6   :  { %5304 = vrot.lane.b32.xlu0 %v5298_v50, %s8092_s1  ;;  %5424 = vrot.lane.b32.xlu1 %v5298_v50, %s8093_s2 }
0x26f7   :  { %v5279_v48 = vpop.permute.xlu1 %5278 }
0x26f8   :  { %v5281_v13 = vmul.f32 %v7508_v40, %v5279_v48  ;;  %v7223_v40 = vpack.c.bf16 %v5459_v29, %v5456_v62 }
0x26fa   :  { %5421 = vrot.lane.b32.xlu0 %v5281_v13, %s8059_s8 }
0x2744   :  { %v5418_v43 = vpop.permute.xlu1 %5417 }
0x2745   :  { %v5427_v10 = vsel %vm2848_vm4, %v5414_v41, %v5418_v43 }
0x2768   :  { %v5305_v38 = vpop.permute.xlu0 %5304  ;;  %v5425_v24 = vpop.permute.xlu1 %5424 }
0x2769   :  { %6614 = vmatmul.mubr.msk.f32.vlgmr.msra.gmra.mrb[40].mxu0 %vm469_vm1, %v5305_v38 }
0x276a   :  { %7212 = vmatpush1.bf16.msra.mxu0 %v9621_v17 }
0x276b   :  { %7213 = vmatprep.subr.bf16.mxu0 %v8091_v58 }
0x276c   :  { %v5422_v28 = vpop.permute.xlu0 %5421 }
0x276d   :  { %v5428_v26 = vsel %vm2850_vm5, %v5427_v10, %v5422_v28  ;;  %v5429_v12 = vsel %vm861_vm3, %v5422_v28, %v5425_v24 }
0x276e   :  { %7215 = vmatpush1.bf16.msra.mxu0 %v7214_v1  ;;  %6225 = vmatprep.mubr.msk.f32.mxu1 %vm2933_vm6, %v5429_v12 }
0x276f   :  { %6226 = vmatprep.mubr.msk.f32.mxu0 %vm2933_vm6, %v5429_v12  ;;  %5578 = vmatmul.mubr.f32.vlgmr.msra.gmra.mrb[46].mxu1 %v5428_v26 }
0x2770   :  { %7216 = vmatprep.subr.bf16.mxu0 %v8091_v58  ;;  %6624 = vmatprep.mubr.msk.f32.mxu1 %vm8083_vm2, %v8082_v20 }
0x2772   :  { %7218 = vmatpush1.bf16.msra.mxu0 %v7217_v37 }
0x2773   :  { %7219 = vmatprep.subr.bf16.mxu0 %v8091_v58 }
0x2776   :  { %7221 = vmatpush1.bf16.msra.mxu0 %v7220_v56 }
0x2777   :  { %7222 = vmatprep.subr.bf16.mxu0 %v8091_v58 }
0x277a   :  { %7224 = vmatpush1.bf16.msra.mxu0 %v7223_v40 }
0x277b   :  { %7225 = vmatprep.subr.bf16.mxu0 %v8091_v58 }
0x277e   :  { %7227 = vmatpush1.bf16.msra.mxu0 %v7226_v15 }
0x277f   :  { %7228 = vmatprep.subr.bf16.mxu0 %v8091_v58 }
0x2782   :  { %7230 = vmatpush1.bf16.msra.mxu0 %v7229_v4 }
0x2783   :  { %7231 = vmatprep.subr.bf16.mxu0 %v8091_v58 }
0x2786   :  { %7233 = vmatpush1.bf16.msra.mxu0 %v7232_v60 }
0x2787   :  { %7234 = vmatprep.subr.bf16.mxu0 %v8091_v58 }
0x278a   :  { %7236 = vmatpush1.bf16.msra.mxu0 %v7235_v3 }
0x278b   :  { %7237 = vmatprep.subr.bf16.mxu0 %v8091_v58 }
0x278e   :  { %7239 = vmatpush1.bf16.msra.mxu0 %v7238_v2 }
0x278f   :  { %5624 = vmatprep.subr.mxu0 %v8082_v20 }
0x2792   :  { %5625 = vmatpush1.msra.mxu0 %v5492_v21 }
0x2793   :  { %5649 = vmatmul.mubr.f32.vlgmr.msra.gmra.mrb[42].mxu0 %v5428_v26  ;;  %7246 = vmatprep.subr.bf16.mxu0 %v8091_v58 }
0x2794   :  { %7248 = vmatpush1.bf16.msra.mxu0 %v9621_v17 }
0x2795   :  { %7249 = vmatprep.subr.bf16.mxu0 %v8091_v58 }
0x2798   :  { %7251 = vmatpush1.bf16.msra.mxu0 %v7214_v1 }
0x2799   :  { %7252 = vmatprep.subr.bf16.mxu0 %v8091_v58 }
0x279c   :  { %7254 = vmatpush1.bf16.msra.mxu0 %v7217_v37 }
0x279d   :  { %7255 = vmatprep.subr.bf16.mxu0 %v8091_v58 }
0x27a0   :  { %7257 = vmatpush1.bf16.msra.mxu0 %v7220_v56 }
0x27a1   :  { %7258 = vmatprep.subr.bf16.mxu0 %v8091_v58 }
0x27a4   :  { %7260 = vmatpush1.bf16.msra.mxu0 %v7223_v40 }
0x27a5   :  { %7261 = vmatprep.subr.bf16.mxu0 %v8091_v58 }
0x27a8   :  { %7263 = vmatpush1.bf16.msra.mxu0 %v7226_v15 }
0x27a9   :  { %7264 = vmatprep.subr.bf16.mxu0 %v8091_v58 }
0x27ac   :  { %7266 = vmatpush1.bf16.msra.mxu0 %v7229_v4 }
0x27ad   :  { %7267 = vmatprep.subr.bf16.mxu0 %v8091_v58 }
0x27b0   :  { %7269 = vmatpush1.bf16.msra.mxu0 %v7232_v60 }
0x27b1   :  { %7270 = vmatprep.subr.bf16.mxu0 %v8091_v58 }
0x27b4   :  { %7272 = vmatpush1.bf16.msra.mxu0 %v7235_v3 }
0x27b5   :  { %7273 = vmatprep.subr.bf16.mxu0 %v8091_v58 }
0x27b8   :  { %7275 = vmatpush1.bf16.msra.mxu0 %v7238_v2 }
0x27b9   :  { %5928 = vmatprep.subr.mxu0 %v8082_v20 }
0x27bc   :  { %5929 = vmatpush1.msra.mxu0 %v5492_v21 }
0x283c   :  { %v5378_v47 = vpop.f32.mrb[40].mxu0 }
0x283d   :  { %v5379_v14 = vadd.f32 %v5378_v47, %v8978_v45  ;;  %v6615_v35 = vpop.f32.mrb[41].mxu0  ;;  %v5837_v47 = vld [vmem:[#allocation26 + $0xf] sm:$0x1] }
0x283f   :  { %v5389_v31 = vrot.slane %v5379_v14, %v9066_v23 }
0x2841   :  { %v5390_v50 = vcombine.high %v5389_v31, %v5389_v31  ;;  %v5397_v48 = vrot.slane %v5389_v31, %v9066_v23 }
0x2842   :  { %v5579_v13 = vpop.f32.mrb[46].mxu1 }
0x2843   :  { %v5404_v33 = vrot.slane %v5390_v50, %v9066_v23  ;;  %5407 = vst.msk [vmem:[#allocation35 + $0x5] sm:$0x1] %vm3272_vm8, %v5397_v48  ;;  %v5580_v42 = vadd.f32 %v5579_v13, %v5498_v16  ;;  %v5581_v36 = vpop.f32.mrb[47].mxu1  ;;  %v5878_v13 = vld [vmem:[#allocation29] sm:$0x7] }
0x2844   :  { %v5582_v32 = vadd.f32 %v5581_v36, %v5502_v49 }
0x2845   :  { %5408 = vst.msk [vmem:[#allocation35 + $0xd] sm:$0x1] %vm3272_vm8, %v5404_v33  ;;  %7515 = vtanh.f32 %v5580_v42  ;;  %v6227_v43 = vmul.f32 -1.442695, %v5580_v42  ;;  %v5883_v33 = vrot.slane %v5878_v13, %v8988_v54 }
0x2846   :  { %7517 = vtanh.f32 %v5582_v32  ;;  %v6228_v38 = vmul.f32 -1.442695, %v5582_v32 }
0x284f   :  { %v7516_v45 = vpop.eup %7515 }
0x2850   :  { %v7518_v63 = vpop.eup %7517  ;;  %5677 = vrot.lane.b32.xlu0 %v7516_v45, %s8088_s29  ;;  %v5726_v45 = vld [vmem:[#allocation31] sm:$0xff] }
0x2851   :  { %5694 = vrot.lane.b32.xlu1 %v7518_v63, %s8088_s29  ;;  %v5727_v63 = vld [vmem:[#allocation31 + $0x8] sm:$0xff] }
0x2866   :  { %v5650_v55 = vpop.f32.mrb[42].mxu0 }
0x2867   :  { %v5651_v17 = vadd.f32 %v5650_v55, %v5506_v8  ;;  %v5652_v57 = vpop.f32.mrb[43].mxu0  ;;  %v7241_v8 = vpack.c.bf16 %v5727_v63, %v5726_v45 }
0x2869   :  { %7519 = vtanh.f32 %v5651_v17  ;;  %v6229_v34 = vmul.f32 -1.442695, %v5651_v17  ;;  %7242 = vmatpush3.bf16.msra.mxu1 %v7241_v8 }
0x286a   :  { %7521 = vpow2.f32 %v6227_v43  ;;  %7243 = vmatprep.subr.bf16.mxu1 %v8091_v58  ;;  %v5728_v43 = vld [vmem:[#allocation31 + $0x10] sm:$0xff] }
0x286b   :  { %7523 = vpow2.f32 %v6228_v38  ;;  %v5729_v38 = vld [vmem:[#allocation31 + $0x18] sm:$0xff] }
0x286c   :  { %v7244_v54 = vpack.c.bf16 %v5729_v38, %v5728_v43 }
0x286e   :  { %7245 = vmatpush3.bf16.msra.mxu1 %v7244_v54 }
0x286f   :  { %7276 = vmatprep.subr.bf16.mxu1 %v8091_v58 }
0x2873   :  { %v7520_v19 = vpop.eup %7519 }
0x2874   :  { %5711 = vrot.lane.b32.xlu0 %v7520_v19, %s8088_s29  ;;  %v7522_v41 = vpop.eup %7521 }
0x2875   :  { %v7524_v1 = vpop.eup %7523  ;;  %v5663_v27 = vadd.f32 1.0, %v7522_v41 }
0x2876   :  { %v5664_v51 = vadd.f32 1.0, %v7524_v1 }
0x2877   :  { %7525 = vrcp.f32 %v5663_v27 }
0x2878   :  { %7527 = vrcp.f32 %v5664_v51 }
0x2879   :  { %7529 = vpow2.f32 %v6229_v34 }
0x2881   :  { %v7526_v10 = vpop.eup %7525 }
0x2882   :  { %v7528_v28 = vpop.eup %7527  ;;  %v5675_v22 = vmul.f32 %v7526_v10, %v9583_v61 }
0x2883   :  { %v7530_v18 = vpop.eup %7529  ;;  %v5692_v15 = vmul.f32 %v7528_v28, %v9592_v53 }
0x2884   :  { %v5665_v56 = vadd.f32 1.0, %v7530_v18 }
0x2886   :  { %7531 = vrcp.f32 %v5665_v56 }
0x2890   :  { %v7532_v62 = vpop.eup %7531 }
0x2891   :  { %v5709_v60 = vmul.f32 %v7532_v62, %v9588_v11  ;;  %v5840_v11 = vrot.slane %v5837_v47, 7 }
0x2893   :  { %v5841_v14 = vsel %vm3172_vm7, %v5840_v11, %v5836_v25 }
0x28c2   :  { %v5678_v24 = vpop.permute.xlu0 %5677 }
0x28c3   :  { %v5680_v26 = vmul.f32 %v7526_v10, %v5678_v24  ;;  %v5695_v12 = vpop.permute.xlu1 %5694 }
0x28c4   :  { %v5697_v37 = vmul.f32 %v7528_v28, %v5695_v12 }
0x28c5   :  { %5682 = vrot.lane.b32.xlu1 %v5680_v26, %s8092_s1 }
0x28c6   :  { %5699 = vrot.lane.b32.xlu0 %v5697_v37, %s8092_s1 }
0x28e6   :  { %v5712_v29 = vpop.permute.xlu0 %5711 }
0x28e7   :  { %v5714_v40 = vmul.f32 %v7532_v62, %v5712_v29 }
0x28e9   :  { %5716 = vrot.lane.b32.xlu1 %v5714_v40, %s8092_s1 }
0x2937   :  { %v5683_v59 = vpop.permute.xlu1 %5682 }
0x2938   :  { %v5685_v44 = vadd.f32 %v5683_v59, %v5675_v22  ;;  %v5700_v39 = vpop.permute.xlu0 %5699 }
0x2939   :  { %v5702_v4 = vadd.f32 %v5700_v39, %v5692_v15 }
0x293a   :  { %7533 = vtanh.f32 %v5685_v44 }
0x293b   :  { %7535 = vtanh.f32 %v5702_v4 }
0x2944   :  { %v7534_v7 = vpop.eup %7533 }
0x2945   :  { %v7536_v30 = vpop.eup %7535  ;;  %5688 = vrot.lane.b32.xlu0 %v7534_v7, %s8088_s29 }
0x2946   :  { %5705 = vrot.lane.b32.xlu1 %v7536_v30, %s8088_s29 }
0x295b   :  { %v5717_v46 = vpop.permute.xlu1 %5716 }
0x295c   :  { %v5719_v6 = vadd.f32 %v5717_v46, %v5709_v60 }
0x295e   :  { %7537 = vtanh.f32 %v5719_v6 }
0x2968   :  { %v7538_v61 = vpop.eup %7537 }
0x2969   :  { %5722 = vrot.lane.b32.xlu0 %v7538_v61, %s8088_s29 }
0x29b7   :  { %v5689_v53 = vpop.permute.xlu0 %5688 }
0x29b8   :  { %v5691_v3 = vmul.f32 %v7526_v10, %v5689_v53  ;;  %v5706_v0 = vpop.permute.xlu1 %5705 }
0x29b9   :  { %v5708_v5 = vmul.f32 %v7528_v28, %v5706_v0 }
0x29ba   :  { %5844 = vrot.lane.b32.xlu1 %v5691_v3, %s8090_s17 }
0x29bb   :  { %5848 = vrot.lane.b32.xlu0 %v5708_v5, %s8059_s8 }
0x29db   :  { %v5723_v2 = vpop.permute.xlu0 %5722 }
0x29dc   :  { %v5725_v21 = vmul.f32 %v7532_v62, %v5723_v2 }
0x29de   :  { %5851 = vrot.lane.b32.xlu1 %v5725_v21, %s8093_s2 }
0x2a2c   :  { %v5845_v35 = vpop.permute.xlu1 %5844 }
0x2a2d   :  { %v5854_v31 = vsel %vm2848_vm4, %v5841_v14, %v5845_v35  ;;  %v5849_v16 = vpop.permute.xlu0 %5848 }
0x2a2e   :  { %v5855_v48 = vsel %vm2850_vm5, %v5854_v31, %v5849_v16 }
0x2a50   :  { %v5852_v49 = vpop.permute.xlu1 %5851 }
0x2a51   :  { %v5856_v50 = vsel %vm861_vm3, %v5849_v16, %v5852_v49 }
0x2a52   :  { %6231 = vmatprep.mubr.msk.f32.mxu0 %vm2933_vm6, %v5856_v50 }
0x2a53   :  { %5953 = vmatmul.mubr.f32.vlgmr.msra.gmra.mrb[44].mxu0 %v5855_v48 }
0x2b26   :  { %v5954_v42 = vpop.f32.mrb[44].mxu0 }
0x2b27   :  { %v5955_v36 = vadd.f32 %v5954_v42, %v5883_v33  ;;  %v5956_v32 = vpop.f32.mrb[45].mxu0 }
0x2b29   :  { %7539 = vtanh.f32 %v5955_v36  ;;  %v6232_v17 = vmul.f32 -1.442695, %v5955_v36 }
0x2b2b   :  { %7541 = vpow2.f32 %v6232_v17 }
0x2b33   :  { %v7540_v55 = vpop.eup %7539 }
0x2b34   :  { %5967 = vrot.lane.b32.xlu0 %v7540_v55, %s8088_s29 }
0x2b35   :  { %v7542_v57 = vpop.eup %7541 }
0x2b36   :  { %v5961_v19 = vadd.f32 1.0, %v7542_v57 }
0x2b38   :  { %7543 = vrcp.f32 %v5961_v19 }
0x2b42   :  { %v7544_v41 = vpop.eup %7543 }
0x2b43   :  { %v5965_v51 = vmul.f32 %v7544_v41, %v5719_v6 }
0x2ba6   :  { %v5968_v1 = vpop.permute.xlu0 %5967 }
0x2ba7   :  { %v5970_v27 = vmul.f32 %v7544_v41, %v5968_v1 }
0x2ba9   :  { %5972 = vrot.lane.b32.xlu1 %v5970_v27, %s8092_s1 }
0x2bad   :  { %5731 = vrot.lane.b32.xlu1 %v5725_v21, %s8092_s1 }
0x2c1b   :  { %v5973_v10 = vpop.permute.xlu1 %5972 }
0x2c1c   :  { %v5975_v24 = vadd.f32 %v5973_v10, %v5965_v51 }
0x2c1e   :  { %7545 = vtanh.f32 %v5975_v24 }
0x2c1f   :  { %v5732_v28 = vpop.permute.xlu1 %5731 }
0x2c20   :  { %6625 = vmatmul.mubr.msk.f32.vlgmr.msra.gmra.mrb[48].mxu1 %vm469_vm1, %v5732_v28 }
0x2c21   :  { %7278 = vmatpush3.bf16.msra.mxu1 %v7241_v8  ;;  %6635 = vmatprep.mubr.msk.f32.mxu1 %vm8083_vm2, %v8082_v20 }
0x2c22   :  { %7279 = vmatprep.subr.bf16.mxu1 %v8091_v58 }
0x2c25   :  { %7281 = vmatpush3.bf16.msra.mxu1 %v7244_v54 }
0x2c28   :  { %v7546_v26 = vpop.eup %7545 }
0x2c29   :  { %5978 = vrot.lane.b32.xlu0 %v7546_v26, %s8088_s29  ;;  %s8095_s29 = smov [#allocation35]  }
0x2c2a   :  { %s6097_s20 = sshll.u32 %s8095_s29, 4  ;;  %s6098_s20 = int_to_ptr.vmem [resolvable:$true] %s6097_s20 }
0x2c2b   :  { %s8009_s18 = scalar_lea.vmem %s6098_s20, 256  ;;  %p8014_p1 = scmp.lt.s32.totalorder %s6098_s20, %s6098_s20 }
0x2c2c   :  { %p8010_p0 = scmp.ne.s32.totalorder %s6098_s20, %s8009_s18  ;;  %p8015_p2 = scmp.lt.s32.totalorder %s8009_s18, %s8009_s18 }
0x2c2e   :  { %p8016_p3 = por %p8015_p2, %p8014_p1 }
0x2c30   :  { %p8017_p4 = pnand %p8016_p3, %p8010_p0 }
0x2c9b   :  { %v5979_v12 = vpop.permute.xlu0 %5978 }
0x2c9c   :  { %v5981_v37 = vmul.f32 %v7544_v41, %v5979_v12 }
0x2c9e   :  { %5987 = vrot.lane.b32.xlu0 %v5981_v37, %s8092_s1 }
0x2cf3   :  { %v5805_v34 = vpop.f32.mrb[48].mxu1 }
0x2cf4   :  { %v5806_v18 = vadd.f32 %v5805_v34, %v8982_v9  ;;  %v6626_v56 = vpop.f32.mrb[49].mxu1 }
0x2cf6   :  { %v5816_v62 = vrot.slane %v5806_v18, %v9066_v23 }
0x2cf8   :  { %v5817_v29 = vcombine.high %v5816_v62, %v5816_v62  ;;  %v5824_v40 = vrot.slane %v5816_v62, %v9066_v23 }
0x2cfa   :  { %v5831_v20 = vrot.slane %v5817_v29, %v9066_v23  ;;  %5834 = vst.msk [vmem:[#allocation35 + $0x6] sm:$0x1] %vm3272_vm8, %v5824_v40 }
0x2cfc   :  { %5835 = vst.msk [vmem:[#allocation35 + $0xe] sm:$0x1] %vm3272_vm8, %v5831_v20 }
0x2d10   :  { %v5988_v58 = vpop.permute.xlu0 %5987 }
0x2d11   :  { %6636 = vmatmul.mubr.msk.f32.vlgmr.msra.gmra.mrb[50].mxu1 %vm469_vm1, %v5988_v58 }
0x2de4   :  { %v6061_v22 = vpop.f32.mrb[50].mxu1 }
0x2de5   :  { %v6062_v59 = vadd.f32 %v6061_v22, %v8985_v52  ;;  %v6637_v15 = vpop.f32.mrb[51].mxu1 }
0x2de7   :  { %v6072_v9 = vrot.slane %v6062_v59, %v9066_v23 }
0x2de9   :  { %v6073_v44 = vcombine.high %v6072_v9, %v6072_v9  ;;  %v6080_v39 = vrot.slane %v6072_v9, %v9066_v23 }
0x2deb   :  { %v6087_v4 = vrot.slane %v6073_v44, %v9066_v23  ;;  %6090 = vst.msk [vmem:[#allocation35 + $0x7] sm:$0x1] %vm3272_vm8, %v6080_v39 }
0x2ded   :  { %6091 = vst.msk [vmem:[#allocation35 + $0xf] sm:$0x1] %vm3272_vm8, %v6087_v4 }
0x2dee   :  { %8020 = shalt.err (!%p8017_p4)
}
0x2def   :  { %s9791_s16 = sld [smem:[#allocation61_spill]] }
0x2df5   :  { %s8021_s3 = scalar_lea.hbm %s9791_s16, 256 }
0x2df6   :  { %p8022_p5 = scmp.ne.s32.totalorder %s9791_s16, %s8021_s3  ;;  %p8025_p6 = scmp.lt.u32.totalorder %s8021_s3, %s9791_s16 }
0x2df8   :  { %p8027_p7 = pnand %p8025_p6, %p8022_p5 }
0x2dfa   :  { %8030 = shalt.err (!%p8027_p7)
}
0x2dfb   :  { %6103 = dma.vmem_to_hbm [thread:$0]  %s6098_s20, 256, %s9791_s16, [#allocation4], %s8058_s28, %s8058_s28, %s8059_s8  }
0x2dfc   :  { %8053 = dma.done.wait [#allocation4], 256  }
0x2dfd   :  { %8054 = vsyncadd [#allocation4], 4294967040 }
0x2dfe   :  { %6107 = vsyncpa [#allocation3], 1 }
0x2dff   :  { %6108 = vsyncpa [#allocation6], 1 }
0x2e00   :  { %6109 = vsyncpa [#allocation9], 1 }
0x2e01   :  { %6110 = vsyncpa [#allocation12], 1 }
0x2e02   :  { %6111 = vsyncpa [#allocation15], 1 }
0x2e03   :  { %6112 = vsyncpa [#allocation18], 1 }
0x2e04   :  { %6113 = vsyncpa [#allocation21], 1 }
0x2e05   :  { %6114 = vsyncpa [#allocation24], 1 }
0x2e06   :  { %6115 = vsyncpa [#allocation27], 1 }
0x2e07   :  { %6116 = vsyncpa [#allocation30], 1 }
0x2e08   :  { %6117 = vsyncpa [#allocation33], 1 }
0x2e09   :  { %6118 = vsyncpa [#allocation4], 1 }

</bundles_post_ra>
